<compile_context>
chip_gen: v7x
topology: tpu7x:2x2x1
jax: 0.10.0
libtpu: 0.0.40
codegen_flags: <defaults>
</compile_context>

<pallas_src>
import jax
import jax.numpy as jnp
from jax.experimental import pallas as pl
from jax.experimental.pallas import tpu as pltpu

D = 1536
HIDDEN = 32          # hidden_channels (= per-head out_channels of TransformerConv)
HEADS = 4
OUT_SIZE = 300
LIN_MID = 1024

QKV_W = HEADS * HIDDEN            # 128 columns per projection (q / k / v)
QKVS_RAW = 3 * QKV_W + HIDDEN     # 416 = q | k | v | skip
QKVS_PAD = 512                    # padded to 4 x 128 for a lane-dense matmul output
HID_PAD = 128                     # padded text hidden width (32 -> 128)
OUT_PAD = 384                     # padded output width  (300 -> 3 x 128)
SCALE = 1.0 / (HIDDEN ** 0.5)


# --------------------------------------------------------------- single fused TextGCN kernel
def _textgcn_kernel(x_graph_ref, adj_ref, x_text_ref,
                    wqkvs_ref, bqkvs_ref,
                    wlin_ref, blin_ref, wlin1_ref, blin1_ref,
                    wtext_ref, btext_ref, wtext1_ref, btext1_ref,
                    graph_out_ref, text_out_ref):
    n = x_graph_ref.shape[0]

    # ------------------------------ graph branch ------------------------------
    xg_bf = x_graph_ref[...].astype(jnp.bfloat16)
    # fused projection: columns = [q(128) | k(128) | v(128) | skip(32) | pad(96)]
    qkvs = jnp.dot(xg_bf, wqkvs_ref[...],
                   preferred_element_type=jnp.float32) + bqkvs_ref[...]        # (N, 512) f32

    mask = adj_ref[...] > 0.5                                                  # mask[i,j]=1 iff edge j->i

    agg = jnp.zeros((n, HIDDEN), jnp.float32)
    # TODO(synk): heads kept as an unrolled Python loop (8 tiny 32x32 MXU ops); batching
    #             them needs an in-kernel (N,128)->(4,N,32) relayout that is not worth the
    #             lowering risk while the kernel remains DMA/launch bound.
    for h in range(HEADS):
        qh = qkvs[:, h * HIDDEN:(h + 1) * HIDDEN]                              # (N, 32) f32
        kh = qkvs[:, QKV_W + h * HIDDEN:QKV_W + (h + 1) * HIDDEN]
        vh = qkvs[:, 2 * QKV_W + h * HIDDEN:2 * QKV_W + (h + 1) * HIDDEN]
        s = jax.lax.dot_general(qh, kh, (((1,), (1,)), ((), ())),
                                preferred_element_type=jnp.float32) * SCALE    # (N_tgt, N_src)
        s_m = jnp.where(mask, s, -1e30)
        row_max = jnp.max(s_m, axis=-1, keepdims=True)
        p = jnp.where(mask, jnp.exp(s_m - row_max), 0.0)
        denom = jnp.sum(p, axis=-1, keepdims=True)
        # nodes with no incoming edges aggregate to 0 (matches PyG segment softmax + empty sum)
        alpha = p / jnp.maximum(denom, 1e-30)
        # TODO(synk): attention dropout (p=0.05) is training-only; identity at inference.
        agg = agg + jnp.dot(alpha, vh, preferred_element_type=jnp.float32)

    skip = qkvs[:, 3 * QKV_W:3 * QKV_W + HIDDEN]                               # (N, 32)
    xg = jnp.maximum(agg * (1.0 / HEADS) + skip, 0.0)   # concat=False: mean over heads + skip + relu

    h1 = jnp.maximum(jnp.dot(xg.astype(jnp.bfloat16), wlin_ref[...],
                             preferred_element_type=jnp.float32) + blin_ref[...], 0.0)   # (N, 1024)
    h2 = jnp.maximum(jnp.dot(h1.astype(jnp.bfloat16), wlin1_ref[...],
                             preferred_element_type=jnp.float32) + blin1_ref[...], 0.0)  # (N, 384)
    # F.dropout(p=0.5, training=False) -> identity; mean over nodes fused into the epilogue
    graph_out_ref[...] = jnp.mean(h2, axis=0, keepdims=True)                   # (1, 384)

    # ------------------------------- text branch ------------------------------
    xt_bf = x_text_ref[...].astype(jnp.bfloat16)
    ht = jnp.maximum(jnp.dot(xt_bf, wtext_ref[...],
                             preferred_element_type=jnp.float32) + btext_ref[...], 0.0)  # (T, 128)
    yt = jnp.dot(ht.astype(jnp.bfloat16), wtext1_ref[...],
                 preferred_element_type=jnp.float32) + btext1_ref[...]                   # (T, 384)
    # F.dropout(p=0.5, training=False) -> identity
    text_out_ref[...] = jnp.maximum(yt, 0.0)


def textgcn_pallas(packed, x_text, x_graph, adj):
    T = x_text.shape[0]
    n_in = 13
    vmem_spec = pl.BlockSpec(memory_space=pltpu.MemorySpace.VMEM)   # whole array, single buffer
    graph_pad, text_pad = pl.pallas_call(
        _textgcn_kernel,
        out_shape=(jax.ShapeDtypeStruct((1, OUT_PAD), jnp.float32),
                   jax.ShapeDtypeStruct((T, OUT_PAD), jnp.float32)),
        in_specs=[vmem_spec] * n_in,
        out_specs=(vmem_spec, vmem_spec),
        compiler_params=pltpu.CompilerParams(vmem_limit_bytes=32 * 1024 * 1024),
    )(x_graph, adj, x_text,
      packed["wqkvs"], packed["bqkvs"],
      packed["w_lin"], packed["b_lin"], packed["w_lin1_p"], packed["b_lin1_p"],
      packed["w_text_p"], packed["b_text_p"], packed["w_text1_p"], packed["b_text1_p"])
    return graph_pad, text_pad


# ------------------------------------------------------------------------------ params packing
def pack_params(p):
    """Concatenate q|k|v|skip weights, zero-pad to lane-dense widths, and store every
    weight matrix in bfloat16 (biases stay f32). Done once, outside the forward."""
    c = p["conv1"]
    wqkvs = jnp.concatenate([c["wq"], c["wk"], c["wv"], c["wskip"]], axis=1)    # (D, 416)
    wqkvs = jnp.pad(wqkvs, ((0, 0), (0, QKVS_PAD - QKVS_RAW))).astype(jnp.bfloat16)  # (D, 512)
    bqkvs = jnp.concatenate([c["bq"], c["bk"], c["bv"], c["bskip"]])
    bqkvs = jnp.pad(bqkvs, (0, QKVS_PAD - QKVS_RAW)).reshape(1, QKVS_PAD)

    w_lin = p["w_lin"].astype(jnp.bfloat16)                                     # (32, 1024)
    b_lin = p["b_lin"].reshape(1, LIN_MID)
    w_lin1_p = jnp.pad(p["w_lin1"], ((0, 0), (0, OUT_PAD - OUT_SIZE))).astype(jnp.bfloat16)  # (1024, 384)
    b_lin1_p = jnp.pad(p["b_lin1"], (0, OUT_PAD - OUT_SIZE)).reshape(1, OUT_PAD)

    w_text_p = jnp.pad(p["w_text"], ((0, 0), (0, HID_PAD - HIDDEN))).astype(jnp.bfloat16)    # (D, 128)
    b_text_p = jnp.pad(p["b_text"], (0, HID_PAD - HIDDEN)).reshape(1, HID_PAD)
    w_text1_p = jnp.pad(p["w_text1"],
                        ((0, HID_PAD - HIDDEN), (0, OUT_PAD - OUT_SIZE))).astype(jnp.bfloat16)  # (128, 384)
    b_text1_p = jnp.pad(p["b_text1"], (0, OUT_PAD - OUT_SIZE)).reshape(1, OUT_PAD)

    return {
        "wqkvs": wqkvs, "bqkvs": bqkvs,
        "w_lin": w_lin, "b_lin": b_lin,
        "w_lin1_p": w_lin1_p, "b_lin1_p": b_lin1_p,
        "w_text_p": w_text_p, "b_text_p": b_text_p,
        "w_text1_p": w_text1_p, "b_text1_p": b_text1_p,
    }


def build_adj(edge_index, num_nodes):
    """Dense incoming-edge mask adj[i, j] = 1 iff edge j -> i ("source_to_target" flow).
    Built ONCE per graph, outside the per-forward jit (perf-review hoist).
    TODO(synk): duplicate edges in edge_index each get their own softmax weight in PyG;
                the dense mask collapses them (no duplicates in the synthetic graph)."""
    return jnp.zeros((num_nodes, num_nodes), jnp.float32).at[
        edge_index[1], edge_index[0]].set(1.0)


# --------------------------------------------------------------------------------- full model
def textgcn_forward(packed, x_text, x_graph, adj, edge_attr=None, place_node=None):
    del edge_attr, place_node  # unused in the reference forward pass
    graph_pad, text_pad = textgcn_pallas(packed, x_text, x_graph, adj)
    # single :300 slice per output, done once at the final consumer
    return text_pad[:, :OUT_SIZE], graph_pad[0, :OUT_SIZE]


def init_params(key):
    def dense(k, fan_in, fan_out):
        kw, kb = jax.random.split(k)
        scale = 1.0 / (fan_in ** 0.5)
        w = jax.random.uniform(kw, (fan_in, fan_out), jnp.float32, -scale, scale)
        b = jax.random.uniform(kb, (fan_out,), jnp.float32, -scale, scale)
        return w, b

    ks = jax.random.split(key, 10)
    wq, bq = dense(ks[0], D, HEADS * HIDDEN)
    wk, bk = dense(ks[1], D, HEADS * HIDDEN)
    wv, bv = dense(ks[2], D, HEADS * HIDDEN)
    wskip, bskip = dense(ks[3], D, HIDDEN)
    w_lin, b_lin = dense(ks[4], HIDDEN, LIN_MID)
    w_lin1, b_lin1 = dense(ks[5], LIN_MID, OUT_SIZE)
    w_text, b_text = dense(ks[6], D, HIDDEN)
    w_text1, b_text1 = dense(ks[7], HIDDEN, OUT_SIZE)
    return {
        "conv1": {"wq": wq, "bq": bq, "wk": wk, "bk": bk, "wv": wv, "bv": bv,
                  "wskip": wskip, "bskip": bskip},
        "w_lin": w_lin, "b_lin": b_lin,
        "w_lin1": w_lin1, "b_lin1": b_lin1,
        "w_text": w_text, "b_text": b_text,
        "w_text1": w_text1, "b_text1": b_text1,
    }
    # NOTE: transformerConv2 parameters are omitted on purpose: never used in forward().


if __name__ == "__main__":
    N_NODES, N_TEXT, N_EDGES = 32, 8, 96

    key = jax.random.PRNGKey(0)
    k_text, k_graph, k_src, k_dst, k_param = jax.random.split(key, 5)

    x_text = jax.random.normal(k_text, (N_TEXT, D), jnp.float32)
    x_graph = jax.random.normal(k_graph, (N_NODES, D), jnp.float32)
    edge_src = jax.random.randint(k_src, (N_EDGES,), 0, N_NODES, dtype=jnp.int32)
    edge_dst = jax.random.randint(k_dst, (N_EDGES,), 0, N_NODES, dtype=jnp.int32)
    edge_index = jnp.stack([edge_src, edge_dst], axis=0)   # [2, E], row0=src, row1=dst

    params = init_params(k_param)
    packed = pack_params(params)                 # one-time: pad + bf16-cast weights
    adj = build_adj(edge_index, N_NODES)         # one-time: dense mask, hoisted out of the jit

    # TODO(synk): for repeated inference the packed weights could be pinned VMEM-resident via a
    #             cross-call resident-weight pattern; kept in HBM here for portability.
    fwd = jax.jit(textgcn_forward)
    x_text_out, x_graph_out = fwd(packed, x_text, x_graph, adj)
    jax.block_until_ready((x_text_out, x_graph_out))

    assert x_text_out.shape == (N_TEXT, OUT_SIZE)
    assert x_graph_out.shape == (OUT_SIZE,)
    assert bool(jnp.isfinite(x_text_out).all()) and bool(jnp.isfinite(x_graph_out).all())
    print("KERNEL_OK")
</pallas_src>

<mosaic_0001>
module attributes {stable_mosaic.version = 11 : i64} {
  func.func @_textgcn_kernel(%arg0: memref<32x1536xf32, #tpu.memory_space<vmem>>, %arg1: memref<32x32xf32, #tpu.memory_space<vmem>>, %arg2: memref<8x1536xf32, #tpu.memory_space<vmem>>, %arg3: memref<1536x512xbf16, #tpu.memory_space<vmem>>, %arg4: memref<1x512xf32, #tpu.memory_space<vmem>>, %arg5: memref<32x1024xbf16, #tpu.memory_space<vmem>>, %arg6: memref<1x1024xf32, #tpu.memory_space<vmem>>, %arg7: memref<1024x384xbf16, #tpu.memory_space<vmem>>, %arg8: memref<1x384xf32, #tpu.memory_space<vmem>>, %arg9: memref<1536x128xbf16, #tpu.memory_space<vmem>>, %arg10: memref<1x128xf32, #tpu.memory_space<vmem>>, %arg11: memref<128x384xbf16, #tpu.memory_space<vmem>>, %arg12: memref<1x384xf32, #tpu.memory_space<vmem>>, %arg13: memref<1x384xf32, #tpu.memory_space<vmem>>, %arg14: memref<8x384xf32, #tpu.memory_space<vmem>>) attributes {dimension_semantics = [], scalar_prefetch = 0 : i64, scratch_operands = 0 : i64, tpu.core_type = #tpu.core_type<tc>} {
    %c0 = arith.constant 0 : index
    %c0_0 = arith.constant 0 : index
    %0 = vector.load %arg0[%c0, %c0_0] : memref<32x1536xf32, #tpu.memory_space<vmem>>, vector<32x1536xf32>
    %1 = arith.truncf %0 : vector<32x1536xf32> to vector<32x1536xbf16>
    %c0_1 = arith.constant 0 : index
    %c0_2 = arith.constant 0 : index
    %2 = vector.load %arg3[%c0_1, %c0_2] : memref<1536x512xbf16, #tpu.memory_space<vmem>>, vector<1536x512xbf16>
    %cst = arith.constant dense<0.000000e+00> : vector<32x512xf32>
    %3 = tpu.matmul %1, %2, %cst {dimension_numbers = #tpu.dot_dimension_numbers<[1], [0], [0], [1], [0, 0, 1, 1], [], []>} : vector<32x1536xbf16>, vector<1536x512xbf16>, vector<32x512xf32> -> vector<32x512xf32>
    %c0_3 = arith.constant 0 : index
    %c0_4 = arith.constant 0 : index
    %4 = vector.load %arg4[%c0_3, %c0_4] : memref<1x512xf32, #tpu.memory_space<vmem>>, vector<1x512xf32>
    %5 = vector.broadcast %4 : vector<1x512xf32> to vector<32x512xf32>
    %6 = arith.addf %3, %5 : vector<32x512xf32>
    %c0_5 = arith.constant 0 : index
    %c0_6 = arith.constant 0 : index
    %7 = vector.load %arg1[%c0_5, %c0_6] : memref<32x32xf32, #tpu.memory_space<vmem>>, vector<32x32xf32>
    %cst_7 = arith.constant 5.000000e-01 : f32
    %8 = vector.broadcast %cst_7 : f32 to vector<32x32xf32>
    %9 = arith.cmpf ogt, %7, %8 : vector<32x32xf32>
    %cst_8 = arith.constant 0.000000e+00 : f32
    %10 = vector.broadcast %cst_8 : f32 to vector<32x32xf32>
    %11 = vector.extract_strided_slice %6 {offsets = [0, 0], sizes = [32, 32], strides = [1, 1]} : vector<32x512xf32> to vector<32x32xf32>
    %12 = vector.extract_strided_slice %6 {offsets = [0, 128], sizes = [32, 32], strides = [1, 1]} : vector<32x512xf32> to vector<32x32xf32>
    %13 = vector.extract_strided_slice %6 {offsets = [0, 256], sizes = [32, 32], strides = [1, 1]} : vector<32x512xf32> to vector<32x32xf32>
    %cst_9 = arith.constant dense<0.000000e+00> : vector<32x32xf32>
    %14 = tpu.matmul %11, %12, %cst_9 {dimension_numbers = #tpu.dot_dimension_numbers<[1], [1], [0], [0], [0, 0, 1, 0], [], []>} : vector<32x32xf32>, vector<32x32xf32>, vector<32x32xf32> -> vector<32x32xf32>
    %cst_10 = arith.constant 0.176776692 : f32
    %15 = vector.broadcast %cst_10 : f32 to vector<32x32xf32>
    %16 = arith.mulf %14, %15 : vector<32x32xf32>
    %cst_11 = arith.constant -1.000000e+30 : f32
    %17 = vector.broadcast %cst_11 : f32 to vector<32x32xf32>
    %18 = arith.select %9, %16, %17 : vector<32x32xi1>, vector<32x32xf32>
    %cst_12 = arith.constant dense<0xFF800000> : vector<32xf32>
    %19 = vector.multi_reduction <maximumf>, %18, %cst_12 [1] : vector<32x32xf32> to vector<32xf32>
    %20 = vector.shape_cast %19 : vector<32xf32> to vector<32x1xf32>
    %21 = vector.broadcast %20 : vector<32x1xf32> to vector<32x32xf32>
    %22 = arith.subf %18, %21 : vector<32x32xf32>
    %23 = math.exp %22 : vector<32x32xf32>
    %cst_13 = arith.constant 0.000000e+00 : f32
    %24 = vector.broadcast %cst_13 : f32 to vector<32x32xf32>
    %25 = arith.select %9, %23, %24 : vector<32x32xi1>, vector<32x32xf32>
    %cst_14 = arith.constant dense<0.000000e+00> : vector<32xf32>
    %26 = vector.multi_reduction <add>, %25, %cst_14 [1] : vector<32x32xf32> to vector<32xf32>
    %27 = vector.shape_cast %26 : vector<32xf32> to vector<32x1xf32>
    %cst_15 = arith.constant 1.000000e-30 : f32
    %28 = vector.broadcast %cst_15 : f32 to vector<32x1xf32>
    %29 = arith.maximumf %27, %28 : vector<32x1xf32>
    %30 = vector.broadcast %29 : vector<32x1xf32> to vector<32x32xf32>
    %31 = arith.divf %25, %30 : vector<32x32xf32>
    %cst_16 = arith.constant dense<0.000000e+00> : vector<32x32xf32>
    %32 = tpu.matmul %31, %13, %cst_16 {dimension_numbers = #tpu.dot_dimension_numbers<[1], [0], [0], [1], [0, 0, 1, 1], [], []>} : vector<32x32xf32>, vector<32x32xf32>, vector<32x32xf32> -> vector<32x32xf32>
    %33 = arith.addf %10, %32 : vector<32x32xf32>
    %34 = vector.extract_strided_slice %6 {offsets = [0, 32], sizes = [32, 32], strides = [1, 1]} : vector<32x512xf32> to vector<32x32xf32>
    %35 = vector.extract_strided_slice %6 {offsets = [0, 160], sizes = [32, 32], strides = [1, 1]} : vector<32x512xf32> to vector<32x32xf32>
    %36 = vector.extract_strided_slice %6 {offsets = [0, 288], sizes = [32, 32], strides = [1, 1]} : vector<32x512xf32> to vector<32x32xf32>
    %cst_17 = arith.constant dense<0.000000e+00> : vector<32x32xf32>
    %37 = tpu.matmul %34, %35, %cst_17 {dimension_numbers = #tpu.dot_dimension_numbers<[1], [1], [0], [0], [0, 0, 1, 0], [], []>} : vector<32x32xf32>, vector<32x32xf32>, vector<32x32xf32> -> vector<32x32xf32>
    %cst_18 = arith.constant 0.176776692 : f32
    %38 = vector.broadcast %cst_18 : f32 to vector<32x32xf32>
    %39 = arith.mulf %37, %38 : vector<32x32xf32>
    %cst_19 = arith.constant -1.000000e+30 : f32
    %40 = vector.broadcast %cst_19 : f32 to vector<32x32xf32>
    %41 = arith.select %9, %39, %40 : vector<32x32xi1>, vector<32x32xf32>
    %cst_20 = arith.constant dense<0xFF800000> : vector<32xf32>
    %42 = vector.multi_reduction <maximumf>, %41, %cst_20 [1] : vector<32x32xf32> to vector<32xf32>
    %43 = vector.shape_cast %42 : vector<32xf32> to vector<32x1xf32>
    %44 = vector.broadcast %43 : vector<32x1xf32> to vector<32x32xf32>
    %45 = arith.subf %41, %44 : vector<32x32xf32>
    %46 = math.exp %45 : vector<32x32xf32>
    %cst_21 = arith.constant 0.000000e+00 : f32
    %47 = vector.broadcast %cst_21 : f32 to vector<32x32xf32>
    %48 = arith.select %9, %46, %47 : vector<32x32xi1>, vector<32x32xf32>
    %cst_22 = arith.constant dense<0.000000e+00> : vector<32xf32>
    %49 = vector.multi_reduction <add>, %48, %cst_22 [1] : vector<32x32xf32> to vector<32xf32>
    %50 = vector.shape_cast %49 : vector<32xf32> to vector<32x1xf32>
    %cst_23 = arith.constant 1.000000e-30 : f32
    %51 = vector.broadcast %cst_23 : f32 to vector<32x1xf32>
    %52 = arith.maximumf %50, %51 : vector<32x1xf32>
    %53 = vector.broadcast %52 : vector<32x1xf32> to vector<32x32xf32>
    %54 = arith.divf %48, %53 : vector<32x32xf32>
    %cst_24 = arith.constant dense<0.000000e+00> : vector<32x32xf32>
    %55 = tpu.matmul %54, %36, %cst_24 {dimension_numbers = #tpu.dot_dimension_numbers<[1], [0], [0], [1], [0, 0, 1, 1], [], []>} : vector<32x32xf32>, vector<32x32xf32>, vector<32x32xf32> -> vector<32x32xf32>
    %56 = arith.addf %33, %55 : vector<32x32xf32>
    %57 = vector.extract_strided_slice %6 {offsets = [0, 64], sizes = [32, 32], strides = [1, 1]} : vector<32x512xf32> to vector<32x32xf32>
    %58 = vector.extract_strided_slice %6 {offsets = [0, 192], sizes = [32, 32], strides = [1, 1]} : vector<32x512xf32> to vector<32x32xf32>
    %59 = vector.extract_strided_slice %6 {offsets = [0, 320], sizes = [32, 32], strides = [1, 1]} : vector<32x512xf32> to vector<32x32xf32>
    %cst_25 = arith.constant dense<0.000000e+00> : vector<32x32xf32>
    %60 = tpu.matmul %57, %58, %cst_25 {dimension_numbers = #tpu.dot_dimension_numbers<[1], [1], [0], [0], [0, 0, 1, 0], [], []>} : vector<32x32xf32>, vector<32x32xf32>, vector<32x32xf32> -> vector<32x32xf32>
    %cst_26 = arith.constant 0.176776692 : f32
    %61 = vector.broadcast %cst_26 : f32 to vector<32x32xf32>
    %62 = arith.mulf %60, %61 : vector<32x32xf32>
    %cst_27 = arith.constant -1.000000e+30 : f32
    %63 = vector.broadcast %cst_27 : f32 to vector<32x32xf32>
    %64 = arith.select %9, %62, %63 : vector<32x32xi1>, vector<32x32xf32>
    %cst_28 = arith.constant dense<0xFF800000> : vector<32xf32>
    %65 = vector.multi_reduction <maximumf>, %64, %cst_28 [1] : vector<32x32xf32> to vector<32xf32>
    %66 = vector.shape_cast %65 : vector<32xf32> to vector<32x1xf32>
    %67 = vector.broadcast %66 : vector<32x1xf32> to vector<32x32xf32>
    %68 = arith.subf %64, %67 : vector<32x32xf32>
    %69 = math.exp %68 : vector<32x32xf32>
    %cst_29 = arith.constant 0.000000e+00 : f32
    %70 = vector.broadcast %cst_29 : f32 to vector<32x32xf32>
    %71 = arith.select %9, %69, %70 : vector<32x32xi1>, vector<32x32xf32>
    %cst_30 = arith.constant dense<0.000000e+00> : vector<32xf32>
    %72 = vector.multi_reduction <add>, %71, %cst_30 [1] : vector<32x32xf32> to vector<32xf32>
    %73 = vector.shape_cast %72 : vector<32xf32> to vector<32x1xf32>
    %cst_31 = arith.constant 1.000000e-30 : f32
    %74 = vector.broadcast %cst_31 : f32 to vector<32x1xf32>
    %75 = arith.maximumf %73, %74 : vector<32x1xf32>
    %76 = vector.broadcast %75 : vector<32x1xf32> to vector<32x32xf32>
    %77 = arith.divf %71, %76 : vector<32x32xf32>
    %cst_32 = arith.constant dense<0.000000e+00> : vector<32x32xf32>
    %78 = tpu.matmul %77, %59, %cst_32 {dimension_numbers = #tpu.dot_dimension_numbers<[1], [0], [0], [1], [0, 0, 1, 1], [], []>} : vector<32x32xf32>, vector<32x32xf32>, vector<32x32xf32> -> vector<32x32xf32>
    %79 = arith.addf %56, %78 : vector<32x32xf32>
    %80 = vector.extract_strided_slice %6 {offsets = [0, 96], sizes = [32, 32], strides = [1, 1]} : vector<32x512xf32> to vector<32x32xf32>
    %81 = vector.extract_strided_slice %6 {offsets = [0, 224], sizes = [32, 32], strides = [1, 1]} : vector<32x512xf32> to vector<32x32xf32>
    %82 = vector.extract_strided_slice %6 {offsets = [0, 352], sizes = [32, 32], strides = [1, 1]} : vector<32x512xf32> to vector<32x32xf32>
    %cst_33 = arith.constant dense<0.000000e+00> : vector<32x32xf32>
    %83 = tpu.matmul %80, %81, %cst_33 {dimension_numbers = #tpu.dot_dimension_numbers<[1], [1], [0], [0], [0, 0, 1, 0], [], []>} : vector<32x32xf32>, vector<32x32xf32>, vector<32x32xf32> -> vector<32x32xf32>
    %cst_34 = arith.constant 0.176776692 : f32
    %84 = vector.broadcast %cst_34 : f32 to vector<32x32xf32>
    %85 = arith.mulf %83, %84 : vector<32x32xf32>
    %cst_35 = arith.constant -1.000000e+30 : f32
    %86 = vector.broadcast %cst_35 : f32 to vector<32x32xf32>
    %87 = arith.select %9, %85, %86 : vector<32x32xi1>, vector<32x32xf32>
    %cst_36 = arith.constant dense<0xFF800000> : vector<32xf32>
    %88 = vector.multi_reduction <maximumf>, %87, %cst_36 [1] : vector<32x32xf32> to vector<32xf32>
    %89 = vector.shape_cast %88 : vector<32xf32> to vector<32x1xf32>
    %90 = vector.broadcast %89 : vector<32x1xf32> to vector<32x32xf32>
    %91 = arith.subf %87, %90 : vector<32x32xf32>
    %92 = math.exp %91 : vector<32x32xf32>
    %cst_37 = arith.constant 0.000000e+00 : f32
    %93 = vector.broadcast %cst_37 : f32 to vector<32x32xf32>
    %94 = arith.select %9, %92, %93 : vector<32x32xi1>, vector<32x32xf32>
    %cst_38 = arith.constant dense<0.000000e+00> : vector<32xf32>
    %95 = vector.multi_reduction <add>, %94, %cst_38 [1] : vector<32x32xf32> to vector<32xf32>
    %96 = vector.shape_cast %95 : vector<32xf32> to vector<32x1xf32>
    %cst_39 = arith.constant 1.000000e-30 : f32
    %97 = vector.broadcast %cst_39 : f32 to vector<32x1xf32>
    %98 = arith.maximumf %96, %97 : vector<32x1xf32>
    %99 = vector.broadcast %98 : vector<32x1xf32> to vector<32x32xf32>
    %100 = arith.divf %94, %99 : vector<32x32xf32>
    %cst_40 = arith.constant dense<0.000000e+00> : vector<32x32xf32>
    %101 = tpu.matmul %100, %82, %cst_40 {dimension_numbers = #tpu.dot_dimension_numbers<[1], [0], [0], [1], [0, 0, 1, 1], [], []>} : vector<32x32xf32>, vector<32x32xf32>, vector<32x32xf32> -> vector<32x32xf32>
    %102 = arith.addf %79, %101 : vector<32x32xf32>
    %103 = vector.extract_strided_slice %6 {offsets = [0, 384], sizes = [32, 32], strides = [1, 1]} : vector<32x512xf32> to vector<32x32xf32>
    %cst_41 = arith.constant 2.500000e-01 : f32
    %104 = vector.broadcast %cst_41 : f32 to vector<32x32xf32>
    %105 = arith.mulf %102, %104 : vector<32x32xf32>
    %106 = arith.addf %105, %103 : vector<32x32xf32>
    %cst_42 = arith.constant 0.000000e+00 : f32
    %107 = vector.broadcast %cst_42 : f32 to vector<32x32xf32>
    %108 = arith.maximumf %106, %107 : vector<32x32xf32>
    %109 = arith.truncf %108 : vector<32x32xf32> to vector<32x32xbf16>
    %c0_43 = arith.constant 0 : index
    %c0_44 = arith.constant 0 : index
    %110 = vector.load %arg5[%c0_43, %c0_44] : memref<32x1024xbf16, #tpu.memory_space<vmem>>, vector<32x1024xbf16>
    %cst_45 = arith.constant dense<0.000000e+00> : vector<32x1024xf32>
    %111 = tpu.matmul %109, %110, %cst_45 {dimension_numbers = #tpu.dot_dimension_numbers<[1], [0], [0], [1], [0, 0, 1, 1], [], []>} : vector<32x32xbf16>, vector<32x1024xbf16>, vector<32x1024xf32> -> vector<32x1024xf32>
    %c0_46 = arith.constant 0 : index
    %c0_47 = arith.constant 0 : index
    %112 = vector.load %arg6[%c0_46, %c0_47] : memref<1x1024xf32, #tpu.memory_space<vmem>>, vector<1x1024xf32>
    %113 = vector.broadcast %112 : vector<1x1024xf32> to vector<32x1024xf32>
    %114 = arith.addf %111, %113 : vector<32x1024xf32>
    %cst_48 = arith.constant 0.000000e+00 : f32
    %115 = vector.broadcast %cst_48 : f32 to vector<32x1024xf32>
    %116 = arith.maximumf %114, %115 : vector<32x1024xf32>
    %117 = arith.truncf %116 : vector<32x1024xf32> to vector<32x1024xbf16>
    %c0_49 = arith.constant 0 : index
    %c0_50 = arith.constant 0 : index
    %118 = vector.load %arg7[%c0_49, %c0_50] : memref<1024x384xbf16, #tpu.memory_space<vmem>>, vector<1024x384xbf16>
    %cst_51 = arith.constant dense<0.000000e+00> : vector<32x384xf32>
    %119 = tpu.matmul %117, %118, %cst_51 {dimension_numbers = #tpu.dot_dimension_numbers<[1], [0], [0], [1], [0, 0, 1, 1], [], []>} : vector<32x1024xbf16>, vector<1024x384xbf16>, vector<32x384xf32> -> vector<32x384xf32>
    %c0_52 = arith.constant 0 : index
    %c0_53 = arith.constant 0 : index
    %120 = vector.load %arg8[%c0_52, %c0_53] : memref<1x384xf32, #tpu.memory_space<vmem>>, vector<1x384xf32>
    %121 = vector.broadcast %120 : vector<1x384xf32> to vector<32x384xf32>
    %122 = arith.addf %119, %121 : vector<32x384xf32>
    %cst_54 = arith.constant 0.000000e+00 : f32
    %123 = vector.broadcast %cst_54 : f32 to vector<32x384xf32>
    %124 = arith.maximumf %122, %123 : vector<32x384xf32>
    %cst_55 = arith.constant dense<0.000000e+00> : vector<384xf32>
    %125 = vector.multi_reduction <add>, %124, %cst_55 [0] : vector<32x384xf32> to vector<384xf32>
    %126 = vector.shape_cast %125 : vector<384xf32> to vector<1x384xf32>
    %cst_56 = arith.constant 3.200000e+01 : f32
    %127 = vector.broadcast %cst_56 : f32 to vector<1x384xf32>
    %128 = arith.divf %126, %127 : vector<1x384xf32>
    %c0_57 = arith.constant 0 : index
    %c0_58 = arith.constant 0 : index
    %129 = vector.load %arg13[%c0_57, %c0_58] : memref<1x384xf32, #tpu.memory_space<vmem>>, vector<1x384xf32>
    tpu.vector_store %arg13[%c0_57, %c0_58], %128 {strides = array<i32>} : memref<1x384xf32, #tpu.memory_space<vmem>>, vector<1x384xf32>,
    %c0_59 = arith.constant 0 : index
    %c0_60 = arith.constant 0 : index
    %130 = vector.load %arg2[%c0_59, %c0_60] : memref<8x1536xf32, #tpu.memory_space<vmem>>, vector<8x1536xf32>
    %131 = arith.truncf %130 : vector<8x1536xf32> to vector<8x1536xbf16>
    %c0_61 = arith.constant 0 : index
    %c0_62 = arith.constant 0 : index
    %132 = vector.load %arg9[%c0_61, %c0_62] : memref<1536x128xbf16, #tpu.memory_space<vmem>>, vector<1536x128xbf16>
    %cst_63 = arith.constant dense<0.000000e+00> : vector<8x128xf32>
    %133 = tpu.matmul %131, %132, %cst_63 {dimension_numbers = #tpu.dot_dimension_numbers<[1], [0], [0], [1], [0, 0, 1, 1], [], []>} : vector<8x1536xbf16>, vector<1536x128xbf16>, vector<8x128xf32> -> vector<8x128xf32>
    %c0_64 = arith.constant 0 : index
    %c0_65 = arith.constant 0 : index
    %134 = vector.load %arg10[%c0_64, %c0_65] : memref<1x128xf32, #tpu.memory_space<vmem>>, vector<1x128xf32>
    %135 = vector.broadcast %134 : vector<1x128xf32> to vector<8x128xf32>
    %136 = arith.addf %133, %135 : vector<8x128xf32>
    %cst_66 = arith.constant 0.000000e+00 : f32
    %137 = vector.broadcast %cst_66 : f32 to vector<8x128xf32>
    %138 = arith.maximumf %136, %137 : vector<8x128xf32>
    %139 = arith.truncf %138 : vector<8x128xf32> to vector<8x128xbf16>
    %c0_67 = arith.constant 0 : index
    %c0_68 = arith.constant 0 : index
    %140 = vector.load %arg11[%c0_67, %c0_68] : memref<128x384xbf16, #tpu.memory_space<vmem>>, vector<128x384xbf16>
    %cst_69 = arith.constant dense<0.000000e+00> : vector<8x384xf32>
    %141 = tpu.matmul %139, %140, %cst_69 {dimension_numbers = #tpu.dot_dimension_numbers<[1], [0], [0], [1], [0, 0, 1, 1], [], []>} : vector<8x128xbf16>, vector<128x384xbf16>, vector<8x384xf32> -> vector<8x384xf32>
    %c0_70 = arith.constant 0 : index
    %c0_71 = arith.constant 0 : index
    %142 = vector.load %arg12[%c0_70, %c0_71] : memref<1x384xf32, #tpu.memory_space<vmem>>, vector<1x384xf32>
    %143 = vector.broadcast %142 : vector<1x384xf32> to vector<8x384xf32>
    %144 = arith.addf %141, %143 : vector<8x384xf32>
    %cst_72 = arith.constant 0.000000e+00 : f32
    %145 = vector.broadcast %cst_72 : f32 to vector<8x384xf32>
    %146 = arith.maximumf %144, %145 : vector<8x384xf32>
    %c0_73 = arith.constant 0 : index
    %c0_74 = arith.constant 0 : index
    %147 = vector.load %arg14[%c0_73, %c0_74] : memref<8x384xf32, #tpu.memory_space<vmem>>, vector<8x384xf32>
    tpu.vector_store %arg14[%c0_73, %c0_74], %146 {strides = array<i32>} : memref<8x384xf32, #tpu.memory_space<vmem>>, vector<8x384xf32>,
    return
  }
}

</mosaic_0001>

<bundles_post_ra>
// kernel: textgcn_forward.1
= control target key start
LH: loop header
LB: loop body
LE: loop exit
PB: predicated region body
PF: predicated region fallthrough
CT: control target
= control target key end

     0   :  { %20 = vsyncpa [#allocation3], 0  ;;  %s11628_s0 = inlined_call_operand.hbm [shape: f32[32,1536], index: 0, kind: input, shape index: {}]   ;;  %s11629_s1 = inlined_call_operand.hbm [shape: f32[32,32], index: 1, kind: input, shape index: {}]   ;;  %s11630_s2 = inlined_call_operand.hbm [shape: f32[8,1536], index: 2, kind: input, shape index: {}]   ;;  %s11631_s3 = inlined_call_operand.hbm [shape: bf16[1536,512], index: 3, kind: input, shape index: {}]   ;;  %s11632_s4 = inlined_call_operand.hbm [shape: f32[1,512], index: 4, kind: input, shape index: {}]   ;;  %s11633_s5 = inlined_call_operand.hbm [shape: bf16[32,1024], index: 5, kind: input, shape index: {}]   ;;  %s11634_s6 = inlined_call_operand.hbm [shape: f32[1,1024], index: 6, kind: input, shape index: {}]   ;;  %s11635_s7 = inlined_call_operand.hbm [shape: bf16[1024,384], index: 7, kind: input, shape index: {}]   ;;  %s11636_s8 = inlined_call_operand.hbm [shape: f32[1,384], index: 8, kind: input, shape index: {}]   ;;  %s11637_s9 = inlined_call_operand.hbm [shape: bf16[1536,128], index: 9, kind: input, shape index: {}]   ;;  %s11638_s10 = inlined_call_operand.hbm [shape: f32[1,128], index: 10, kind: input, shape index: {}]   ;;  %s11639_s11 = inlined_call_operand.hbm [shape: bf16[128,384], index: 11, kind: input, shape index: {}]   ;;  %s11640_s12 = inlined_call_operand.hbm [shape: f32[1,384], index: 12, kind: input, shape index: {}]   ;;  %s11641_s13 = inlined_call_operand.vmem [shape: f32[1,384], index: 13, kind: output, shape index: {0}]   ;;  %s11642_s14 = inlined_call_operand.hbm [shape: f32[8,384], index: 14, kind: output, shape index: {1}]  }
   0x1   :  { %21 = vsyncpa [#allocation6], 0 }
   0x2   :  { %22 = vsyncpa [#allocation9], 0 }
   0x3   :  { %23 = vsyncpa [#allocation12], 0 }
   0x4   :  { %24 = vsyncpa [#allocation15], 0 }
   0x5   :  { %25 = vsyncpa [#allocation18], 0 }
   0x6   :  { %26 = vsyncpa [#allocation21], 0 }
   0x7   :  { %27 = vsyncpa [#allocation4], 0  ;;  %s10796_s29 = smov [#allocation5]   ;;  %s10472_s17 = scalar_lea.hbm %s11629_s1, 512 }
   0x8   :  { %s45_s30 = sshll.u32 %s10796_s29, 4  ;;  %p10473_p0 = scmp.ne.s32.totalorder %s11629_s1, %s10472_s17  ;;  %s46_s30 = int_to_ptr.vmem [resolvable:$true] %s45_s30 }
   0x9   :  { %p10476_p1 = scmp.lt.u32.totalorder %s10472_s17, %s11629_s1 }
   0xb   :  { %p10478_p2 = pnand %p10476_p1, %p10473_p0 }
   0xd   :  { %10481 = shalt.err (!%p10478_p2)
}
   0xe   :  { %s10482_s22 = scalar_lea.vmem %s46_s30, 512  ;;  %p10487_p4 = scmp.lt.s32.totalorder %s46_s30, %s46_s30 }
   0xf   :  { %p10483_p3 = scmp.ne.s32.totalorder %s46_s30, %s10482_s22  ;;  %p10488_p5 = scmp.lt.s32.totalorder %s10482_s22, %s10482_s22 }
  0x11   :  { %p10489_p6 = por %p10488_p5, %p10487_p4 }
  0x13   :  { %p10490_p7 = pnand %p10489_p6, %p10483_p3 }
  0x15   :  { %10493 = shalt.err (!%p10490_p7)
}
  0x16   :  { %s10797_s23 = smov 128   ;;  %s10798_s24 = smov 8  }
  0x17   :  { %51 = dma.hbm_to_vmem [thread:$0]  %s11629_s1, 512, %s46_s30, [#allocation6], %s10797_s23, %s10797_s23, %s10798_s24  }
  0x18   :  { %s10799_s27 = smov [#allocation8]   ;;  %s10494_s16 = scalar_lea.hbm %s11631_s3, 49152 }
  0x19   :  { %s67_s28 = sshll.u32 %s10799_s27, 4  ;;  %p10495_p8 = scmp.ne.s32.totalorder %s11631_s3, %s10494_s16  ;;  %s68_s28 = int_to_ptr.vmem [resolvable:$true] %s67_s28 }
  0x1a   :  { %p10498_p9 = scmp.lt.u32.totalorder %s10494_s16, %s11631_s3 }
  0x1c   :  { %p10500_p10 = pnand %p10498_p9, %p10495_p8 }
  0x1e   :  { %10503 = shalt.err (!%p10500_p10)
}
  0x1f   :  { %s10504_s21 = scalar_lea.vmem %s68_s28, 49152  ;;  %p10509_p12 = scmp.lt.s32.totalorder %s68_s28, %s68_s28 }
  0x20   :  { %p10505_p11 = scmp.ne.s32.totalorder %s68_s28, %s10504_s21  ;;  %p10510_p13 = scmp.lt.s32.totalorder %s10504_s21, %s10504_s21 }
  0x22   :  { %p10511_p0 = por %p10510_p13, %p10509_p12 }
  0x24   :  { %p10512_p1 = pnand %p10511_p0, %p10505_p11 }
  0x26   :  { %10515 = shalt.err (!%p10512_p1)
}
  0x27   :  { %s10800_s1 = smov 256   ;;  %s10801_s30 = smov 16  }
  0x28   :  { %73 = dma.hbm_to_vmem [thread:$0]  %s11631_s3, 49152, %s68_s28, [#allocation9], %s10800_s1, %s10800_s1, %s10801_s30  }
  0x29   :  { %s10802_s24 = smov [#allocation11]   ;;  %s10516_s29 = scalar_lea.hbm %s11633_s5, 2048 }
  0x2a   :  { %s89_s25 = sshll.u32 %s10802_s24, 4  ;;  %p10517_p2 = scmp.ne.s32.totalorder %s11633_s5, %s10516_s29  ;;  %s90_s25 = int_to_ptr.vmem [resolvable:$true] %s89_s25 }
  0x2b   :  { %p10520_p3 = scmp.lt.u32.totalorder %s10516_s29, %s11633_s5 }
  0x2d   :  { %p10522_p4 = pnand %p10520_p3, %p10517_p2 }
  0x2f   :  { %10525 = shalt.err (!%p10522_p4)
}
  0x30   :  { %s10526_s19 = scalar_lea.vmem %s90_s25, 2048  ;;  %p10531_p6 = scmp.lt.s32.totalorder %s90_s25, %s90_s25 }
  0x31   :  { %p10527_p5 = scmp.ne.s32.totalorder %s90_s25, %s10526_s19  ;;  %p10532_p7 = scmp.lt.s32.totalorder %s10526_s19, %s10526_s19 }
  0x33   :  { %p10533_p8 = por %p10532_p7, %p10531_p6 }
  0x35   :  { %p10534_p9 = pnand %p10533_p8, %p10527_p5 }
  0x37   :  { %10537 = shalt.err (!%p10534_p9)
}
  0x38   :  { %s10803_s3 = smov 512   ;;  %s10804_s28 = smov 32  }
  0x39   :  { %95 = dma.hbm_to_vmem [thread:$0]  %s11633_s5, 2048, %s90_s25, [#allocation12], %s10803_s3, %s10803_s3, %s10804_s28  }
  0x3a   :  { %s10805_s1 = smov [#allocation14]   ;;  %s10538_s24 = scalar_lea.hbm %s11635_s7, 24576 }
  0x3b   :  { %s111_s30 = sshll.u32 %s10805_s1, 4  ;;  %p10539_p10 = scmp.ne.s32.totalorder %s11635_s7, %s10538_s24  ;;  %s112_s30 = int_to_ptr.vmem [resolvable:$true] %s111_s30 }
  0x3c   :  { %p10542_p11 = scmp.lt.u32.totalorder %s10538_s24, %s11635_s7 }
  0x3e   :  { %p10544_p12 = pnand %p10542_p11, %p10539_p10 }
  0x40   :  { %10547 = shalt.err (!%p10544_p12)
}
  0x41   :  { %s10548_s16 = scalar_lea.vmem %s112_s30, 24576  ;;  %p10553_p0 = scmp.lt.s32.totalorder %s112_s30, %s112_s30 }
  0x42   :  { %p10549_p13 = scmp.ne.s32.totalorder %s112_s30, %s10548_s16  ;;  %p10554_p1 = scmp.lt.s32.totalorder %s10548_s16, %s10548_s16 }
  0x44   :  { %p10555_p2 = por %p10554_p1, %p10553_p0 }
  0x46   :  { %p10556_p3 = pnand %p10555_p2, %p10549_p13 }
  0x48   :  { %10559 = shalt.err (!%p10556_p3)
}
  0x49   :  { %s10806_s5 = smov 192   ;;  %s10807_s25 = smov 12  }
  0x4a   :  { %117 = dma.hbm_to_vmem [thread:$0]  %s11635_s7, 24576, %s112_s30, [#allocation15], %s10806_s5, %s10806_s5, %s10807_s25  }
  0x4b   :  { %s10808_s19 = smov [#allocation17]   ;;  %s10560_s1 = scalar_lea.hbm %s11637_s9, 12288 }
  0x4c   :  { %s133_s3 = sshll.u32 %s10808_s19, 4  ;;  %p10561_p4 = scmp.ne.s32.totalorder %s11637_s9, %s10560_s1  ;;  %s134_s3 = int_to_ptr.vmem [resolvable:$true] %s133_s3 }
  0x4d   :  { %p10564_p5 = scmp.lt.u32.totalorder %s10560_s1, %s11637_s9 }
  0x4f   :  { %p10566_p6 = pnand %p10564_p5, %p10561_p4 }
  0x51   :  { %10569 = shalt.err (!%p10566_p6)
}
  0x52   :  { %s10570_s27 = scalar_lea.vmem %s134_s3, 12288  ;;  %p10575_p8 = scmp.lt.s32.totalorder %s134_s3, %s134_s3 }
  0x53   :  { %p10571_p7 = scmp.ne.s32.totalorder %s134_s3, %s10570_s27  ;;  %p10576_p9 = scmp.lt.s32.totalorder %s10570_s27, %s10570_s27 }
  0x55   :  { %p10577_p10 = por %p10576_p9, %p10575_p8 }
  0x57   :  { %p10578_p11 = pnand %p10577_p10, %p10571_p7 }
  0x59   :  { %10581 = shalt.err (!%p10578_p11)
}
  0x5a   :  { %s10809_s7 = smov 64   ;;  %s10810_s30 = smov 4  }
  0x5b   :  { %139 = dma.hbm_to_vmem [thread:$0]  %s11637_s9, 12288, %s134_s3, [#allocation18], %s10809_s7, %s10809_s7, %s10810_s30  }
  0x5c   :  { %s10811_s16 = smov [#allocation20]   ;;  %s10812_s18 = smov [#allocation2]  }
  0x5d   :  { %s155_s17 = sshll.u32 %s10811_s16, 4  ;;  %s33_s19 = sshll.u32 %s10812_s18, 4  ;;  %s156_s17 = int_to_ptr.vmem [resolvable:$true] %s155_s17  ;;  %s34_s19 = int_to_ptr.vmem [resolvable:$true] %s33_s19 }
  0x5e   :  { %s10582_s1 = scalar_lea.hbm %s11639_s11, 3072 }
  0x5f   :  { %p10583_p12 = scmp.ne.s32.totalorder %s11639_s11, %s10582_s1  ;;  %p10586_p13 = scmp.lt.u32.totalorder %s10582_s1, %s11639_s11 }
  0x61   :  { %p10588_p0 = pnand %p10586_p13, %p10583_p12 }
  0x63   :  { %10591 = shalt.err (!%p10588_p0)
}
  0x64   :  { %s10592_s9 = scalar_lea.vmem %s156_s17, 3072  ;;  %p10597_p2 = scmp.lt.s32.totalorder %s156_s17, %s156_s17 }
  0x65   :  { %p10593_p1 = scmp.ne.s32.totalorder %s156_s17, %s10592_s9  ;;  %p10598_p3 = scmp.lt.s32.totalorder %s10592_s9, %s10592_s9 }
  0x67   :  { %p10599_p4 = por %p10598_p3, %p10597_p2 }
  0x69   :  { %p10600_p5 = pnand %p10599_p4, %p10593_p1 }
  0x6b   :  { %10603 = shalt.err (!%p10600_p5)
}
  0x6c   :  { %161 = dma.hbm_to_vmem [thread:$0]  %s11639_s11, 3072, %s156_s17, [#allocation21], %s10806_s5, %s10806_s5, %s10807_s25  }
  0x6d   :  { %s10604_s15 = scalar_lea.hbm %s11628_s0, 6144 }
  0x6e   :  { %p10605_p6 = scmp.ne.s32.totalorder %s11628_s0, %s10604_s15  ;;  %p10608_p7 = scmp.lt.u32.totalorder %s10604_s15, %s11628_s0 }
  0x70   :  { %p10610_p8 = pnand %p10608_p7, %p10605_p6 }
  0x72   :  { %10613 = shalt.err (!%p10610_p8)
}
  0x73   :  { %s10614_s1 = scalar_lea.vmem %s34_s19, 6144  ;;  %p10619_p10 = scmp.lt.s32.totalorder %s34_s19, %s34_s19 }
  0x74   :  { %p10615_p9 = scmp.ne.s32.totalorder %s34_s19, %s10614_s1  ;;  %p10620_p11 = scmp.lt.s32.totalorder %s10614_s1, %s10614_s1 }
  0x76   :  { %p10621_p12 = por %p10620_p11, %p10619_p10 }
  0x78   :  { %p10622_p13 = pnand %p10621_p12, %p10615_p9 }
  0x7a   :  { %10625 = shalt.err (!%p10622_p13)
}
  0x7b   :  { %s10813_s11 = smov 1536   ;;  %s10814_s5 = smov 96  }
  0x7c   :  { %39 = dma.hbm_to_vmem [thread:$0]  %s11628_s0, 6144, %s34_s19, [#allocation3], %s10813_s11, %s10813_s11, %s10814_s5  }
  0x7d   :  { %s10815_s22 = smov [#allocation7]   ;;  %s10816_s24 = smov [#allocation10]  }
  0x7e   :  { %s58_s23 = sshll.u32 %s10815_s22, 4  ;;  %s80_s26 = sshll.u32 %s10816_s24, 4  ;;  %s59_s23 = int_to_ptr.vmem [resolvable:$true] %s58_s23  ;;  %s81_s26 = int_to_ptr.vmem [resolvable:$true] %s80_s26 }
  0x7f   :  { %s10626_s27 = scalar_lea.hbm %s11630_s2, 1536 }
  0x80   :  { %p10627_p0 = scmp.ne.s32.totalorder %s11630_s2, %s10626_s27  ;;  %p10630_p1 = scmp.lt.u32.totalorder %s10626_s27, %s11630_s2 }
  0x82   :  { %p10632_p2 = pnand %p10630_p1, %p10627_p0 }
  0x84   :  { %10635 = shalt.err (!%p10632_p2)
}
  0x85   :  { %s10636_s0 = scalar_lea.vmem %s59_s23, 1536  ;;  %p10641_p4 = scmp.lt.s32.totalorder %s59_s23, %s59_s23 }
  0x86   :  { %p10637_p3 = scmp.ne.s32.totalorder %s59_s23, %s10636_s0  ;;  %p10642_p5 = scmp.lt.s32.totalorder %s10636_s0, %s10636_s0 }
  0x88   :  { %p10643_p6 = por %p10642_p5, %p10641_p4 }
  0x8a   :  { %p10644_p7 = pnand %p10643_p6, %p10637_p3 }
  0x8c   :  { %10647 = shalt.err (!%p10644_p7)
}
  0x8d   :  { %61 = dma.hbm_to_vmem [thread:$0]  %s11630_s2, 1536, %s59_s23, [#allocation6]  }
  0x8e   :  { %s10648_s1 = scalar_lea.hbm %s11632_s4, 64 }
  0x8f   :  { %p10649_p8 = scmp.ne.s32.totalorder %s11632_s4, %s10648_s1  ;;  %p10652_p9 = scmp.lt.u32.totalorder %s10648_s1, %s11632_s4 }
  0x91   :  { %p10654_p10 = pnand %p10652_p9, %p10649_p8 }
  0x93   :  { %10657 = shalt.err (!%p10654_p10)
}
  0x94   :  { %s10658_s24 = scalar_lea.vmem %s81_s26, 64  ;;  %p10663_p12 = scmp.lt.s32.totalorder %s81_s26, %s81_s26 }
  0x95   :  { %p10659_p11 = scmp.ne.s32.totalorder %s81_s26, %s10658_s24  ;;  %p10664_p13 = scmp.lt.s32.totalorder %s10658_s24, %s10658_s24 }
  0x97   :  { %p10665_p0 = por %p10664_p13, %p10663_p12 }
  0x99   :  { %p10666_p1 = pnand %p10665_p0, %p10659_p11 }
  0x9b   :  { %10669 = shalt.err (!%p10666_p1)
}
  0x9c   :  { %83 = dma.hbm_to_vmem [thread:$0]  %s11632_s4, 64, %s81_s26, [#allocation9]  }
  0x9d   :  { %s10817_s9 = smov [#allocation13]   ;;  %s10818_s27 = smov [#allocation16]  }
  0x9e   :  { %s102_s3 = sshll.u32 %s10817_s9, 4  ;;  %s124_s30 = sshll.u32 %s10818_s27, 4  ;;  %s103_s3 = int_to_ptr.vmem [resolvable:$true] %s102_s3  ;;  %s125_s30 = int_to_ptr.vmem [resolvable:$true] %s124_s30 }
  0x9f   :  { %s10670_s16 = scalar_lea.hbm %s11634_s6, 128 }
  0xa0   :  { %p10671_p2 = scmp.ne.s32.totalorder %s11634_s6, %s10670_s16  ;;  %p10674_p3 = scmp.lt.u32.totalorder %s10670_s16, %s11634_s6 }
  0xa2   :  { %p10676_p4 = pnand %p10674_p3, %p10671_p2 }
  0xa4   :  { %10679 = shalt.err (!%p10676_p4)
}
  0xa5   :  { %s10680_s4 = scalar_lea.vmem %s103_s3, 128  ;;  %p10685_p6 = scmp.lt.s32.totalorder %s103_s3, %s103_s3 }
  0xa6   :  { %p10681_p5 = scmp.ne.s32.totalorder %s103_s3, %s10680_s4  ;;  %p10686_p7 = scmp.lt.s32.totalorder %s10680_s4, %s10680_s4 }
  0xa8   :  { %p10687_p8 = por %p10686_p7, %p10685_p6 }
  0xaa   :  { %p10688_p9 = pnand %p10687_p8, %p10681_p5 }
  0xac   :  { %10691 = shalt.err (!%p10688_p9)
}
  0xad   :  { %105 = dma.hbm_to_vmem [thread:$0]  %s11634_s6, 128, %s103_s3, [#allocation12]  }
  0xae   :  { %s10692_s25 = scalar_lea.hbm %s11636_s8, 48 }
  0xaf   :  { %p10693_p10 = scmp.ne.s32.totalorder %s11636_s8, %s10692_s25  ;;  %p10696_p11 = scmp.lt.u32.totalorder %s10692_s25, %s11636_s8 }
  0xb1   :  { %p10698_p12 = pnand %p10696_p11, %p10693_p10 }
  0xb3   :  { %10701 = shalt.err (!%p10698_p12)
}
  0xb4   :  { %s10702_s23 = scalar_lea.vmem %s125_s30, 48  ;;  %s10706_s9 = scalar_lea.vmem %s125_s30, 64 }
  0xb5   :  { %p10703_p13 = scmp.ne.s32.totalorder %s125_s30, %s10702_s23  ;;  %p10707_p0 = scmp.lt.s32.totalorder %s125_s30, %s125_s30 }
  0xb6   :  { %p10708_p1 = scmp.lt.s32.totalorder %s10706_s9, %s10702_s23 }
  0xb8   :  { %p10709_p2 = por %p10708_p1, %p10707_p0 }
  0xba   :  { %p10710_p3 = pnand %p10709_p2, %p10703_p13 }
  0xbc   :  { %10713 = shalt.err (!%p10710_p3)
}
  0xbd   :  { %127 = dma.hbm_to_vmem [thread:$0]  %s11636_s8, 48, %s125_s30, [#allocation15]  }
  0xbe   :  { %s10819_s27 = smov [#allocation19]   ;;  %s10820_s15 = smov [#allocation22]  }
  0xbf   :  { %s146_s29 = sshll.u32 %s10819_s27, 4  ;;  %s168_s16 = sshll.u32 %s10820_s15, 4  ;;  %s147_s29 = int_to_ptr.vmem [resolvable:$true] %s146_s29  ;;  %s169_s16 = int_to_ptr.vmem [resolvable:$true] %s168_s16 }
  0xc0   :  { %s10714_s18 = scalar_lea.hbm %s11638_s10, 16 }
  0xc1   :  { %p10715_p4 = scmp.ne.s32.totalorder %s11638_s10, %s10714_s18  ;;  %p10718_p5 = scmp.lt.u32.totalorder %s10714_s18, %s11638_s10 }
  0xc3   :  { %p10720_p6 = pnand %p10718_p5, %p10715_p4 }
  0xc5   :  { %10723 = shalt.err (!%p10720_p6)
}
  0xc6   :  { %s10724_s8 = scalar_lea.vmem %s147_s29, 16  ;;  %s10728_s30 = scalar_lea.vmem %s147_s29, 32 }
  0xc7   :  { %p10725_p7 = scmp.ne.s32.totalorder %s147_s29, %s10724_s8  ;;  %p10729_p8 = scmp.lt.s32.totalorder %s147_s29, %s147_s29 }
  0xc8   :  { %p10730_p9 = scmp.lt.s32.totalorder %s10728_s30, %s10724_s8 }
  0xca   :  { %p10731_p10 = por %p10730_p9, %p10729_p8 }
  0xcc   :  { %p10732_p11 = pnand %p10731_p10, %p10725_p7 }
  0xce   :  { %10735 = shalt.err (!%p10732_p11)
}
  0xcf   :  { %149 = dma.hbm_to_vmem [thread:$0]  %s11638_s10, 16, %s147_s29, [#allocation18]  }
  0xd0   :  { %s10736_s22 = scalar_lea.hbm %s11640_s12, 48 }
  0xd1   :  { %p10737_p12 = scmp.ne.s32.totalorder %s11640_s12, %s10736_s22  ;;  %p10740_p13 = scmp.lt.u32.totalorder %s10736_s22, %s11640_s12 }
  0xd3   :  { %p10742_p0 = pnand %p10740_p13, %p10737_p12 }
  0xd5   :  { %10745 = shalt.err (!%p10742_p0)
}
  0xd6   :  { %s10746_s6 = scalar_lea.vmem %s169_s16, 48  ;;  %s10750_s3 = scalar_lea.vmem %s169_s16, 64 }
  0xd7   :  { %p10747_p1 = scmp.ne.s32.totalorder %s169_s16, %s10746_s6  ;;  %p10751_p2 = scmp.lt.s32.totalorder %s169_s16, %s169_s16 }
  0xd8   :  { %p10752_p3 = scmp.lt.s32.totalorder %s10750_s3, %s10746_s6 }
  0xda   :  { %p10753_p4 = por %p10752_p3, %p10751_p2 }
  0xdc   :  { %p10754_p5 = pnand %p10753_p4, %p10747_p1 }
  0xde   :  { %10757 = shalt.err (!%p10754_p5)
}
  0xdf   :  { %171 = dma.hbm_to_vmem [thread:$0]  %s11640_s12, 48, %s169_s16, [#allocation21]  }
  0xe0   :  { %10780 = dma.done.wait [#allocation3], 6144  }
  0xe1   :  { %10781 = vsyncadd [#allocation3], 4294961152 }
  0xe2   :  { %10782 = dma.done.wait [#allocation6], 2048  }
  0xe3   :  { %10783 = vsyncadd [#allocation6], 4294965248 }
  0xe4   :  { %10784 = dma.done.wait [#allocation9], 49216  }
  0xe5   :  { %10785 = vsyncadd [#allocation9], 4294918080 }
  0xe6   :  { %10786 = dma.done.wait [#allocation12], 2176  }
  0xe7   :  { %10787 = vsyncadd [#allocation12], 4294965120 }
  0xe8   :  { %10788 = dma.done.wait [#allocation15], 24624  }
  0xe9   :  { %10789 = vsyncadd [#allocation15], 4294942672 }
  0xea   :  { %10790 = dma.done.wait [#allocation18], 12304  }
  0xeb   :  { %10791 = vsyncadd [#allocation18], 4294954992 }
  0xec   :  { %10792 = dma.done.wait [#allocation21], 3120  }
  0xed   :  { %10793 = vsyncadd [#allocation21], 4294964176  ;;  %v9447_v0 = vld [vmem:[#allocation8 + $0x4] ss:$16 sps:$4 sm:$0xff]   ;;  %v9449_v1 = vld [vmem:[#allocation8 + $0xc] ss:$16 sps:$4 sm:$0xff]  }
  0xee   :  { %2610 = vmatprep.subr.bf16.mxu0 %v9447_v0  ;;  %v9451_v2 = vld [vmem:[#allocation8] ss:$16 sps:$4 sm:$0xff]   ;;  %v9452_v3 = vld [vmem:[#allocation8 + $0x8] ss:$16 sps:$4 sm:$0xff]   ;;  %2928 = vmatprep.subr.bf16.mxu1 %v9449_v1  ;;  %v9453_v4 = vld [vmem:[#allocation8 + $0x24] ss:$16 sps:$4 sm:$0xff]  }
  0xef   :  { %2611 = vmatpush1.bf16.msra.mxu0 %v9451_v2  ;;  %2929 = vmatpush1.bf16.msra.mxu1 %v9452_v3  ;;  %v9455_v5 = vld [vmem:[#allocation8 + $0x2c] ss:$16 sps:$4 sm:$0xff]   ;;  %v9457_v6 = vld [vmem:[#allocation8 + $0x20] ss:$16 sps:$4 sm:$0xff]   ;;  %v9458_v7 = vld [vmem:[#allocation8 + $0x28] ss:$16 sps:$4 sm:$0xff]  }
  0xf0   :  { %2612 = vmatprep.subr.bf16.mxu0 %v9453_v4  ;;  %2930 = vmatprep.subr.bf16.mxu1 %v9455_v5  ;;  %v9459_v8 = vld [vmem:[#allocation8 + $0x44] ss:$16 sps:$4 sm:$0xff]   ;;  %v9461_v9 = vld [vmem:[#allocation8 + $0x4c] ss:$16 sps:$4 sm:$0xff]   ;;  %v9463_v10 = vld [vmem:[#allocation8 + $0x40] ss:$16 sps:$4 sm:$0xff]  }
  0xf1   :  { %v9464_v11 = vld [vmem:[#allocation8 + $0x48] ss:$16 sps:$4 sm:$0xff]   ;;  %v9465_v12 = vld [vmem:[#allocation8 + $0x64] ss:$16 sps:$4 sm:$0xff]   ;;  %v9467_v13 = vld [vmem:[#allocation8 + $0x6c] ss:$16 sps:$4 sm:$0xff]  }
  0xf2   :  { %v9469_v14 = vld [vmem:[#allocation8 + $0x60] ss:$16 sps:$4 sm:$0xff]   ;;  %v9470_v15 = vld [vmem:[#allocation8 + $0x68] ss:$16 sps:$4 sm:$0xff]   ;;  %v9471_v16 = vld [vmem:[#allocation8 + $0x84] ss:$16 sps:$4 sm:$0xff]  }
  0xf3   :  { %2613 = vmatpush1.bf16.msra.mxu0 %v9457_v6  ;;  %2931 = vmatpush1.bf16.msra.mxu1 %v9458_v7  ;;  %v9473_v17 = vld [vmem:[#allocation8 + $0x8c] ss:$16 sps:$4 sm:$0xff]   ;;  %v9475_v18 = vld [vmem:[#allocation8 + $0x80] ss:$16 sps:$4 sm:$0xff]   ;;  %v9476_v19 = vld [vmem:[#allocation8 + $0x88] ss:$16 sps:$4 sm:$0xff]  }
  0xf4   :  { %2614 = vmatprep.subr.bf16.mxu0 %v9459_v8  ;;  %2932 = vmatprep.subr.bf16.mxu1 %v9461_v9  ;;  %v9477_v20 = vld [vmem:[#allocation8 + $0xa4] ss:$16 sps:$4 sm:$0xff]   ;;  %v9479_v21 = vld [vmem:[#allocation8 + $0xac] ss:$16 sps:$4 sm:$0xff]   ;;  %v9481_v22 = vld [vmem:[#allocation8 + $0xa0] ss:$16 sps:$4 sm:$0xff]  }
  0xf5   :  { %v9482_v23 = vld [vmem:[#allocation8 + $0xa8] ss:$16 sps:$4 sm:$0xff]   ;;  %v9483_v24 = vld [vmem:[#allocation8 + $0xc4] ss:$16 sps:$4 sm:$0xff]   ;;  %v9485_v25 = vld [vmem:[#allocation8 + $0xcc] ss:$16 sps:$4 sm:$0xff]  }
  0xf6   :  { %v9487_v26 = vld [vmem:[#allocation8 + $0xc0] ss:$16 sps:$4 sm:$0xff]   ;;  %v9488_v27 = vld [vmem:[#allocation8 + $0xc8] ss:$16 sps:$4 sm:$0xff]   ;;  %v9489_v28 = vld [vmem:[#allocation8 + $0xe4] ss:$16 sps:$4 sm:$0xff]  }
  0xf7   :  { %2615 = vmatpush1.bf16.msra.mxu0 %v9463_v10  ;;  %2933 = vmatpush1.bf16.msra.mxu1 %v9464_v11  ;;  %v9491_v29 = vld [vmem:[#allocation8 + $0xec] ss:$16 sps:$4 sm:$0xff]   ;;  %v9493_v30 = vld [vmem:[#allocation8 + $0xe0] ss:$16 sps:$4 sm:$0xff]   ;;  %v9494_v31 = vld [vmem:[#allocation8 + $0xe8] ss:$16 sps:$4 sm:$0xff]  }
  0xf8   :  { %2616 = vmatprep.subr.bf16.mxu0 %v9465_v12  ;;  %2934 = vmatprep.subr.bf16.mxu1 %v9467_v13  ;;  %v9495_v32 = vld [vmem:[#allocation8 + $0x104] ss:$16 sps:$4 sm:$0xff]   ;;  %v9497_v33 = vld [vmem:[#allocation8 + $0x10c] ss:$16 sps:$4 sm:$0xff]   ;;  %v9499_v34 = vld [vmem:[#allocation8 + $0x100] ss:$16 sps:$4 sm:$0xff]  }
  0xf9   :  { %v9500_v35 = vld [vmem:[#allocation8 + $0x108] ss:$16 sps:$4 sm:$0xff]   ;;  %v9501_v36 = vld [vmem:[#allocation8 + $0x124] ss:$16 sps:$4 sm:$0xff]   ;;  %v9503_v37 = vld [vmem:[#allocation8 + $0x12c] ss:$16 sps:$4 sm:$0xff]  }
  0xfa   :  { %v9505_v38 = vld [vmem:[#allocation8 + $0x120] ss:$16 sps:$4 sm:$0xff]   ;;  %v9506_v39 = vld [vmem:[#allocation8 + $0x128] ss:$16 sps:$4 sm:$0xff]   ;;  %v9507_v40 = vld [vmem:[#allocation8 + $0x144] ss:$16 sps:$4 sm:$0xff]  }
  0xfb   :  { %2617 = vmatpush1.bf16.msra.mxu0 %v9469_v14  ;;  %2935 = vmatpush1.bf16.msra.mxu1 %v9470_v15  ;;  %v9509_v41 = vld [vmem:[#allocation8 + $0x14c] ss:$16 sps:$4 sm:$0xff]   ;;  %v9511_v42 = vld [vmem:[#allocation8 + $0x140] ss:$16 sps:$4 sm:$0xff]   ;;  %v9512_v43 = vld [vmem:[#allocation8 + $0x148] ss:$16 sps:$4 sm:$0xff]  }
  0xfc   :  { %2618 = vmatprep.subr.bf16.mxu0 %v9471_v16  ;;  %2936 = vmatprep.subr.bf16.mxu1 %v9473_v17  ;;  %v9513_v44 = vld [vmem:[#allocation8 + $0x164] ss:$16 sps:$4 sm:$0xff]   ;;  %v9515_v45 = vld [vmem:[#allocation8 + $0x16c] ss:$16 sps:$4 sm:$0xff]   ;;  %v9517_v48 = vld [vmem:[#allocation8 + $0x160] ss:$16 sps:$4 sm:$0xff]  }
  0xfd   :  { %v213_v46 = vld [vmem:[#allocation2 + $0x8] sm:$0xff]  ;;  %v9519_v51 = vld [vmem:[#allocation8 + $0x184] ss:$16 sps:$4 sm:$0xff]   ;;  %v9523_v53 = vld [vmem:[#allocation8 + $0x180] ss:$16 sps:$4 sm:$0xff]   ;;  %vm3254_vm0 = vcmask 261120  }
  0xfe   :  { %v225_v47 = vld [vmem:[#allocation2 + $0x68] sm:$0xff]  ;;  %v9525_v55 = vld [vmem:[#allocation8 + $0x1a4] ss:$16 sps:$4 sm:$0xff]   ;;  %v9529_v57 = vld [vmem:[#allocation8 + $0x1a0] ss:$16 sps:$4 sm:$0xff]   ;;  %vm10823_vm6 = vmmov 0  }
  0xff   :  { %2619 = vmatpush1.bf16.msra.mxu0 %v9475_v18  ;;  %2937 = vmatpush1.bf16.msra.mxu1 %v9476_v19  ;;  %v9518_v49 = vld [vmem:[#allocation8 + $0x168] ss:$16 sps:$4 sm:$0xff]   ;;  %v261_v50 = vpack.c.bf16 %v225_v47, %v213_v46  ;;  %v9521_v52 = vld [vmem:[#allocation8 + $0x18c] ss:$16 sps:$4 sm:$0xff]   ;;  %v9531_v59 = vld [vmem:[#allocation8 + $0x1c4] ss:$16 sps:$4 sm:$0xff]  }
 0x100   :  { %2620 = vmatprep.subr.bf16.mxu0 %v9477_v20  ;;  %2938 = vmatprep.subr.bf16.mxu1 %v9479_v21  ;;  %v9524_v54 = vld [vmem:[#allocation8 + $0x188] ss:$16 sps:$4 sm:$0xff]   ;;  %v9527_v56 = vld [vmem:[#allocation8 + $0x1ac] ss:$16 sps:$4 sm:$0xff]   ;;  %v9535_v61 = vld [vmem:[#allocation8 + $0x1c0] ss:$16 sps:$4 sm:$0xff]  }
 0x101   :  { %2642 = vmatprep.mubr.bf16.mxu0 %v261_v50  ;;  %2960 = vmatprep.mubr.bf16.mxu1 %v261_v50  ;;  %v9530_v58 = vld [vmem:[#allocation8 + $0x1a8] ss:$16 sps:$4 sm:$0xff]   ;;  %v9533_v60 = vld [vmem:[#allocation8 + $0x1cc] ss:$16 sps:$4 sm:$0xff]   ;;  %v9537_v63 = vld [vmem:[#allocation8 + $0x1e4] ss:$16 sps:$4 sm:$0xff]  }
 0x102   :  { %v9536_v62 = vld [vmem:[#allocation8 + $0x1c8] ss:$16 sps:$4 sm:$0xff]   ;;  %v9539_v0 = vld [vmem:[#allocation8 + $0x1ec] ss:$16 sps:$4 sm:$0xff]   ;;  %v9541_v1 = vld [vmem:[#allocation8 + $0x1e0] ss:$16 sps:$4 sm:$0xff]  }
 0x103   :  { %2621 = vmatpush1.bf16.msra.mxu0 %v9481_v22  ;;  %2939 = vmatpush1.bf16.msra.mxu1 %v9482_v23  ;;  %v9542_v2 = vld [vmem:[#allocation8 + $0x1e8] ss:$16 sps:$4 sm:$0xff]   ;;  %v9545_v3 = vld [vmem:[#allocation8 + $0x204] ss:$16 sps:$4 sm:$0xff]   ;;  %v9548_v6 = vld [vmem:[#allocation8 + $0x20c] ss:$16 sps:$4 sm:$0xff]  }
 0x104   :  { %2622 = vmatprep.subr.bf16.mxu0 %v9483_v24  ;;  %2940 = vmatprep.subr.bf16.mxu1 %v9485_v25  ;;  %v212_v4 = vld [vmem:[#allocation2] sm:$0xff]  ;;  %v9546_v8 = vld [vmem:[#allocation8 + $0x208] ss:$16 sps:$4 sm:$0xff]   ;;  %v9554_v11 = vld [vmem:[#allocation8 + $0x22c] ss:$16 sps:$4 sm:$0xff]  }
 0x105   :  { %v224_v5 = vld [vmem:[#allocation2 + $0x60] sm:$0xff]  ;;  %v9552_v13 = vld [vmem:[#allocation8 + $0x228] ss:$16 sps:$4 sm:$0xff]   ;;  %v9560_v15 = vld [vmem:[#allocation8 + $0x24c] ss:$16 sps:$4 sm:$0xff]  }
 0x106   :  { %v9543_v7 = vld [vmem:[#allocation8 + $0x200] ss:$16 sps:$4 sm:$0xff]   ;;  %v260_v9 = vpack.c.bf16 %v224_v5, %v212_v4  ;;  %v9551_v10 = vld [vmem:[#allocation8 + $0x224] ss:$16 sps:$4 sm:$0xff]   ;;  %v9558_v17 = vld [vmem:[#allocation8 + $0x248] ss:$16 sps:$4 sm:$0xff]  }
 0x107   :  { %2623 = vmatpush1.bf16.msra.mxu0 %v9487_v26  ;;  %2941 = vmatpush1.bf16.msra.mxu1 %v9488_v27  ;;  %v9549_v12 = vld [vmem:[#allocation8 + $0x220] ss:$16 sps:$4 sm:$0xff]   ;;  %v9557_v14 = vld [vmem:[#allocation8 + $0x244] ss:$16 sps:$4 sm:$0xff]   ;;  %v9566_v19 = vld [vmem:[#allocation8 + $0x26c] ss:$16 sps:$4 sm:$0xff]  }
 0x108   :  { %2624 = vmatprep.subr.bf16.mxu0 %v9489_v28  ;;  %2942 = vmatprep.subr.bf16.mxu1 %v9491_v29  ;;  %v9555_v16 = vld [vmem:[#allocation8 + $0x240] ss:$16 sps:$4 sm:$0xff]   ;;  %v9563_v18 = vld [vmem:[#allocation8 + $0x264] ss:$16 sps:$4 sm:$0xff]   ;;  %v9564_v21 = vld [vmem:[#allocation8 + $0x268] ss:$16 sps:$4 sm:$0xff]  }
 0x109   :  { %v9561_v20 = vld [vmem:[#allocation8 + $0x260] ss:$16 sps:$4 sm:$0xff]   ;;  %v9569_v22 = vld [vmem:[#allocation8 + $0x284] ss:$16 sps:$4 sm:$0xff]   ;;  %v9572_v23 = vld [vmem:[#allocation8 + $0x28c] ss:$16 sps:$4 sm:$0xff]  }
 0x10a   :  { %v9567_v24 = vld [vmem:[#allocation8 + $0x280] ss:$16 sps:$4 sm:$0xff]   ;;  %v9570_v25 = vld [vmem:[#allocation8 + $0x288] ss:$16 sps:$4 sm:$0xff]   ;;  %v9575_v26 = vld [vmem:[#allocation8 + $0x2a4] ss:$16 sps:$4 sm:$0xff]  }
 0x10b   :  { %2625 = vmatpush1.bf16.msra.mxu0 %v9493_v30  ;;  %2943 = vmatpush1.bf16.msra.mxu1 %v9494_v31  ;;  %v9578_v27 = vld [vmem:[#allocation8 + $0x2ac] ss:$16 sps:$4 sm:$0xff]   ;;  %v9573_v30 = vld [vmem:[#allocation8 + $0x2a0] ss:$16 sps:$4 sm:$0xff]   ;;  %v9588_v46 = vld [vmem:[#allocation8 + $0x2e8] ss:$16 sps:$4 sm:$0xff]  }
 0x10c   :  { %2626 = vmatprep.subr.bf16.mxu0 %v9495_v32  ;;  %2944 = vmatprep.subr.bf16.mxu1 %v9497_v33  ;;  %v237_v28 = vld [vmem:[#allocation2 + $0xc8] sm:$0xff]  ;;  %v9581_v33 = vld [vmem:[#allocation8 + $0x2c4] ss:$16 sps:$4 sm:$0xff]   ;;  %v9621_v5 = vld [vmem:[#allocation8 + $0x3a0] ss:$16 sps:$4 sm:$0xff]  }
 0x10d   :  { %v249_v29 = vld [vmem:[#allocation2 + $0x128] sm:$0xff]  ;;  %v9593_v47 = vld [vmem:[#allocation8 + $0x304] ss:$16 sps:$4 sm:$0xff]   ;;  %vm11093_vm1 = vmpackc.low %vm3254_vm0, %vm3254_vm0 }
 0x10e   :  { %v273_v31 = vpack.c.bf16 %v249_v29, %v237_v28  ;;  %v9576_v32 = vld [vmem:[#allocation8 + $0x2a8] ss:$16 sps:$4 sm:$0xff]   ;;  %v9626_v4 = vld [vmem:[#allocation8 + $0x3ac] ss:$16 sps:$4 sm:$0xff]   ;;  %v238_v29 = vld [vmem:[#allocation2 + $0xd0] sm:$0xff] }
 0x10f   :  { %2627 = vmatpush1.bf16.msra.mxu0 %v9499_v34  ;;  %2945 = vmatpush1.bf16.msra.mxu1 %v9500_v35  ;;  %v9584_v34 = vld [vmem:[#allocation8 + $0x2cc] ss:$16 sps:$4 sm:$0xff]   ;;  %v236_v35 = vld [vmem:[#allocation2 + $0xc0] sm:$0xff]  ;;  %v9594_v50 = vld [vmem:[#allocation8 + $0x308] ss:$16 sps:$4 sm:$0xff]  }
 0x110   :  { %2628 = vmatprep.subr.bf16.mxu0 %v9501_v36  ;;  %2946 = vmatprep.subr.bf16.mxu1 %v9503_v37  ;;  %v248_v36 = vld [vmem:[#allocation2 + $0x120] sm:$0xff]  ;;  %v9648_v28 = vld [vmem:[#allocation8 + $0x428] ss:$16 sps:$4 sm:$0xff]  }
 0x111   :  { %v272_v37 = vpack.c.bf16 %v248_v36, %v236_v35  ;;  %v229_v35 = vld [vmem:[#allocation2 + $0x88] sm:$0xff]  ;;  %v9651_v36 = vld [vmem:[#allocation8 + $0x440] ss:$16 sps:$4 sm:$0xff]  }
 0x113   :  { %2629 = vmatpush1.bf16.msra.mxu0 %v9505_v38  ;;  %2947 = vmatpush1.bf16.msra.mxu1 %v9506_v39  ;;  %v9579_v38 = vld [vmem:[#allocation8 + $0x2c0] ss:$16 sps:$4 sm:$0xff]   ;;  %v9582_v39 = vld [vmem:[#allocation8 + $0x2c8] ss:$16 sps:$4 sm:$0xff]  }
 0x114   :  { %2630 = vmatprep.subr.bf16.mxu0 %v9507_v40  ;;  %2948 = vmatprep.subr.bf16.mxu1 %v9509_v41  ;;  %v215_v40 = vld [vmem:[#allocation2 + $0x18] sm:$0xff] }
 0x115   :  { %v227_v41 = vld [vmem:[#allocation2 + $0x78] sm:$0xff] }
 0x117   :  { %2631 = vmatpush1.bf16.msra.mxu0 %v9511_v42  ;;  %2949 = vmatpush1.bf16.msra.mxu1 %v9512_v43  ;;  %v9587_v42 = vld [vmem:[#allocation8 + $0x2e4] ss:$16 sps:$4 sm:$0xff]   ;;  %v9590_v43 = vld [vmem:[#allocation8 + $0x2ec] ss:$16 sps:$4 sm:$0xff]  }
 0x118   :  { %2632 = vmatprep.subr.bf16.mxu0 %v9513_v44  ;;  %2950 = vmatprep.subr.bf16.mxu1 %v9515_v45  ;;  %v263_v44 = vpack.c.bf16 %v227_v41, %v215_v40  ;;  %v9585_v45 = vld [vmem:[#allocation8 + $0x2e0] ss:$16 sps:$4 sm:$0xff]  }
 0x119   :  { %v9657_v41 = vld [vmem:[#allocation8 + $0x460] ss:$16 sps:$4 sm:$0xff]  }
 0x11b   :  { %2633 = vmatpush1.bf16.msra.mxu0 %v9517_v48  ;;  %2951 = vmatpush1.bf16.msra.mxu1 %v9518_v49  ;;  %v9596_v48 = vld [vmem:[#allocation8 + $0x30c] ss:$16 sps:$4 sm:$0xff]   ;;  %v9591_v49 = vld [vmem:[#allocation8 + $0x300] ss:$16 sps:$4 sm:$0xff]  }
 0x11c   :  { %2634 = vmatprep.subr.bf16.mxu0 %v9519_v51  ;;  %2952 = vmatprep.subr.bf16.mxu1 %v9521_v52  ;;  %v9599_v51 = vld [vmem:[#allocation8 + $0x324] ss:$16 sps:$4 sm:$0xff]   ;;  %v9602_v52 = vld [vmem:[#allocation8 + $0x32c] ss:$16 sps:$4 sm:$0xff]  }
 0x11f   :  { %2635 = vmatpush1.bf16.msra.mxu0 %v9523_v53  ;;  %2953 = vmatpush1.bf16.msra.mxu1 %v9524_v54  ;;  %v9597_v53 = vld [vmem:[#allocation8 + $0x320] ss:$16 sps:$4 sm:$0xff]   ;;  %v9600_v54 = vld [vmem:[#allocation8 + $0x328] ss:$16 sps:$4 sm:$0xff]  }
 0x120   :  { %2636 = vmatprep.subr.bf16.mxu0 %v9525_v55  ;;  %2954 = vmatprep.subr.bf16.mxu1 %v9527_v56  ;;  %v9605_v55 = vld [vmem:[#allocation8 + $0x344] ss:$16 sps:$4 sm:$0xff]   ;;  %v9608_v56 = vld [vmem:[#allocation8 + $0x34c] ss:$16 sps:$4 sm:$0xff]  }
 0x123   :  { %2637 = vmatpush1.bf16.msra.mxu0 %v9529_v57  ;;  %2955 = vmatpush1.bf16.msra.mxu1 %v9530_v58  ;;  %v9603_v57 = vld [vmem:[#allocation8 + $0x340] ss:$16 sps:$4 sm:$0xff]   ;;  %v9606_v58 = vld [vmem:[#allocation8 + $0x348] ss:$16 sps:$4 sm:$0xff]  }
 0x124   :  { %2638 = vmatprep.subr.bf16.mxu0 %v9531_v59  ;;  %2956 = vmatprep.subr.bf16.mxu1 %v9533_v60  ;;  %v9611_v59 = vld [vmem:[#allocation8 + $0x364] ss:$16 sps:$4 sm:$0xff]   ;;  %v9614_v60 = vld [vmem:[#allocation8 + $0x36c] ss:$16 sps:$4 sm:$0xff]  }
 0x127   :  { %2639 = vmatpush1.bf16.msra.mxu0 %v9535_v61  ;;  %2957 = vmatpush1.bf16.msra.mxu1 %v9536_v62  ;;  %v9609_v61 = vld [vmem:[#allocation8 + $0x360] ss:$16 sps:$4 sm:$0xff]   ;;  %v9612_v62 = vld [vmem:[#allocation8 + $0x368] ss:$16 sps:$4 sm:$0xff]  }
 0x128   :  { %2640 = vmatprep.subr.bf16.mxu0 %v9537_v63  ;;  %2958 = vmatprep.subr.bf16.mxu1 %v9539_v0  ;;  %v9617_v63 = vld [vmem:[#allocation8 + $0x384] ss:$16 sps:$4 sm:$0xff]   ;;  %v9620_v0 = vld [vmem:[#allocation8 + $0x38c] ss:$16 sps:$4 sm:$0xff]  }
 0x12b   :  { %2641 = vmatpush1.bf16.msra.mxu0 %v9541_v1  ;;  %2959 = vmatpush1.bf16.msra.mxu1 %v9542_v2  ;;  %v9615_v1 = vld [vmem:[#allocation8 + $0x380] ss:$16 sps:$4 sm:$0xff]   ;;  %v9618_v2 = vld [vmem:[#allocation8 + $0x388] ss:$16 sps:$4 sm:$0xff]  }
 0x12c   :  { %2663 = vmatprep.subr.bf16.mxu0 %v9545_v3  ;;  %2981 = vmatprep.subr.bf16.mxu1 %v9548_v6  ;;  %v9623_v3 = vld [vmem:[#allocation8 + $0x3a4] ss:$16 sps:$4 sm:$0xff]   ;;  %v9624_v6 = vld [vmem:[#allocation8 + $0x3a8] ss:$16 sps:$4 sm:$0xff]  }
 0x12e   :  { %2643 = vmatmul.mubr.bf16.vlgmr.msra.gmra.mrb[0].mxu0 %v260_v9  ;;  %2961 = vmatmul.mubr.bf16.vlgmr.msra.gmra.mrb[0].mxu1 %v260_v9  ;;  %v9627_v9 = vld [vmem:[#allocation8 + $0x3c0] ss:$16 sps:$4 sm:$0xff]  }
 0x12f   :  { %2664 = vmatpush1.bf16.msra.mxu0 %v9543_v7  ;;  %2982 = vmatpush1.bf16.msra.mxu1 %v9546_v8  ;;  %v9629_v7 = vld [vmem:[#allocation8 + $0x3c4] ss:$16 sps:$4 sm:$0xff]   ;;  %v9632_v8 = vld [vmem:[#allocation8 + $0x3cc] ss:$16 sps:$4 sm:$0xff]  }
 0x130   :  { %2665 = vmatprep.subr.bf16.mxu0 %v9551_v10  ;;  %2983 = vmatprep.subr.bf16.mxu1 %v9554_v11  ;;  %v9630_v10 = vld [vmem:[#allocation8 + $0x3c8] ss:$16 sps:$4 sm:$0xff]   ;;  %v9635_v11 = vld [vmem:[#allocation8 + $0x3e4] ss:$16 sps:$4 sm:$0xff]  }
 0x131   :  { %2652 = vmatprep.mubr.bf16.mxu0 %v273_v31  ;;  %2970 = vmatprep.mubr.bf16.mxu1 %v273_v31  ;;  %v9653_v31 = vld [vmem:[#allocation8 + $0x444] ss:$16 sps:$4 sm:$0xff]  }
 0x133   :  { %2666 = vmatpush1.bf16.msra.mxu0 %v9549_v12  ;;  %2984 = vmatpush1.bf16.msra.mxu1 %v9552_v13  ;;  %v9638_v12 = vld [vmem:[#allocation8 + $0x3ec] ss:$16 sps:$4 sm:$0xff]   ;;  %v9633_v13 = vld [vmem:[#allocation8 + $0x3e0] ss:$16 sps:$4 sm:$0xff]  }
 0x134   :  { %2667 = vmatprep.subr.bf16.mxu0 %v9557_v14  ;;  %2985 = vmatprep.subr.bf16.mxu1 %v9560_v15  ;;  %v9636_v14 = vld [vmem:[#allocation8 + $0x3e8] ss:$16 sps:$4 sm:$0xff]   ;;  %v9641_v15 = vld [vmem:[#allocation8 + $0x404] ss:$16 sps:$4 sm:$0xff]  }
 0x136   :  { %2653 = vmatmul.mubr.bf16.gmra.mrb[4].mxu0 %v272_v37  ;;  %2971 = vmatmul.mubr.bf16.gmra.mrb[4].mxu1 %v272_v37  ;;  %v9654_v37 = vld [vmem:[#allocation8 + $0x448] ss:$16 sps:$4 sm:$0xff]  }
 0x137   :  { %2668 = vmatpush1.bf16.msra.mxu0 %v9555_v16  ;;  %2986 = vmatpush1.bf16.msra.mxu1 %v9558_v17  ;;  %v214_v16 = vld [vmem:[#allocation2 + $0x10] sm:$0xff] }
 0x138   :  { %2669 = vmatprep.subr.bf16.mxu0 %v9563_v18  ;;  %2987 = vmatprep.subr.bf16.mxu1 %v9566_v19  ;;  %v226_v17 = vld [vmem:[#allocation2 + $0x70] sm:$0xff]  ;;  %v9644_v18 = vld [vmem:[#allocation8 + $0x40c] ss:$16 sps:$4 sm:$0xff]  }
 0x139   :  { %2695 = vmatprep.mubr.bf16.mxu0 %v263_v44  ;;  %3013 = vmatprep.mubr.bf16.mxu1 %v263_v44  ;;  %v239_v19 = vld [vmem:[#allocation2 + $0xd8] sm:$0xff] }
 0x13a   :  { %v9668_v44 = vld [vmem:[#allocation8 + $0x48c] ss:$16 sps:$4 sm:$0xff]  }
 0x13b   :  { %2670 = vmatpush1.bf16.msra.mxu0 %v9561_v20  ;;  %2988 = vmatpush1.bf16.msra.mxu1 %v9564_v21  ;;  %v262_v20 = vpack.c.bf16 %v226_v17, %v214_v16  ;;  %v251_v21 = vld [vmem:[#allocation2 + $0x138] sm:$0xff]  ;;  %v9717_v17 = vld [vmem:[#allocation8 + $0x5a0] ss:$16 sps:$4 sm:$0xff]  }
 0x13c   :  { %2671 = vmatprep.subr.bf16.mxu0 %v9569_v22  ;;  %2989 = vmatprep.subr.bf16.mxu1 %v9572_v23  ;;  %v9639_v22 = vld [vmem:[#allocation8 + $0x400] ss:$16 sps:$4 sm:$0xff]   ;;  %v9642_v23 = vld [vmem:[#allocation8 + $0x408] ss:$16 sps:$4 sm:$0xff]   ;;  %v9722_v16 = vld [vmem:[#allocation8 + $0x5ac] ss:$16 sps:$4 sm:$0xff]  }
 0x13f   :  { %2672 = vmatpush1.bf16.msra.mxu0 %v9567_v24  ;;  %2990 = vmatpush1.bf16.msra.mxu1 %v9570_v25  ;;  %v9647_v24 = vld [vmem:[#allocation8 + $0x424] ss:$16 sps:$4 sm:$0xff]   ;;  %v9650_v25 = vld [vmem:[#allocation8 + $0x42c] ss:$16 sps:$4 sm:$0xff]  }
 0x140   :  { %2673 = vmatprep.subr.bf16.mxu0 %v9575_v26  ;;  %2991 = vmatprep.subr.bf16.mxu1 %v9578_v27  ;;  %v9645_v26 = vld [vmem:[#allocation8 + $0x420] ss:$16 sps:$4 sm:$0xff]   ;;  %v275_v27 = vpack.c.bf16 %v251_v21, %v239_v19  ;;  %v9725_v19 = vld [vmem:[#allocation8 + $0x5c4] ss:$16 sps:$4 sm:$0xff]  }
 0x141   :  { %v9723_v21 = vld [vmem:[#allocation8 + $0x5c0] ss:$16 sps:$4 sm:$0xff]  }
 0x143   :  { %2674 = vmatpush1.bf16.msra.mxu0 %v9573_v30  ;;  %2992 = vmatpush1.bf16.msra.mxu1 %v9576_v32  ;;  %v250_v30 = vld [vmem:[#allocation2 + $0x130] sm:$0xff]  ;;  %v9656_v32 = vld [vmem:[#allocation8 + $0x44c] ss:$16 sps:$4 sm:$0xff]  }
 0x144   :  { %2675 = vmatprep.subr.bf16.mxu0 %v9581_v33  ;;  %2993 = vmatprep.subr.bf16.mxu1 %v9584_v34  ;;  %v217_v33 = vld [vmem:[#allocation2 + $0x28] sm:$0xff]  ;;  %v274_v34 = vpack.c.bf16 %v250_v30, %v238_v29  ;;  %v228_v29 = vld [vmem:[#allocation2 + $0x80] sm:$0xff] }
 0x145   :  { %v265_v40 = vpack.c.bf16 %v229_v35, %v217_v33  ;;  %v9740_v30 = vld [vmem:[#allocation8 + $0x60c] ss:$16 sps:$4 sm:$0xff]  }
 0x146   :  { %v253_v35 = vld [vmem:[#allocation2 + $0x148] sm:$0xff] }
 0x147   :  { %2676 = vmatpush1.bf16.msra.mxu0 %v9579_v38  ;;  %2994 = vmatpush1.bf16.msra.mxu1 %v9582_v39  ;;  %v9659_v38 = vld [vmem:[#allocation8 + $0x464] ss:$16 sps:$4 sm:$0xff]   ;;  %v9662_v39 = vld [vmem:[#allocation8 + $0x46c] ss:$16 sps:$4 sm:$0xff]  }
 0x148   :  { %2677 = vmatprep.subr.bf16.mxu0 %v9587_v42  ;;  %2995 = vmatprep.subr.bf16.mxu1 %v9590_v43  ;;  %v9660_v42 = vld [vmem:[#allocation8 + $0x468] ss:$16 sps:$4 sm:$0xff]   ;;  %v9665_v43 = vld [vmem:[#allocation8 + $0x484] ss:$16 sps:$4 sm:$0xff]  }
 0x14b   :  { %2678 = vmatpush1.bf16.msra.mxu0 %v9585_v45  ;;  %2996 = vmatpush1.bf16.msra.mxu1 %v9588_v46  ;;  %v9663_v45 = vld [vmem:[#allocation8 + $0x480] ss:$16 sps:$4 sm:$0xff]   ;;  %v9666_v46 = vld [vmem:[#allocation8 + $0x488] ss:$16 sps:$4 sm:$0xff]  }
 0x14c   :  { %2679 = vmatprep.subr.bf16.mxu0 %v9593_v47  ;;  %2997 = vmatprep.subr.bf16.mxu1 %v9596_v48  ;;  %v9671_v47 = vld [vmem:[#allocation8 + $0x4a4] ss:$16 sps:$4 sm:$0xff]   ;;  %v9674_v48 = vld [vmem:[#allocation8 + $0x4ac] ss:$16 sps:$4 sm:$0xff]  }
 0x14f   :  { %2680 = vmatpush1.bf16.msra.mxu0 %v9591_v49  ;;  %2998 = vmatpush1.bf16.msra.mxu1 %v9594_v50  ;;  %v9669_v49 = vld [vmem:[#allocation8 + $0x4a0] ss:$16 sps:$4 sm:$0xff]   ;;  %v9672_v50 = vld [vmem:[#allocation8 + $0x4a8] ss:$16 sps:$4 sm:$0xff]  }
 0x150   :  { %2681 = vmatprep.subr.bf16.mxu0 %v9599_v51  ;;  %2999 = vmatprep.subr.bf16.mxu1 %v9602_v52  ;;  %v9677_v51 = vld [vmem:[#allocation8 + $0x4c4] ss:$16 sps:$4 sm:$0xff]   ;;  %v9680_v52 = vld [vmem:[#allocation8 + $0x4cc] ss:$16 sps:$4 sm:$0xff]  }
 0x153   :  { %2682 = vmatpush1.bf16.msra.mxu0 %v9597_v53  ;;  %3000 = vmatpush1.bf16.msra.mxu1 %v9600_v54  ;;  %v9675_v53 = vld [vmem:[#allocation8 + $0x4c0] ss:$16 sps:$4 sm:$0xff]   ;;  %v9678_v54 = vld [vmem:[#allocation8 + $0x4c8] ss:$16 sps:$4 sm:$0xff]  }
 0x154   :  { %2683 = vmatprep.subr.bf16.mxu0 %v9605_v55  ;;  %3001 = vmatprep.subr.bf16.mxu1 %v9608_v56  ;;  %v9683_v55 = vld [vmem:[#allocation8 + $0x4e4] ss:$16 sps:$4 sm:$0xff]   ;;  %v9686_v56 = vld [vmem:[#allocation8 + $0x4ec] ss:$16 sps:$4 sm:$0xff]  }
 0x157   :  { %2684 = vmatpush1.bf16.msra.mxu0 %v9603_v57  ;;  %3002 = vmatpush1.bf16.msra.mxu1 %v9606_v58  ;;  %v9681_v57 = vld [vmem:[#allocation8 + $0x4e0] ss:$16 sps:$4 sm:$0xff]   ;;  %v9684_v58 = vld [vmem:[#allocation8 + $0x4e8] ss:$16 sps:$4 sm:$0xff]  }
 0x158   :  { %2685 = vmatprep.subr.bf16.mxu0 %v9611_v59  ;;  %3003 = vmatprep.subr.bf16.mxu1 %v9614_v60  ;;  %v9689_v59 = vld [vmem:[#allocation8 + $0x504] ss:$16 sps:$4 sm:$0xff]   ;;  %v9692_v60 = vld [vmem:[#allocation8 + $0x50c] ss:$16 sps:$4 sm:$0xff]  }
 0x15b   :  { %2686 = vmatpush1.bf16.msra.mxu0 %v9609_v61  ;;  %3004 = vmatpush1.bf16.msra.mxu1 %v9612_v62  ;;  %v9687_v61 = vld [vmem:[#allocation8 + $0x500] ss:$16 sps:$4 sm:$0xff]   ;;  %v9690_v62 = vld [vmem:[#allocation8 + $0x508] ss:$16 sps:$4 sm:$0xff]  }
 0x15c   :  { %2687 = vmatprep.subr.bf16.mxu0 %v9617_v63  ;;  %3005 = vmatprep.subr.bf16.mxu1 %v9620_v0  ;;  %v9695_v63 = vld [vmem:[#allocation8 + $0x524] ss:$16 sps:$4 sm:$0xff]   ;;  %v9698_v0 = vld [vmem:[#allocation8 + $0x52c] ss:$16 sps:$4 sm:$0xff]  }
 0x15f   :  { %2688 = vmatpush1.bf16.msra.mxu0 %v9615_v1  ;;  %3006 = vmatpush1.bf16.msra.mxu1 %v9618_v2  ;;  %v9693_v1 = vld [vmem:[#allocation8 + $0x520] ss:$16 sps:$4 sm:$0xff]   ;;  %v9696_v2 = vld [vmem:[#allocation8 + $0x528] ss:$16 sps:$4 sm:$0xff]  }
 0x160   :  { %2689 = vmatprep.subr.bf16.mxu0 %v9623_v3  ;;  %3007 = vmatprep.subr.bf16.mxu1 %v9626_v4  ;;  %v9701_v3 = vld [vmem:[#allocation8 + $0x544] ss:$16 sps:$4 sm:$0xff]   ;;  %v9704_v4 = vld [vmem:[#allocation8 + $0x54c] ss:$16 sps:$4 sm:$0xff]  }
 0x163   :  { %2690 = vmatpush1.bf16.msra.mxu0 %v9621_v5  ;;  %3008 = vmatpush1.bf16.msra.mxu1 %v9624_v6  ;;  %v9699_v5 = vld [vmem:[#allocation8 + $0x540] ss:$16 sps:$4 sm:$0xff]   ;;  %v9702_v6 = vld [vmem:[#allocation8 + $0x548] ss:$16 sps:$4 sm:$0xff]  }
 0x164   :  { %2691 = vmatprep.subr.bf16.mxu0 %v9629_v7  ;;  %3009 = vmatprep.subr.bf16.mxu1 %v9632_v8  ;;  %v9707_v7 = vld [vmem:[#allocation8 + $0x564] ss:$16 sps:$4 sm:$0xff]   ;;  %v9710_v8 = vld [vmem:[#allocation8 + $0x56c] ss:$16 sps:$4 sm:$0xff]  }
 0x167   :  { %2692 = vmatpush1.bf16.msra.mxu0 %v9627_v9  ;;  %3010 = vmatpush1.bf16.msra.mxu1 %v9630_v10  ;;  %v9705_v9 = vld [vmem:[#allocation8 + $0x560] ss:$16 sps:$4 sm:$0xff]   ;;  %v9708_v10 = vld [vmem:[#allocation8 + $0x568] ss:$16 sps:$4 sm:$0xff]  }
 0x168   :  { %2693 = vmatprep.subr.bf16.mxu0 %v9635_v11  ;;  %3011 = vmatprep.subr.bf16.mxu1 %v9638_v12  ;;  %v9713_v11 = vld [vmem:[#allocation8 + $0x584] ss:$16 sps:$4 sm:$0xff]   ;;  %v9716_v12 = vld [vmem:[#allocation8 + $0x58c] ss:$16 sps:$4 sm:$0xff]  }
 0x16b   :  { %2694 = vmatpush1.bf16.msra.mxu0 %v9633_v13  ;;  %3012 = vmatpush1.bf16.msra.mxu1 %v9636_v14  ;;  %v9711_v13 = vld [vmem:[#allocation8 + $0x580] ss:$16 sps:$4 sm:$0xff]   ;;  %v9714_v14 = vld [vmem:[#allocation8 + $0x588] ss:$16 sps:$4 sm:$0xff]  }
 0x16c   :  { %2716 = vmatprep.subr.bf16.mxu0 %v9641_v15  ;;  %3034 = vmatprep.subr.bf16.mxu1 %v9644_v18  ;;  %v9719_v15 = vld [vmem:[#allocation8 + $0x5a4] ss:$16 sps:$4 sm:$0xff]   ;;  %v9720_v18 = vld [vmem:[#allocation8 + $0x5a8] ss:$16 sps:$4 sm:$0xff]  }
 0x16e   :  { %2696 = vmatmul.mubr.bf16.vlgmr.msra.gmra.mrb[0].mxu0 %v262_v20  ;;  %3014 = vmatmul.mubr.bf16.vlgmr.msra.gmra.mrb[0].mxu1 %v262_v20  ;;  %v9728_v20 = vld [vmem:[#allocation8 + $0x5cc] ss:$16 sps:$4 sm:$0xff]  }
 0x16f   :  { %2717 = vmatpush1.bf16.msra.mxu0 %v9639_v22  ;;  %3035 = vmatpush1.bf16.msra.mxu1 %v9642_v23  ;;  %v9726_v22 = vld [vmem:[#allocation8 + $0x5c8] ss:$16 sps:$4 sm:$0xff]   ;;  %v9731_v23 = vld [vmem:[#allocation8 + $0x5e4] ss:$16 sps:$4 sm:$0xff]  }
 0x170   :  { %2718 = vmatprep.subr.bf16.mxu0 %v9647_v24  ;;  %3036 = vmatprep.subr.bf16.mxu1 %v9650_v25  ;;  %v9734_v24 = vld [vmem:[#allocation8 + $0x5ec] ss:$16 sps:$4 sm:$0xff]   ;;  %v9729_v25 = vld [vmem:[#allocation8 + $0x5e0] ss:$16 sps:$4 sm:$0xff]  }
 0x171   :  { %2705 = vmatprep.mubr.bf16.mxu0 %v275_v27  ;;  %3023 = vmatprep.mubr.bf16.mxu1 %v275_v27  ;;  %v9737_v27 = vld [vmem:[#allocation8 + $0x604] ss:$16 sps:$4 sm:$0xff]  }
 0x173   :  { %2719 = vmatpush1.bf16.msra.mxu0 %v9645_v26  ;;  %3037 = vmatpush1.bf16.msra.mxu1 %v9648_v28  ;;  %v9732_v26 = vld [vmem:[#allocation8 + $0x5e8] ss:$16 sps:$4 sm:$0xff]   ;;  %v216_v28 = vld [vmem:[#allocation2 + $0x20] sm:$0xff] }
 0x174   :  { %2720 = vmatprep.subr.bf16.mxu0 %v9653_v31  ;;  %3038 = vmatprep.subr.bf16.mxu1 %v9656_v32  ;;  %v9735_v31 = vld [vmem:[#allocation8 + $0x600] ss:$16 sps:$4 sm:$0xff]   ;;  %v9738_v32 = vld [vmem:[#allocation8 + $0x608] ss:$16 sps:$4 sm:$0xff]   ;;  %v264_v33 = vpack.c.bf16 %v228_v29, %v216_v28  ;;  %v9818_v28 = vld [vmem:[#allocation8 + $0x7ac] ss:$16 sps:$4 sm:$0xff]  }
 0x175   :  { %v9813_v29 = vld [vmem:[#allocation8 + $0x7a0] ss:$16 sps:$4 sm:$0xff]  }
 0x176   :  { %2706 = vmatmul.mubr.bf16.gmra.mrb[4].mxu0 %v274_v34  ;;  %3024 = vmatmul.mubr.bf16.gmra.mrb[4].mxu1 %v274_v34  ;;  %v241_v34 = vld [vmem:[#allocation2 + $0xe8] sm:$0xff] }
 0x177   :  { %2721 = vmatpush1.bf16.msra.mxu0 %v9651_v36  ;;  %3039 = vmatpush1.bf16.msra.mxu1 %v9654_v37  ;;  %v9743_v36 = vld [vmem:[#allocation8 + $0x624] ss:$16 sps:$4 sm:$0xff]   ;;  %v9746_v37 = vld [vmem:[#allocation8 + $0x62c] ss:$16 sps:$4 sm:$0xff]  }
 0x178   :  { %2722 = vmatprep.subr.bf16.mxu0 %v9659_v38  ;;  %3040 = vmatprep.subr.bf16.mxu1 %v9662_v39  ;;  %v9741_v38 = vld [vmem:[#allocation8 + $0x620] ss:$16 sps:$4 sm:$0xff]   ;;  %v9744_v39 = vld [vmem:[#allocation8 + $0x628] ss:$16 sps:$4 sm:$0xff]  }
 0x179   :  { %2748 = vmatprep.mubr.bf16.mxu0 %v265_v40  ;;  %3066 = vmatprep.mubr.bf16.mxu1 %v265_v40  ;;  %v277_v40 = vpack.c.bf16 %v253_v35, %v241_v34  ;;  %v9822_v34 = vld [vmem:[#allocation8 + $0x7c8] ss:$16 sps:$4 sm:$0xff]   ;;  %v9827_v35 = vld [vmem:[#allocation8 + $0x7e4] ss:$16 sps:$4 sm:$0xff]  }
 0x17b   :  { %2723 = vmatpush1.bf16.msra.mxu0 %v9657_v41  ;;  %3041 = vmatpush1.bf16.msra.mxu1 %v9660_v42  ;;  %v9749_v41 = vld [vmem:[#allocation8 + $0x644] ss:$16 sps:$4 sm:$0xff]  }
 0x17c   :  { %2724 = vmatprep.subr.bf16.mxu0 %v9665_v43  ;;  %3042 = vmatprep.subr.bf16.mxu1 %v9668_v44  ;;  %v240_v42 = vld [vmem:[#allocation2 + $0xe0] sm:$0xff]  ;;  %v9752_v44 = vld [vmem:[#allocation8 + $0x64c] ss:$16 sps:$4 sm:$0xff]  }
 0x17d   :  { %v252_v43 = vld [vmem:[#allocation2 + $0x140] sm:$0xff] }
 0x17f   :  { %2725 = vmatpush1.bf16.msra.mxu0 %v9663_v45  ;;  %3043 = vmatpush1.bf16.msra.mxu1 %v9666_v46  ;;  %v9747_v45 = vld [vmem:[#allocation8 + $0x640] ss:$16 sps:$4 sm:$0xff]   ;;  %v9750_v46 = vld [vmem:[#allocation8 + $0x648] ss:$16 sps:$4 sm:$0xff]  }
 0x180   :  { %2726 = vmatprep.subr.bf16.mxu0 %v9671_v47  ;;  %3044 = vmatprep.subr.bf16.mxu1 %v9674_v48  ;;  %v276_v47 = vpack.c.bf16 %v252_v43, %v240_v42  ;;  %v219_v48 = vld [vmem:[#allocation2 + $0x38] sm:$0xff]  ;;  %v9831_v43 = vld [vmem:[#allocation8 + $0x800] ss:$16 sps:$4 sm:$0xff]  }
 0x181   :  { %v9836_v42 = vld [vmem:[#allocation8 + $0x80c] ss:$16 sps:$4 sm:$0xff]  }
 0x183   :  { %2727 = vmatpush1.bf16.msra.mxu0 %v9669_v49  ;;  %3045 = vmatpush1.bf16.msra.mxu1 %v9672_v50  ;;  %v231_v49 = vld [vmem:[#allocation2 + $0x98] sm:$0xff]  ;;  %v9755_v50 = vld [vmem:[#allocation8 + $0x664] ss:$16 sps:$4 sm:$0xff]  }
 0x184   :  { %2728 = vmatprep.subr.bf16.mxu0 %v9677_v51  ;;  %3046 = vmatprep.subr.bf16.mxu1 %v9680_v52  ;;  %v9758_v51 = vld [vmem:[#allocation8 + $0x66c] ss:$16 sps:$4 sm:$0xff]   ;;  %v267_v52 = vpack.c.bf16 %v231_v49, %v219_v48  ;;  %v9839_v48 = vld [vmem:[#allocation8 + $0x824] ss:$16 sps:$4 sm:$0xff]  }
 0x185   :  { %v9842_v49 = vld [vmem:[#allocation8 + $0x82c] ss:$16 sps:$4 sm:$0xff]  }
 0x187   :  { %2729 = vmatpush1.bf16.msra.mxu0 %v9675_v53  ;;  %3047 = vmatpush1.bf16.msra.mxu1 %v9678_v54  ;;  %v9753_v53 = vld [vmem:[#allocation8 + $0x660] ss:$16 sps:$4 sm:$0xff]   ;;  %v9756_v54 = vld [vmem:[#allocation8 + $0x668] ss:$16 sps:$4 sm:$0xff]  }
 0x188   :  { %2730 = vmatprep.subr.bf16.mxu0 %v9683_v55  ;;  %3048 = vmatprep.subr.bf16.mxu1 %v9686_v56  ;;  %v9761_v55 = vld [vmem:[#allocation8 + $0x684] ss:$16 sps:$4 sm:$0xff]   ;;  %v9764_v56 = vld [vmem:[#allocation8 + $0x68c] ss:$16 sps:$4 sm:$0xff]  }
 0x18b   :  { %2731 = vmatpush1.bf16.msra.mxu0 %v9681_v57  ;;  %3049 = vmatpush1.bf16.msra.mxu1 %v9684_v58  ;;  %v9759_v57 = vld [vmem:[#allocation8 + $0x680] ss:$16 sps:$4 sm:$0xff]   ;;  %v9762_v58 = vld [vmem:[#allocation8 + $0x688] ss:$16 sps:$4 sm:$0xff]  }
 0x18c   :  { %2732 = vmatprep.subr.bf16.mxu0 %v9689_v59  ;;  %3050 = vmatprep.subr.bf16.mxu1 %v9692_v60  ;;  %v9767_v59 = vld [vmem:[#allocation8 + $0x6a4] ss:$16 sps:$4 sm:$0xff]   ;;  %v9770_v60 = vld [vmem:[#allocation8 + $0x6ac] ss:$16 sps:$4 sm:$0xff]  }
 0x18f   :  { %2733 = vmatpush1.bf16.msra.mxu0 %v9687_v61  ;;  %3051 = vmatpush1.bf16.msra.mxu1 %v9690_v62  ;;  %v9765_v61 = vld [vmem:[#allocation8 + $0x6a0] ss:$16 sps:$4 sm:$0xff]   ;;  %v9768_v62 = vld [vmem:[#allocation8 + $0x6a8] ss:$16 sps:$4 sm:$0xff]  }
 0x190   :  { %2734 = vmatprep.subr.bf16.mxu0 %v9695_v63  ;;  %3052 = vmatprep.subr.bf16.mxu1 %v9698_v0  ;;  %v9773_v63 = vld [vmem:[#allocation8 + $0x6c4] ss:$16 sps:$4 sm:$0xff]   ;;  %v9776_v0 = vld [vmem:[#allocation8 + $0x6cc] ss:$16 sps:$4 sm:$0xff]  }
 0x193   :  { %2735 = vmatpush1.bf16.msra.mxu0 %v9693_v1  ;;  %3053 = vmatpush1.bf16.msra.mxu1 %v9696_v2  ;;  %v9771_v1 = vld [vmem:[#allocation8 + $0x6c0] ss:$16 sps:$4 sm:$0xff]   ;;  %v9774_v2 = vld [vmem:[#allocation8 + $0x6c8] ss:$16 sps:$4 sm:$0xff]  }
 0x194   :  { %2736 = vmatprep.subr.bf16.mxu0 %v9701_v3  ;;  %3054 = vmatprep.subr.bf16.mxu1 %v9704_v4  ;;  %v9779_v3 = vld [vmem:[#allocation8 + $0x6e4] ss:$16 sps:$4 sm:$0xff]   ;;  %v9782_v4 = vld [vmem:[#allocation8 + $0x6ec] ss:$16 sps:$4 sm:$0xff]  }
 0x197   :  { %2737 = vmatpush1.bf16.msra.mxu0 %v9699_v5  ;;  %3055 = vmatpush1.bf16.msra.mxu1 %v9702_v6  ;;  %v9777_v5 = vld [vmem:[#allocation8 + $0x6e0] ss:$16 sps:$4 sm:$0xff]   ;;  %v9780_v6 = vld [vmem:[#allocation8 + $0x6e8] ss:$16 sps:$4 sm:$0xff]  }
 0x198   :  { %2738 = vmatprep.subr.bf16.mxu0 %v9707_v7  ;;  %3056 = vmatprep.subr.bf16.mxu1 %v9710_v8  ;;  %v9785_v7 = vld [vmem:[#allocation8 + $0x704] ss:$16 sps:$4 sm:$0xff]   ;;  %v9788_v8 = vld [vmem:[#allocation8 + $0x70c] ss:$16 sps:$4 sm:$0xff]  }
 0x19b   :  { %2739 = vmatpush1.bf16.msra.mxu0 %v9705_v9  ;;  %3057 = vmatpush1.bf16.msra.mxu1 %v9708_v10  ;;  %v9783_v9 = vld [vmem:[#allocation8 + $0x700] ss:$16 sps:$4 sm:$0xff]   ;;  %v9786_v10 = vld [vmem:[#allocation8 + $0x708] ss:$16 sps:$4 sm:$0xff]  }
 0x19c   :  { %2740 = vmatprep.subr.bf16.mxu0 %v9713_v11  ;;  %3058 = vmatprep.subr.bf16.mxu1 %v9716_v12  ;;  %v9791_v11 = vld [vmem:[#allocation8 + $0x724] ss:$16 sps:$4 sm:$0xff]   ;;  %v9794_v12 = vld [vmem:[#allocation8 + $0x72c] ss:$16 sps:$4 sm:$0xff]  }
 0x19f   :  { %2741 = vmatpush1.bf16.msra.mxu0 %v9711_v13  ;;  %3059 = vmatpush1.bf16.msra.mxu1 %v9714_v14  ;;  %v9789_v13 = vld [vmem:[#allocation8 + $0x720] ss:$16 sps:$4 sm:$0xff]   ;;  %v9792_v14 = vld [vmem:[#allocation8 + $0x728] ss:$16 sps:$4 sm:$0xff]  }
 0x1a0   :  { %2742 = vmatprep.subr.bf16.mxu0 %v9719_v15  ;;  %3060 = vmatprep.subr.bf16.mxu1 %v9722_v16  ;;  %v9797_v15 = vld [vmem:[#allocation8 + $0x744] ss:$16 sps:$4 sm:$0xff]   ;;  %v9800_v16 = vld [vmem:[#allocation8 + $0x74c] ss:$16 sps:$4 sm:$0xff]  }
 0x1a3   :  { %2743 = vmatpush1.bf16.msra.mxu0 %v9717_v17  ;;  %3061 = vmatpush1.bf16.msra.mxu1 %v9720_v18  ;;  %v9795_v17 = vld [vmem:[#allocation8 + $0x740] ss:$16 sps:$4 sm:$0xff]   ;;  %v9798_v18 = vld [vmem:[#allocation8 + $0x748] ss:$16 sps:$4 sm:$0xff]  }
 0x1a4   :  { %2744 = vmatprep.subr.bf16.mxu0 %v9725_v19  ;;  %3062 = vmatprep.subr.bf16.mxu1 %v9728_v20  ;;  %v9803_v19 = vld [vmem:[#allocation8 + $0x764] ss:$16 sps:$4 sm:$0xff]   ;;  %v9806_v20 = vld [vmem:[#allocation8 + $0x76c] ss:$16 sps:$4 sm:$0xff]  }
 0x1a7   :  { %2745 = vmatpush1.bf16.msra.mxu0 %v9723_v21  ;;  %3063 = vmatpush1.bf16.msra.mxu1 %v9726_v22  ;;  %v9801_v21 = vld [vmem:[#allocation8 + $0x760] ss:$16 sps:$4 sm:$0xff]   ;;  %v9804_v22 = vld [vmem:[#allocation8 + $0x768] ss:$16 sps:$4 sm:$0xff]  }
 0x1a8   :  { %2746 = vmatprep.subr.bf16.mxu0 %v9731_v23  ;;  %3064 = vmatprep.subr.bf16.mxu1 %v9734_v24  ;;  %v9809_v23 = vld [vmem:[#allocation8 + $0x784] ss:$16 sps:$4 sm:$0xff]   ;;  %v9812_v24 = vld [vmem:[#allocation8 + $0x78c] ss:$16 sps:$4 sm:$0xff]  }
 0x1ab   :  { %2747 = vmatpush1.bf16.msra.mxu0 %v9729_v25  ;;  %3065 = vmatpush1.bf16.msra.mxu1 %v9732_v26  ;;  %v9807_v25 = vld [vmem:[#allocation8 + $0x780] ss:$16 sps:$4 sm:$0xff]   ;;  %v9810_v26 = vld [vmem:[#allocation8 + $0x788] ss:$16 sps:$4 sm:$0xff]  }
 0x1ac   :  { %2769 = vmatprep.subr.bf16.mxu0 %v9737_v27  ;;  %3087 = vmatprep.subr.bf16.mxu1 %v9740_v30  ;;  %v9815_v27 = vld [vmem:[#allocation8 + $0x7a4] ss:$16 sps:$4 sm:$0xff]   ;;  %v9816_v30 = vld [vmem:[#allocation8 + $0x7a8] ss:$16 sps:$4 sm:$0xff]  }
 0x1ae   :  { %2749 = vmatmul.mubr.bf16.vlgmr.msra.gmra.mrb[0].mxu0 %v264_v33  ;;  %3067 = vmatmul.mubr.bf16.vlgmr.msra.gmra.mrb[0].mxu1 %v264_v33  ;;  %v9819_v33 = vld [vmem:[#allocation8 + $0x7c0] ss:$16 sps:$4 sm:$0xff]  }
 0x1af   :  { %2770 = vmatpush1.bf16.msra.mxu0 %v9735_v31  ;;  %3088 = vmatpush1.bf16.msra.mxu1 %v9738_v32  ;;  %v9821_v31 = vld [vmem:[#allocation8 + $0x7c4] ss:$16 sps:$4 sm:$0xff]   ;;  %v9824_v32 = vld [vmem:[#allocation8 + $0x7cc] ss:$16 sps:$4 sm:$0xff]  }
 0x1b0   :  { %2771 = vmatprep.subr.bf16.mxu0 %v9743_v36  ;;  %3089 = vmatprep.subr.bf16.mxu1 %v9746_v37  ;;  %v9830_v36 = vld [vmem:[#allocation8 + $0x7ec] ss:$16 sps:$4 sm:$0xff]   ;;  %v9825_v37 = vld [vmem:[#allocation8 + $0x7e0] ss:$16 sps:$4 sm:$0xff]  }
 0x1b1   :  { %2758 = vmatprep.mubr.bf16.mxu0 %v277_v40  ;;  %3076 = vmatprep.mubr.bf16.mxu1 %v277_v40  ;;  %v218_v40 = vld [vmem:[#allocation2 + $0x30] sm:$0xff] }
 0x1b3   :  { %2772 = vmatpush1.bf16.msra.mxu0 %v9741_v38  ;;  %3090 = vmatpush1.bf16.msra.mxu1 %v9744_v39  ;;  %v9828_v38 = vld [vmem:[#allocation8 + $0x7e8] ss:$16 sps:$4 sm:$0xff]   ;;  %v9833_v39 = vld [vmem:[#allocation8 + $0x804] ss:$16 sps:$4 sm:$0xff]  }
 0x1b4   :  { %2773 = vmatprep.subr.bf16.mxu0 %v9749_v41  ;;  %3091 = vmatprep.subr.bf16.mxu1 %v9752_v44  ;;  %v230_v41 = vld [vmem:[#allocation2 + $0x90] sm:$0xff]  ;;  %v9834_v44 = vld [vmem:[#allocation8 + $0x808] ss:$16 sps:$4 sm:$0xff]  }
 0x1b6   :  { %2759 = vmatmul.mubr.bf16.gmra.mrb[4].mxu0 %v276_v47  ;;  %3077 = vmatmul.mubr.bf16.gmra.mrb[4].mxu1 %v276_v47  ;;  %v255_v47 = vld [vmem:[#allocation2 + $0x158] sm:$0xff] }
 0x1b7   :  { %2774 = vmatpush1.bf16.msra.mxu0 %v9747_v45  ;;  %3092 = vmatpush1.bf16.msra.mxu1 %v9750_v46  ;;  %v266_v45 = vpack.c.bf16 %v230_v41, %v218_v40  ;;  %v243_v46 = vld [vmem:[#allocation2 + $0xf8] sm:$0xff]  ;;  %v9909_v41 = vld [vmem:[#allocation8 + $0x9a0] ss:$16 sps:$4 sm:$0xff]  }
 0x1b8   :  { %2775 = vmatprep.subr.bf16.mxu0 %v9755_v50  ;;  %3093 = vmatprep.subr.bf16.mxu1 %v9758_v51  ;;  %v9837_v50 = vld [vmem:[#allocation8 + $0x820] ss:$16 sps:$4 sm:$0xff]   ;;  %v9840_v51 = vld [vmem:[#allocation8 + $0x828] ss:$16 sps:$4 sm:$0xff]   ;;  %v9914_v40 = vld [vmem:[#allocation8 + $0x9ac] ss:$16 sps:$4 sm:$0xff]  }
 0x1b9   :  { %2801 = vmatprep.mubr.bf16.mxu0 %v267_v52  ;;  %3119 = vmatprep.mubr.bf16.mxu1 %v267_v52  ;;  %v279_v52 = vpack.c.bf16 %v255_v47, %v243_v46  ;;  %v9918_v46 = vld [vmem:[#allocation8 + $0x9c8] ss:$16 sps:$4 sm:$0xff]   ;;  %v9923_v47 = vld [vmem:[#allocation8 + $0x9e4] ss:$16 sps:$4 sm:$0xff]  }
 0x1bb   :  { %2776 = vmatpush1.bf16.msra.mxu0 %v9753_v53  ;;  %3094 = vmatpush1.bf16.msra.mxu1 %v9756_v54  ;;  %v9845_v53 = vld [vmem:[#allocation8 + $0x844] ss:$16 sps:$4 sm:$0xff]  }
 0x1bc   :  { %2777 = vmatprep.subr.bf16.mxu0 %v9761_v55  ;;  %3095 = vmatprep.subr.bf16.mxu1 %v9764_v56  ;;  %v242_v54 = vld [vmem:[#allocation2 + $0xf0] sm:$0xff]  ;;  %v9848_v56 = vld [vmem:[#allocation8 + $0x84c] ss:$16 sps:$4 sm:$0xff]  }
 0x1bd   :  { %v254_v55 = vld [vmem:[#allocation2 + $0x150] sm:$0xff] }
 0x1bf   :  { %2778 = vmatpush1.bf16.msra.mxu0 %v9759_v57  ;;  %3096 = vmatpush1.bf16.msra.mxu1 %v9762_v58  ;;  %v9843_v57 = vld [vmem:[#allocation8 + $0x840] ss:$16 sps:$4 sm:$0xff]   ;;  %v9846_v58 = vld [vmem:[#allocation8 + $0x848] ss:$16 sps:$4 sm:$0xff]  }
 0x1c0   :  { %2779 = vmatprep.subr.bf16.mxu0 %v9767_v59  ;;  %3097 = vmatprep.subr.bf16.mxu1 %v9770_v60  ;;  %v278_v59 = vpack.c.bf16 %v254_v55, %v242_v54  ;;  %v221_v60 = vld [vmem:[#allocation2 + $0x48] sm:$0xff] }
 0x1c1   :  { %v9932_v54 = vld [vmem:[#allocation8 + $0xa0c] ss:$16 sps:$4 sm:$0xff]  }
 0x1c2   :  { %v245_v55 = vld [vmem:[#allocation2 + $0x108] sm:$0xff] }
 0x1c3   :  { %2780 = vmatpush1.bf16.msra.mxu0 %v9765_v61  ;;  %3098 = vmatpush1.bf16.msra.mxu1 %v9768_v62  ;;  %v233_v61 = vld [vmem:[#allocation2 + $0xa8] sm:$0xff]  ;;  %v9851_v62 = vld [vmem:[#allocation8 + $0x864] ss:$16 sps:$4 sm:$0xff]  }
 0x1c4   :  { %2781 = vmatprep.subr.bf16.mxu0 %v9773_v63  ;;  %3099 = vmatprep.subr.bf16.mxu1 %v9776_v0  ;;  %v9854_v63 = vld [vmem:[#allocation8 + $0x86c] ss:$16 sps:$4 sm:$0xff]   ;;  %v269_v0 = vpack.c.bf16 %v233_v61, %v221_v60  ;;  %v9935_v60 = vld [vmem:[#allocation8 + $0xa24] ss:$16 sps:$4 sm:$0xff]  }
 0x1c5   :  { %v9938_v61 = vld [vmem:[#allocation8 + $0xa2c] ss:$16 sps:$4 sm:$0xff]  }
 0x1c7   :  { %2782 = vmatpush1.bf16.msra.mxu0 %v9771_v1  ;;  %3100 = vmatpush1.bf16.msra.mxu1 %v9774_v2  ;;  %v9849_v1 = vld [vmem:[#allocation8 + $0x860] ss:$16 sps:$4 sm:$0xff]   ;;  %v9852_v2 = vld [vmem:[#allocation8 + $0x868] ss:$16 sps:$4 sm:$0xff]  }
 0x1c8   :  { %2783 = vmatprep.subr.bf16.mxu0 %v9779_v3  ;;  %3101 = vmatprep.subr.bf16.mxu1 %v9782_v4  ;;  %v9857_v3 = vld [vmem:[#allocation8 + $0x884] ss:$16 sps:$4 sm:$0xff]   ;;  %v9860_v4 = vld [vmem:[#allocation8 + $0x88c] ss:$16 sps:$4 sm:$0xff]  }
 0x1cb   :  { %2784 = vmatpush1.bf16.msra.mxu0 %v9777_v5  ;;  %3102 = vmatpush1.bf16.msra.mxu1 %v9780_v6  ;;  %v9855_v5 = vld [vmem:[#allocation8 + $0x880] ss:$16 sps:$4 sm:$0xff]   ;;  %v9858_v6 = vld [vmem:[#allocation8 + $0x888] ss:$16 sps:$4 sm:$0xff]  }
 0x1cc   :  { %2785 = vmatprep.subr.bf16.mxu0 %v9785_v7  ;;  %3103 = vmatprep.subr.bf16.mxu1 %v9788_v8  ;;  %v9863_v7 = vld [vmem:[#allocation8 + $0x8a4] ss:$16 sps:$4 sm:$0xff]   ;;  %v9866_v8 = vld [vmem:[#allocation8 + $0x8ac] ss:$16 sps:$4 sm:$0xff]  }
 0x1cf   :  { %2786 = vmatpush1.bf16.msra.mxu0 %v9783_v9  ;;  %3104 = vmatpush1.bf16.msra.mxu1 %v9786_v10  ;;  %v9861_v9 = vld [vmem:[#allocation8 + $0x8a0] ss:$16 sps:$4 sm:$0xff]   ;;  %v9864_v10 = vld [vmem:[#allocation8 + $0x8a8] ss:$16 sps:$4 sm:$0xff]  }
 0x1d0   :  { %2787 = vmatprep.subr.bf16.mxu0 %v9791_v11  ;;  %3105 = vmatprep.subr.bf16.mxu1 %v9794_v12  ;;  %v9869_v11 = vld [vmem:[#allocation8 + $0x8c4] ss:$16 sps:$4 sm:$0xff]   ;;  %v9872_v12 = vld [vmem:[#allocation8 + $0x8cc] ss:$16 sps:$4 sm:$0xff]  }
 0x1d3   :  { %2788 = vmatpush1.bf16.msra.mxu0 %v9789_v13  ;;  %3106 = vmatpush1.bf16.msra.mxu1 %v9792_v14  ;;  %v9867_v13 = vld [vmem:[#allocation8 + $0x8c0] ss:$16 sps:$4 sm:$0xff]   ;;  %v9870_v14 = vld [vmem:[#allocation8 + $0x8c8] ss:$16 sps:$4 sm:$0xff]  }
 0x1d4   :  { %2789 = vmatprep.subr.bf16.mxu0 %v9797_v15  ;;  %3107 = vmatprep.subr.bf16.mxu1 %v9800_v16  ;;  %v9875_v15 = vld [vmem:[#allocation8 + $0x8e4] ss:$16 sps:$4 sm:$0xff]   ;;  %v9878_v16 = vld [vmem:[#allocation8 + $0x8ec] ss:$16 sps:$4 sm:$0xff]  }
 0x1d7   :  { %2790 = vmatpush1.bf16.msra.mxu0 %v9795_v17  ;;  %3108 = vmatpush1.bf16.msra.mxu1 %v9798_v18  ;;  %v9873_v17 = vld [vmem:[#allocation8 + $0x8e0] ss:$16 sps:$4 sm:$0xff]   ;;  %v9876_v18 = vld [vmem:[#allocation8 + $0x8e8] ss:$16 sps:$4 sm:$0xff]  }
 0x1d8   :  { %2791 = vmatprep.subr.bf16.mxu0 %v9803_v19  ;;  %3109 = vmatprep.subr.bf16.mxu1 %v9806_v20  ;;  %v9881_v19 = vld [vmem:[#allocation8 + $0x904] ss:$16 sps:$4 sm:$0xff]   ;;  %v9884_v20 = vld [vmem:[#allocation8 + $0x90c] ss:$16 sps:$4 sm:$0xff]  }
 0x1db   :  { %2792 = vmatpush1.bf16.msra.mxu0 %v9801_v21  ;;  %3110 = vmatpush1.bf16.msra.mxu1 %v9804_v22  ;;  %v9879_v21 = vld [vmem:[#allocation8 + $0x900] ss:$16 sps:$4 sm:$0xff]   ;;  %v9882_v22 = vld [vmem:[#allocation8 + $0x908] ss:$16 sps:$4 sm:$0xff]  }
 0x1dc   :  { %2793 = vmatprep.subr.bf16.mxu0 %v9809_v23  ;;  %3111 = vmatprep.subr.bf16.mxu1 %v9812_v24  ;;  %v9887_v23 = vld [vmem:[#allocation8 + $0x924] ss:$16 sps:$4 sm:$0xff]   ;;  %v9890_v24 = vld [vmem:[#allocation8 + $0x92c] ss:$16 sps:$4 sm:$0xff]  }
 0x1df   :  { %2794 = vmatpush1.bf16.msra.mxu0 %v9807_v25  ;;  %3112 = vmatpush1.bf16.msra.mxu1 %v9810_v26  ;;  %v9885_v25 = vld [vmem:[#allocation8 + $0x920] ss:$16 sps:$4 sm:$0xff]   ;;  %v9888_v26 = vld [vmem:[#allocation8 + $0x928] ss:$16 sps:$4 sm:$0xff]  }
 0x1e0   :  { %2795 = vmatprep.subr.bf16.mxu0 %v9815_v27  ;;  %3113 = vmatprep.subr.bf16.mxu1 %v9818_v28  ;;  %v9893_v27 = vld [vmem:[#allocation8 + $0x944] ss:$16 sps:$4 sm:$0xff]   ;;  %v9896_v28 = vld [vmem:[#allocation8 + $0x94c] ss:$16 sps:$4 sm:$0xff]  }
 0x1e3   :  { %2796 = vmatpush1.bf16.msra.mxu0 %v9813_v29  ;;  %3114 = vmatpush1.bf16.msra.mxu1 %v9816_v30  ;;  %v9891_v29 = vld [vmem:[#allocation8 + $0x940] ss:$16 sps:$4 sm:$0xff]   ;;  %v9894_v30 = vld [vmem:[#allocation8 + $0x948] ss:$16 sps:$4 sm:$0xff]  }
 0x1e4   :  { %2797 = vmatprep.subr.bf16.mxu0 %v9821_v31  ;;  %3115 = vmatprep.subr.bf16.mxu1 %v9824_v32  ;;  %v9899_v31 = vld [vmem:[#allocation8 + $0x964] ss:$16 sps:$4 sm:$0xff]   ;;  %v9902_v32 = vld [vmem:[#allocation8 + $0x96c] ss:$16 sps:$4 sm:$0xff]  }
 0x1e7   :  { %2798 = vmatpush1.bf16.msra.mxu0 %v9819_v33  ;;  %3116 = vmatpush1.bf16.msra.mxu1 %v9822_v34  ;;  %v9897_v33 = vld [vmem:[#allocation8 + $0x960] ss:$16 sps:$4 sm:$0xff]   ;;  %v9900_v34 = vld [vmem:[#allocation8 + $0x968] ss:$16 sps:$4 sm:$0xff]  }
 0x1e8   :  { %2799 = vmatprep.subr.bf16.mxu0 %v9827_v35  ;;  %3117 = vmatprep.subr.bf16.mxu1 %v9830_v36  ;;  %v9905_v35 = vld [vmem:[#allocation8 + $0x984] ss:$16 sps:$4 sm:$0xff]   ;;  %v9908_v36 = vld [vmem:[#allocation8 + $0x98c] ss:$16 sps:$4 sm:$0xff]  }
 0x1eb   :  { %2800 = vmatpush1.bf16.msra.mxu0 %v9825_v37  ;;  %3118 = vmatpush1.bf16.msra.mxu1 %v9828_v38  ;;  %v9903_v37 = vld [vmem:[#allocation8 + $0x980] ss:$16 sps:$4 sm:$0xff]   ;;  %v9906_v38 = vld [vmem:[#allocation8 + $0x988] ss:$16 sps:$4 sm:$0xff]  }
 0x1ec   :  { %2822 = vmatprep.subr.bf16.mxu0 %v9833_v39  ;;  %3140 = vmatprep.subr.bf16.mxu1 %v9836_v42  ;;  %v9911_v39 = vld [vmem:[#allocation8 + $0x9a4] ss:$16 sps:$4 sm:$0xff]   ;;  %v9912_v42 = vld [vmem:[#allocation8 + $0x9a8] ss:$16 sps:$4 sm:$0xff]  }
 0x1ee   :  { %2802 = vmatmul.mubr.bf16.vlgmr.msra.gmra.mrb[0].mxu0 %v266_v45  ;;  %3120 = vmatmul.mubr.bf16.vlgmr.msra.gmra.mrb[0].mxu1 %v266_v45  ;;  %v9915_v45 = vld [vmem:[#allocation8 + $0x9c0] ss:$16 sps:$4 sm:$0xff]  }
 0x1ef   :  { %2823 = vmatpush1.bf16.msra.mxu0 %v9831_v43  ;;  %3141 = vmatpush1.bf16.msra.mxu1 %v9834_v44  ;;  %v9917_v43 = vld [vmem:[#allocation8 + $0x9c4] ss:$16 sps:$4 sm:$0xff]   ;;  %v9920_v44 = vld [vmem:[#allocation8 + $0x9cc] ss:$16 sps:$4 sm:$0xff]  }
 0x1f0   :  { %2824 = vmatprep.subr.bf16.mxu0 %v9839_v48  ;;  %3142 = vmatprep.subr.bf16.mxu1 %v9842_v49  ;;  %v9926_v48 = vld [vmem:[#allocation8 + $0x9ec] ss:$16 sps:$4 sm:$0xff]   ;;  %v9921_v49 = vld [vmem:[#allocation8 + $0x9e0] ss:$16 sps:$4 sm:$0xff]  }
 0x1f1   :  { %2811 = vmatprep.mubr.bf16.mxu0 %v279_v52  ;;  %3129 = vmatprep.mubr.bf16.mxu1 %v279_v52  ;;  %v232_v52 = vld [vmem:[#allocation2 + $0xa0] sm:$0xff] }
 0x1f3   :  { %2825 = vmatpush1.bf16.msra.mxu0 %v9837_v50  ;;  %3143 = vmatpush1.bf16.msra.mxu1 %v9840_v51  ;;  %v9924_v50 = vld [vmem:[#allocation8 + $0x9e8] ss:$16 sps:$4 sm:$0xff]   ;;  %v220_v51 = vld [vmem:[#allocation2 + $0x40] sm:$0xff] }
 0x1f4   :  { %2826 = vmatprep.subr.bf16.mxu0 %v9845_v53  ;;  %3144 = vmatprep.subr.bf16.mxu1 %v9848_v56  ;;  %v9929_v53 = vld [vmem:[#allocation8 + $0xa04] ss:$16 sps:$4 sm:$0xff]   ;;  %v257_v56 = vld [vmem:[#allocation2 + $0x168] sm:$0xff] }
 0x1f6   :  { %2812 = vmatmul.mubr.bf16.gmra.mrb[4].mxu0 %v278_v59  ;;  %3130 = vmatmul.mubr.bf16.gmra.mrb[4].mxu1 %v278_v59  ;;  %v268_v59 = vpack.c.bf16 %v232_v52, %v220_v51  ;;  %v10007_v51 = vld [vmem:[#allocation8 + $0xba4] ss:$16 sps:$4 sm:$0xff]   ;;  %v10010_v52 = vld [vmem:[#allocation8 + $0xbac] ss:$16 sps:$4 sm:$0xff]  }
 0x1f7   :  { %2827 = vmatpush1.bf16.msra.mxu0 %v9843_v57  ;;  %3145 = vmatpush1.bf16.msra.mxu1 %v9846_v58  ;;  %v9927_v57 = vld [vmem:[#allocation8 + $0xa00] ss:$16 sps:$4 sm:$0xff]   ;;  %v9930_v58 = vld [vmem:[#allocation8 + $0xa08] ss:$16 sps:$4 sm:$0xff]  }
 0x1f8   :  { %2828 = vmatprep.subr.bf16.mxu0 %v9851_v62  ;;  %3146 = vmatprep.subr.bf16.mxu1 %v9854_v63  ;;  %v9933_v62 = vld [vmem:[#allocation8 + $0xa20] ss:$16 sps:$4 sm:$0xff]   ;;  %v9936_v63 = vld [vmem:[#allocation8 + $0xa28] ss:$16 sps:$4 sm:$0xff]  }
 0x1f9   :  { %2854 = vmatprep.mubr.bf16.mxu0 %v269_v0  ;;  %3172 = vmatprep.mubr.bf16.mxu1 %v269_v0  ;;  %v281_v0 = vpack.c.bf16 %v257_v56, %v245_v55  ;;  %v10013_v55 = vld [vmem:[#allocation8 + $0xbc4] ss:$16 sps:$4 sm:$0xff]   ;;  %v10016_v56 = vld [vmem:[#allocation8 + $0xbcc] ss:$16 sps:$4 sm:$0xff]  }
 0x1fb   :  { %2829 = vmatpush1.bf16.msra.mxu0 %v9849_v1  ;;  %3147 = vmatpush1.bf16.msra.mxu1 %v9852_v2  ;;  %v244_v1 = vld [vmem:[#allocation2 + $0x100] sm:$0xff] }
 0x1fc   :  { %2830 = vmatprep.subr.bf16.mxu0 %v9857_v3  ;;  %3148 = vmatprep.subr.bf16.mxu1 %v9860_v4  ;;  %v256_v2 = vld [vmem:[#allocation2 + $0x160] sm:$0xff]  ;;  %v9944_v4 = vld [vmem:[#allocation8 + $0xa4c] ss:$16 sps:$4 sm:$0xff]  }
 0x1fd   :  { %v9941_v3 = vld [vmem:[#allocation8 + $0xa44] ss:$16 sps:$4 sm:$0xff]  }
 0x1ff   :  { %2831 = vmatpush1.bf16.msra.mxu0 %v9855_v5  ;;  %3149 = vmatpush1.bf16.msra.mxu1 %v9858_v6  ;;  %v223_v5 = vld [vmem:[#allocation2 + $0x58] sm:$0xff] }
 0x200   :  { %2832 = vmatprep.subr.bf16.mxu0 %v9863_v7  ;;  %3150 = vmatprep.subr.bf16.mxu1 %v9866_v8  ;;  %v235_v6 = vld [vmem:[#allocation2 + $0xb8] sm:$0xff]  ;;  %v9939_v7 = vld [vmem:[#allocation8 + $0xa40] ss:$16 sps:$4 sm:$0xff]  }
 0x201   :  { %v9942_v8 = vld [vmem:[#allocation8 + $0xa48] ss:$16 sps:$4 sm:$0xff]  }
 0x203   :  { %2833 = vmatpush1.bf16.msra.mxu0 %v9861_v9  ;;  %3151 = vmatpush1.bf16.msra.mxu1 %v9864_v10  ;;  %v9947_v9 = vld [vmem:[#allocation8 + $0xa64] ss:$16 sps:$4 sm:$0xff]   ;;  %v9950_v10 = vld [vmem:[#allocation8 + $0xa6c] ss:$16 sps:$4 sm:$0xff]  }
 0x204   :  { %2834 = vmatprep.subr.bf16.mxu0 %v9869_v11  ;;  %3152 = vmatprep.subr.bf16.mxu1 %v9872_v12  ;;  %v280_v11 = vpack.c.bf16 %v256_v2, %v244_v1  ;;  %v9945_v12 = vld [vmem:[#allocation8 + $0xa60] ss:$16 sps:$4 sm:$0xff]   ;;  %v247_v1 = vld [vmem:[#allocation2 + $0x118] sm:$0xff] }
 0x205   :  { %v259_v2 = vld [vmem:[#allocation2 + $0x178] sm:$0xff] }
 0x207   :  { %2835 = vmatpush1.bf16.msra.mxu0 %v9867_v13  ;;  %3153 = vmatpush1.bf16.msra.mxu1 %v9870_v14  ;;  %v9948_v13 = vld [vmem:[#allocation8 + $0xa68] ss:$16 sps:$4 sm:$0xff]   ;;  %v271_v14 = vpack.c.bf16 %v235_v6, %v223_v5  ;;  %v246_v5 = vld [vmem:[#allocation2 + $0x110] sm:$0xff] }
 0x208   :  { %2836 = vmatprep.subr.bf16.mxu0 %v9875_v15  ;;  %3154 = vmatprep.subr.bf16.mxu1 %v9878_v16  ;;  %v9953_v15 = vld [vmem:[#allocation8 + $0xa84] ss:$16 sps:$4 sm:$0xff]   ;;  %v9956_v16 = vld [vmem:[#allocation8 + $0xa8c] ss:$16 sps:$4 sm:$0xff]  }
 0x209   :  { %v258_v6 = vld [vmem:[#allocation2 + $0x170] sm:$0xff] }
 0x20b   :  { %2837 = vmatpush1.bf16.msra.mxu0 %v9873_v17  ;;  %3155 = vmatpush1.bf16.msra.mxu1 %v9876_v18  ;;  %v9951_v17 = vld [vmem:[#allocation8 + $0xa80] ss:$16 sps:$4 sm:$0xff]   ;;  %v9954_v18 = vld [vmem:[#allocation8 + $0xa88] ss:$16 sps:$4 sm:$0xff]  }
 0x20c   :  { %2838 = vmatprep.subr.bf16.mxu0 %v9881_v19  ;;  %3156 = vmatprep.subr.bf16.mxu1 %v9884_v20  ;;  %v9959_v19 = vld [vmem:[#allocation8 + $0xaa4] ss:$16 sps:$4 sm:$0xff]   ;;  %v9962_v20 = vld [vmem:[#allocation8 + $0xaac] ss:$16 sps:$4 sm:$0xff]  }
 0x20f   :  { %2839 = vmatpush1.bf16.msra.mxu0 %v9879_v21  ;;  %3157 = vmatpush1.bf16.msra.mxu1 %v9882_v22  ;;  %v9957_v21 = vld [vmem:[#allocation8 + $0xaa0] ss:$16 sps:$4 sm:$0xff]   ;;  %v9960_v22 = vld [vmem:[#allocation8 + $0xaa8] ss:$16 sps:$4 sm:$0xff]  }
 0x210   :  { %2840 = vmatprep.subr.bf16.mxu0 %v9887_v23  ;;  %3158 = vmatprep.subr.bf16.mxu1 %v9890_v24  ;;  %v9965_v23 = vld [vmem:[#allocation8 + $0xac4] ss:$16 sps:$4 sm:$0xff]   ;;  %v9968_v24 = vld [vmem:[#allocation8 + $0xacc] ss:$16 sps:$4 sm:$0xff]  }
 0x213   :  { %2841 = vmatpush1.bf16.msra.mxu0 %v9885_v25  ;;  %3159 = vmatpush1.bf16.msra.mxu1 %v9888_v26  ;;  %v9963_v25 = vld [vmem:[#allocation8 + $0xac0] ss:$16 sps:$4 sm:$0xff]   ;;  %v9966_v26 = vld [vmem:[#allocation8 + $0xac8] ss:$16 sps:$4 sm:$0xff]  }
 0x214   :  { %2842 = vmatprep.subr.bf16.mxu0 %v9893_v27  ;;  %3160 = vmatprep.subr.bf16.mxu1 %v9896_v28  ;;  %v9971_v27 = vld [vmem:[#allocation8 + $0xae4] ss:$16 sps:$4 sm:$0xff]   ;;  %v9974_v28 = vld [vmem:[#allocation8 + $0xaec] ss:$16 sps:$4 sm:$0xff]  }
 0x217   :  { %2843 = vmatpush1.bf16.msra.mxu0 %v9891_v29  ;;  %3161 = vmatpush1.bf16.msra.mxu1 %v9894_v30  ;;  %v9969_v29 = vld [vmem:[#allocation8 + $0xae0] ss:$16 sps:$4 sm:$0xff]   ;;  %v9972_v30 = vld [vmem:[#allocation8 + $0xae8] ss:$16 sps:$4 sm:$0xff]  }
 0x218   :  { %2844 = vmatprep.subr.bf16.mxu0 %v9899_v31  ;;  %3162 = vmatprep.subr.bf16.mxu1 %v9902_v32  ;;  %v9977_v31 = vld [vmem:[#allocation8 + $0xb04] ss:$16 sps:$4 sm:$0xff]   ;;  %v9980_v32 = vld [vmem:[#allocation8 + $0xb0c] ss:$16 sps:$4 sm:$0xff]  }
 0x21b   :  { %2845 = vmatpush1.bf16.msra.mxu0 %v9897_v33  ;;  %3163 = vmatpush1.bf16.msra.mxu1 %v9900_v34  ;;  %v9975_v33 = vld [vmem:[#allocation8 + $0xb00] ss:$16 sps:$4 sm:$0xff]   ;;  %v9978_v34 = vld [vmem:[#allocation8 + $0xb08] ss:$16 sps:$4 sm:$0xff]  }
 0x21c   :  { %2846 = vmatprep.subr.bf16.mxu0 %v9905_v35  ;;  %3164 = vmatprep.subr.bf16.mxu1 %v9908_v36  ;;  %v9983_v35 = vld [vmem:[#allocation8 + $0xb24] ss:$16 sps:$4 sm:$0xff]   ;;  %v9986_v36 = vld [vmem:[#allocation8 + $0xb2c] ss:$16 sps:$4 sm:$0xff]  }
 0x21f   :  { %2847 = vmatpush1.bf16.msra.mxu0 %v9903_v37  ;;  %3165 = vmatpush1.bf16.msra.mxu1 %v9906_v38  ;;  %v9981_v37 = vld [vmem:[#allocation8 + $0xb20] ss:$16 sps:$4 sm:$0xff]   ;;  %v9984_v38 = vld [vmem:[#allocation8 + $0xb28] ss:$16 sps:$4 sm:$0xff]  }
 0x220   :  { %2848 = vmatprep.subr.bf16.mxu0 %v9911_v39  ;;  %3166 = vmatprep.subr.bf16.mxu1 %v9914_v40  ;;  %v9989_v39 = vld [vmem:[#allocation8 + $0xb44] ss:$16 sps:$4 sm:$0xff]   ;;  %v9992_v40 = vld [vmem:[#allocation8 + $0xb4c] ss:$16 sps:$4 sm:$0xff]  }
 0x223   :  { %2849 = vmatpush1.bf16.msra.mxu0 %v9909_v41  ;;  %3167 = vmatpush1.bf16.msra.mxu1 %v9912_v42  ;;  %v9987_v41 = vld [vmem:[#allocation8 + $0xb40] ss:$16 sps:$4 sm:$0xff]   ;;  %v9990_v42 = vld [vmem:[#allocation8 + $0xb48] ss:$16 sps:$4 sm:$0xff]  }
 0x224   :  { %2850 = vmatprep.subr.bf16.mxu0 %v9917_v43  ;;  %3168 = vmatprep.subr.bf16.mxu1 %v9920_v44  ;;  %v9995_v43 = vld [vmem:[#allocation8 + $0xb64] ss:$16 sps:$4 sm:$0xff]   ;;  %v9998_v44 = vld [vmem:[#allocation8 + $0xb6c] ss:$16 sps:$4 sm:$0xff]  }
 0x227   :  { %2851 = vmatpush1.bf16.msra.mxu0 %v9915_v45  ;;  %3169 = vmatpush1.bf16.msra.mxu1 %v9918_v46  ;;  %v9993_v45 = vld [vmem:[#allocation8 + $0xb60] ss:$16 sps:$4 sm:$0xff]   ;;  %v9996_v46 = vld [vmem:[#allocation8 + $0xb68] ss:$16 sps:$4 sm:$0xff]  }
 0x228   :  { %2852 = vmatprep.subr.bf16.mxu0 %v9923_v47  ;;  %3170 = vmatprep.subr.bf16.mxu1 %v9926_v48  ;;  %v10001_v47 = vld [vmem:[#allocation8 + $0xb84] ss:$16 sps:$4 sm:$0xff]   ;;  %v10004_v48 = vld [vmem:[#allocation8 + $0xb8c] ss:$16 sps:$4 sm:$0xff]  }
 0x22b   :  { %2853 = vmatpush1.bf16.msra.mxu0 %v9921_v49  ;;  %3171 = vmatpush1.bf16.msra.mxu1 %v9924_v50  ;;  %v9999_v49 = vld [vmem:[#allocation8 + $0xb80] ss:$16 sps:$4 sm:$0xff]   ;;  %v10002_v50 = vld [vmem:[#allocation8 + $0xb88] ss:$16 sps:$4 sm:$0xff]  }
 0x22c   :  { %2875 = vmatprep.subr.bf16.mxu0 %v9929_v53  ;;  %3193 = vmatprep.subr.bf16.mxu1 %v9932_v54  ;;  %v10005_v53 = vld [vmem:[#allocation8 + $0xba0] ss:$16 sps:$4 sm:$0xff]   ;;  %v10008_v54 = vld [vmem:[#allocation8 + $0xba8] ss:$16 sps:$4 sm:$0xff]  }
 0x22e   :  { %2855 = vmatmul.mubr.bf16.vlgmr.msra.gmra.mrb[0].mxu0 %v268_v59  ;;  %3173 = vmatmul.mubr.bf16.vlgmr.msra.gmra.mrb[0].mxu1 %v268_v59  ;;  %v10019_v59 = vld [vmem:[#allocation8 + $0xbe4] ss:$16 sps:$4 sm:$0xff]  }
 0x22f   :  { %2876 = vmatpush1.bf16.msra.mxu0 %v9927_v57  ;;  %3194 = vmatpush1.bf16.msra.mxu1 %v9930_v58  ;;  %v10011_v57 = vld [vmem:[#allocation8 + $0xbc0] ss:$16 sps:$4 sm:$0xff]   ;;  %v10014_v58 = vld [vmem:[#allocation8 + $0xbc8] ss:$16 sps:$4 sm:$0xff]  }
 0x230   :  { %2877 = vmatprep.subr.bf16.mxu0 %v9935_v60  ;;  %3195 = vmatprep.subr.bf16.mxu1 %v9938_v61  ;;  %v10022_v60 = vld [vmem:[#allocation8 + $0xbec] ss:$16 sps:$4 sm:$0xff]   ;;  %v10017_v61 = vld [vmem:[#allocation8 + $0xbe0] ss:$16 sps:$4 sm:$0xff]  }
 0x231   :  { %2864 = vmatprep.mubr.bf16.mxu0 %v281_v0  ;;  %3182 = vmatprep.mubr.bf16.mxu1 %v281_v0  ;;  %v234_v0 = vld [vmem:[#allocation2 + $0xb0] sm:$0xff] }
 0x233   :  { %2878 = vmatpush1.bf16.msra.mxu0 %v9933_v62  ;;  %3196 = vmatpush1.bf16.msra.mxu1 %v9936_v63  ;;  %v10020_v62 = vld [vmem:[#allocation8 + $0xbe8] ss:$16 sps:$4 sm:$0xff]   ;;  %v222_v63 = vld [vmem:[#allocation2 + $0x50] sm:$0xff] }
 0x234   :  { %2879 = vmatprep.subr.bf16.mxu0 %v9941_v3  ;;  %3197 = vmatprep.subr.bf16.mxu1 %v9944_v4  ;;  %v270_v3 = vpack.c.bf16 %v234_v0, %v222_v63  ;;  %v283_v4 = vpack.c.bf16 %v259_v2, %v247_v1 }
 0x236   :  { %2865 = vmatmul.mubr.bf16.gmra.mrb[4].mxu0 %v280_v11  ;;  %3183 = vmatmul.mubr.bf16.gmra.mrb[4].mxu1 %v280_v11  ;;  %v668_v11 = vld [vmem:[#allocation10] sm:$0xf] }
 0x237   :  { %2880 = vmatpush1.bf16.msra.mxu0 %v9939_v7  ;;  %3198 = vmatpush1.bf16.msra.mxu1 %v9942_v8  ;;  %v282_v7 = vpack.c.bf16 %v258_v6, %v246_v5  ;;  %v670_v8 = vlaneseq }
 0x238   :  { %2881 = vmatprep.subr.bf16.mxu0 %v9947_v9  ;;  %3199 = vmatprep.subr.bf16.mxu1 %v9950_v10 }
 0x239   :  { %2907 = vmatprep.mubr.bf16.mxu0 %v271_v14  ;;  %3225 = vmatprep.mubr.bf16.mxu1 %v271_v14  ;;  %v11068_v9 = vshrl.u32 %v670_v8, 7  ;;  %vm6586_vm7 = vcmp.lt.s32.totalorder %v670_v8, 384 }
 0x23b   :  { %2882 = vmatpush1.bf16.msra.mxu0 %v9945_v12  ;;  %3200 = vmatpush1.bf16.msra.mxu1 %v9948_v13  ;;  %v11071_v10 = vsub.s32 0, %v11068_v9  ;;  %v11074_v12 = vsub.s32 2, %v11068_v9  ;;  %v11077_v13 = vsub.s32 1, %v11068_v9 }
 0x23c   :  { %2883 = vmatprep.subr.bf16.mxu0 %v9953_v15  ;;  %3201 = vmatprep.subr.bf16.mxu1 %v9956_v16 }
 0x23d   :  { %v673_v14 = vrot.slane %v668_v11, %v11071_v10  ;;  %v681_v15 = vrot.slane %v668_v11, %v11074_v12 }
 0x23f   :  { %2884 = vmatpush1.bf16.msra.mxu0 %v9951_v17  ;;  %3202 = vmatpush1.bf16.msra.mxu1 %v9954_v18  ;;  %v677_v18 = vrot.slane %v668_v11, %v11077_v13 }
 0x240   :  { %2885 = vmatprep.subr.bf16.mxu0 %v9959_v19  ;;  %3203 = vmatprep.subr.bf16.mxu1 %v9962_v20 }
 0x243   :  { %2886 = vmatpush1.bf16.msra.mxu0 %v9957_v21  ;;  %3204 = vmatpush1.bf16.msra.mxu1 %v9960_v22 }
 0x244   :  { %2887 = vmatprep.subr.bf16.mxu0 %v9965_v23  ;;  %3205 = vmatprep.subr.bf16.mxu1 %v9968_v24 }
 0x247   :  { %2888 = vmatpush1.bf16.msra.mxu0 %v9963_v25  ;;  %3206 = vmatpush1.bf16.msra.mxu1 %v9966_v26 }
 0x248   :  { %2889 = vmatprep.subr.bf16.mxu0 %v9971_v27  ;;  %3207 = vmatprep.subr.bf16.mxu1 %v9974_v28 }
 0x24b   :  { %2890 = vmatpush1.bf16.msra.mxu0 %v9969_v29  ;;  %3208 = vmatpush1.bf16.msra.mxu1 %v9972_v30 }
 0x24c   :  { %2891 = vmatprep.subr.bf16.mxu0 %v9977_v31  ;;  %3209 = vmatprep.subr.bf16.mxu1 %v9980_v32 }
 0x24f   :  { %2892 = vmatpush1.bf16.msra.mxu0 %v9975_v33  ;;  %3210 = vmatpush1.bf16.msra.mxu1 %v9978_v34  ;;  %v11181_v34 = vld [vmem:[#allocation5 + $0x18] sm:$0xff] }
 0x250   :  { %2893 = vmatprep.subr.bf16.mxu0 %v9983_v35  ;;  %3211 = vmatprep.subr.bf16.mxu1 %v9986_v36  ;;  %vm3253_vm4 = vcmp.gt.f32.partialorder %v11181_v34, 0.5 }
 0x253   :  { %2894 = vmatpush1.bf16.msra.mxu0 %v9981_v37  ;;  %3212 = vmatpush1.bf16.msra.mxu1 %v9984_v38 }
 0x254   :  { %2895 = vmatprep.subr.bf16.mxu0 %v9989_v39  ;;  %3213 = vmatprep.subr.bf16.mxu1 %v9992_v40 }
 0x257   :  { %2896 = vmatpush1.bf16.msra.mxu0 %v9987_v41  ;;  %3214 = vmatpush1.bf16.msra.mxu1 %v9990_v42 }
 0x258   :  { %2897 = vmatprep.subr.bf16.mxu0 %v9995_v43  ;;  %3215 = vmatprep.subr.bf16.mxu1 %v9998_v44 }
 0x25b   :  { %2898 = vmatpush1.bf16.msra.mxu0 %v9993_v45  ;;  %3216 = vmatpush1.bf16.msra.mxu1 %v9996_v46 }
 0x25c   :  { %2899 = vmatprep.subr.bf16.mxu0 %v10001_v47  ;;  %3217 = vmatprep.subr.bf16.mxu1 %v10004_v48 }
 0x25f   :  { %2900 = vmatpush1.bf16.msra.mxu0 %v9999_v49  ;;  %3218 = vmatpush1.bf16.msra.mxu1 %v10002_v50 }
 0x260   :  { %2901 = vmatprep.subr.bf16.mxu0 %v10007_v51  ;;  %3219 = vmatprep.subr.bf16.mxu1 %v10010_v52 }
 0x263   :  { %2902 = vmatpush1.bf16.msra.mxu0 %v10005_v53  ;;  %3220 = vmatpush1.bf16.msra.mxu1 %v10008_v54 }
 0x264   :  { %2903 = vmatprep.subr.bf16.mxu0 %v10013_v55  ;;  %3221 = vmatprep.subr.bf16.mxu1 %v10016_v56 }
 0x267   :  { %2904 = vmatpush1.bf16.msra.mxu0 %v10011_v57  ;;  %3222 = vmatpush1.bf16.msra.mxu1 %v10014_v58 }
 0x268   :  { %2905 = vmatprep.subr.bf16.mxu0 %v10019_v59  ;;  %3223 = vmatprep.subr.bf16.mxu1 %v10022_v60 }
 0x26b   :  { %2906 = vmatpush1.bf16.msra.mxu0 %v10017_v61  ;;  %3224 = vmatpush1.bf16.msra.mxu1 %v10020_v62 }
 0x26e   :  { %2908 = vmatmul.mubr.bf16.vlgmr.msra.gmra.mrb[0].mxu0 %v270_v3  ;;  %3226 = vmatmul.mubr.bf16.vlgmr.msra.gmra.mrb[0].mxu1 %v270_v3 }
 0x26f   :  { %2917 = vmatprep.mubr.bf16.mxu0 %v283_v4  ;;  %3235 = vmatprep.mubr.bf16.mxu1 %v283_v4 }
 0x276   :  { %2918 = vmatmul.mubr.bf16.gmra.mrb[4].mxu0 %v282_v7  ;;  %3236 = vmatmul.mubr.bf16.gmra.mrb[4].mxu1 %v282_v7 }
 0x341   :  { %v2909_v16 = vpop.f32.mrb[0].mxu0  ;;  %v3227_v17 = vpop.f32.mrb[0].mxu1 }
 0x342   :  { %v9217_v19 = vadd.f32 %v2909_v16, %v673_v14  ;;  %v2911_v20 = vpop.f32.mrb[1].mxu0  ;;  %v11082_v21 = vpop.f32.mrb[1].mxu1  ;;  %v9225_v24 = vadd.f32 %v3227_v17, %v681_v15 }
 0x343   :  { %v2913_v22 = vpop.f32.mrb[2].mxu0  ;;  %v3231_v23 = vpop.f32.mrb[2].mxu1  ;;  %v9218_v28 = vadd.f32 %v2911_v20, %v677_v18 }
 0x344   :  { %v9227_v25 = vadd.f32 %v3231_v23, %v681_v15  ;;  %v2915_v26 = vpop.f32.mrb[3].mxu0  ;;  %v11084_v27 = vpop.f32.mrb[3].mxu1  ;;  %9013 = vmatprep.mubr.msk.f32.mxu0 %vm3254_vm0, %v9217_v19  ;;  %v9219_v51 = vadd.f32 %v2913_v22, %v673_v14 }
 0x345   :  { %v9220_v29 = vadd.f32 %v2915_v26, %v677_v18 }
 0x346   :  { %v11087_v30 = vpack.i.bf16 %v9227_v25, %v9225_v24  ;;  %v11089_v31 = vpack.c.bf16 %v9227_v25, %v9225_v24 }
 0x347   :  { %v9397_v32 = vpack.i.bf16 %v9220_v29, %v9218_v28  ;;  %v9137_v33 = vpack.c.bf16 %v9220_v29, %v9218_v28 }
 0x349   :  { %v2919_v35 = vpop.f32.mrb[4].mxu0  ;;  %9398 = vrot.lane.b32.xlu1 %v9397_v32, %s10809_s7  ;;  %9388 = vrot.lane.b32.xlu0 %v9397_v32, %s10814_s5  ;;  %v3237_v36 = vpop.f32.mrb[4].mxu1 }
 0x34a   :  { %9139 = vmatprep.subr.msk.bf16.mxu0 %vm11093_vm1, %v9137_v33  ;;  %v2921_v37 = vpop.f32.mrb[5].mxu0  ;;  %v9229_v38 = vadd.f32 %v3237_v36, %v681_v15  ;;  %v11101_v39 = vpop.f32.mrb[5].mxu1  ;;  %v9221_v53 = vadd.f32 %v2919_v35, %v673_v14 }
 0x34b   :  { %9142 = vmatpush3.bf16.xpose.msk.msra.mxu0 %vm11093_vm1, %v9137_v33  ;;  %v2923_v40 = vpop.f32.mrb[6].mxu0  ;;  %v3241_v41 = vpop.f32.mrb[6].mxu1  ;;  %v9222_v45 = vadd.f32 %v2921_v37, %v677_v18 }
 0x34c   :  { %v2925_v42 = vpop.f32.mrb[7].mxu0  ;;  %v9231_v43 = vadd.f32 %v3241_v41, %v681_v15  ;;  %v11105_v44 = vpop.f32.mrb[7].mxu1  ;;  %v9223_v52 = vadd.f32 %v2923_v40, %v673_v14 }
 0x34d   :  { %v9224_v46 = vadd.f32 %v2925_v42, %v677_v18  ;;  %3424 = vrot.lane.b32.xlu1 %v9217_v19, %s10814_s5 }
 0x34e   :  { %v11108_v47 = vpack.i.bf16 %v9231_v43, %v9229_v38  ;;  %v11110_v48 = vpack.c.bf16 %v9231_v43, %v9229_v38 }
 0x34f   :  { %v9392_v49 = vpack.i.bf16 %v9224_v46, %v9222_v45  ;;  %v9143_v50 = vpack.c.bf16 %v9224_v46, %v9222_v45  ;;  %v11175_v46 = vld [vmem:[#allocation5 + $0x8] sm:$0xff] }
 0x350   :  { %vm3251_vm2 = vcmp.gt.f32.partialorder %v11175_v46, 0.5 }
 0x351   :  { %9393 = vrot.lane.b32.xlu0 %v9392_v49, %s10814_s5  ;;  %9145 = vmatprep.subr.msk.bf16.mxu0 %vm11093_vm1, %v9143_v50 }
 0x352   :  { %9403 = vrot.lane.b32.xlu1 %v9392_v49, %s10809_s7 }
 0x353   :  { %9148 = vmatpush3.bf16.xpose.msk.msra.mxu0 %vm11093_vm1, %v9143_v50 }
 0x355   :  { %3426 = vrot.lane.b32.xlu0 %v9219_v51, %s10814_s5 }
 0x356   :  { %3430 = vrot.lane.b32.xlu1 %v9223_v52, %s10814_s5 }
 0x359   :  { %3428 = vrot.lane.b32.xlu0 %v9221_v53, %s10814_s5 }
 0x35a   :  { %3811 = vrot.lane.b32.xlu1 %v9217_v19, %s10809_s7  ;;  %9014 = vmatmul.mubr.msk.f32.vlgmr.msra.gmra.mrb[8].mxu0 %vm3254_vm0, %v9219_v51 }
 0x35b   :  { %9016 = vmatprep.mubr.msk.f32.mxu0 %vm3254_vm0, %v9221_v53 }
 0x35d   :  { %9408 = vrot.lane.b32.xlu0 %v9397_v32, %s10804_s28 }
 0x35e   :  { %9413 = vrot.lane.b32.xlu1 %v9392_v49, %s10804_s28  ;;  %9017 = vmatmul.mubr.msk.f32.gmra.mrb[10].mxu0 %vm3254_vm0, %v9223_v52  ;;  %v11177_v49 = vld [vmem:[#allocation5] sm:$0xff] }
 0x35f   :  { %vm3250_vm3 = vcmp.gt.f32.partialorder %v11177_v49, 0.5 }
 0x361   :  { %3813 = vrot.lane.b32.xlu0 %v9219_v51, %s10809_s7 }
 0x362   :  { %3817 = vrot.lane.b32.xlu1 %v9223_v52, %s10809_s7 }
 0x365   :  { %3815 = vrot.lane.b32.xlu0 %v9221_v53, %s10809_s7 }
 0x366   :  { %4103 = vrot.lane.b32.xlu1 %v9219_v51, %s10804_s28 }
 0x369   :  { %4101 = vrot.lane.b32.xlu0 %v9217_v19, %s10804_s28 }
 0x36a   :  { %4107 = vrot.lane.b32.xlu1 %v9223_v52, %s10804_s28 }
 0x36d   :  { %4105 = vrot.lane.b32.xlu0 %v9221_v53, %s10804_s28 }
 0x36e   :  { %9418 = vrot.lane.b32.xlu1 %v11087_v30, %s10814_s5 }
 0x371   :  { %9423 = vrot.lane.b32.xlu0 %v11108_v47, %s10814_s5 }
 0x3bb   :  { %v9399_v54 = vpop.permute.xlu1 %9398  ;;  %v9389_v55 = vpop.permute.xlu0 %9388 }
 0x3bc   :  { %v9391_v56 = vunpack.i.h.bf16 %v9389_v55  ;;  %v9390_v57 = vunpack.i.l.bf16 %v9389_v55  ;;  %v9401_v61 = vunpack.i.h.bf16 %v9399_v54  ;;  %v9400_v62 = vunpack.i.l.bf16 %v9399_v54  ;;  %v11183_v54 = vld [vmem:[#allocation5 + $0x10] sm:$0xff] }
 0x3bd   :  { %vm3252_vm5 = vcmp.gt.f32.partialorder %v11183_v54, 0.5 }
 0x3be   :  { %v9149_v58 = vpack.c.bf16 %v9391_v56, %v9390_v57  ;;  %v9177_v4 = vpack.c.bf16 %v9401_v61, %v9400_v62 }
 0x3bf   :  { %v3425_v59 = vpop.permute.xlu1 %3424 }
 0x3c0   :  { %9151 = vmatprep.subr.msk.bf16.mxu1 %vm11093_vm1, %v9149_v58  ;;  %9027 = vmatprep.mubr.msk.f32.mxu1 %vm3254_vm0, %v3425_v59 }
 0x3c1   :  { %9154 = vmatpush3.bf16.xpose.msk.msra.mxu1 %vm11093_vm1, %v9149_v58 }
 0x3c3   :  { %v9394_v60 = vpop.permute.xlu0 %9393 }
 0x3c4   :  { %v9396_v63 = vunpack.i.h.bf16 %v9394_v60  ;;  %v9395_v0 = vunpack.i.l.bf16 %v9394_v60  ;;  %v9404_v1 = vpop.permute.xlu1 %9403 }
 0x3c5   :  { %v9406_v7 = vunpack.i.h.bf16 %v9404_v1  ;;  %v9405_v11 = vunpack.i.l.bf16 %v9404_v1 }
 0x3c6   :  { %v9155_v2 = vpack.c.bf16 %v9396_v63, %v9395_v0 }
 0x3c7   :  { %v3427_v3 = vpop.permute.xlu0 %3426  ;;  %v9183_v16 = vpack.c.bf16 %v9406_v7, %v9405_v11 }
 0x3c8   :  { %v3431_v5 = vpop.permute.xlu1 %3430  ;;  %9157 = vmatprep.subr.msk.bf16.mxu1 %vm11093_vm1, %v9155_v2 }
 0x3c9   :  { %9160 = vmatpush3.bf16.xpose.msk.msra.mxu1 %vm11093_vm1, %v9155_v2 }
 0x3ca   :  { %9179 = vmatprep.subr.msk.bf16.mxu1 %vm11093_vm1, %v9177_v4 }
 0x3cb   :  { %v3429_v6 = vpop.permute.xlu0 %3428 }
 0x3cc   :  { %v3812_v14 = vpop.permute.xlu1 %3811 }
 0x3cf   :  { %v9409_v15 = vpop.permute.xlu0 %9408 }
 0x3d0   :  { %v9414_v17 = vpop.permute.xlu1 %9413  ;;  %9028 = vmatmul.mubr.msk.f32.vlgmr.msra.gmra.mrb[8].mxu1 %vm3254_vm0, %v3427_v3  ;;  %v9411_v19 = vunpack.i.h.bf16 %v9409_v15  ;;  %v9410_v20 = vunpack.i.l.bf16 %v9409_v15 }
 0x3d1   :  { %9030 = vmatprep.mubr.msk.f32.mxu1 %vm3254_vm0, %v3429_v6  ;;  %9182 = vmatpush3.bf16.xpose.msk.msra.mxu1 %vm11093_vm1, %v9177_v4  ;;  %v9416_v28 = vunpack.i.h.bf16 %v9414_v17  ;;  %v9415_v29 = vunpack.i.l.bf16 %v9414_v17 }
 0x3d2   :  { %9185 = vmatprep.subr.msk.bf16.mxu1 %vm11093_vm1, %v9183_v16  ;;  %v9197_v24 = vpack.c.bf16 %v9411_v19, %v9410_v20 }
 0x3d3   :  { %v3814_v18 = vpop.permute.xlu0 %3813  ;;  %v9203_v35 = vpack.c.bf16 %v9416_v28, %v9415_v29 }
 0x3d4   :  { %v3818_v22 = vpop.permute.xlu1 %3817  ;;  %9031 = vmatmul.mubr.msk.f32.gmra.mrb[10].mxu1 %vm3254_vm0, %v3431_v5 }
 0x3d5   :  { %9069 = vmatprep.mubr.msk.f32.mxu1 %vm3254_vm0, %v3812_v14 }
 0x3d7   :  { %v3816_v23 = vpop.permute.xlu0 %3815 }
 0x3d8   :  { %v4104_v25 = vpop.permute.xlu1 %4103 }
 0x3d9   :  { %9188 = vmatpush3.bf16.xpose.msk.msra.mxu1 %vm11093_vm1, %v9183_v16 }
 0x3da   :  { %9199 = vmatprep.subr.msk.bf16.mxu1 %vm11093_vm1, %v9197_v24 }
 0x3db   :  { %v4102_v26 = vpop.permute.xlu0 %4101 }
 0x3dc   :  { %v4108_v32 = vpop.permute.xlu1 %4107 }
 0x3df   :  { %v4106_v33 = vpop.permute.xlu0 %4105 }
 0x3e0   :  { %v9419_v36 = vpop.permute.xlu1 %9418  ;;  %9070 = vmatmul.mubr.msk.f32.vlgmr.msra.gmra.mrb[12].mxu1 %vm3254_vm0, %v3814_v18 }
 0x3e1   :  { %v9421_v37 = vunpack.i.h.bf16 %v9419_v36  ;;  %v9420_v38 = vunpack.i.l.bf16 %v9419_v36  ;;  %9072 = vmatprep.mubr.msk.f32.mxu1 %vm3254_vm0, %v3816_v23  ;;  %9202 = vmatpush3.bf16.xpose.msk.msra.mxu1 %vm11093_vm1, %v9197_v24 }
 0x3e2   :  { %9205 = vmatprep.subr.msk.bf16.mxu1 %vm11093_vm1, %v9203_v35 }
 0x3e3   :  { %v9161_v40 = vpack.c.bf16 %v9421_v37, %v9420_v38  ;;  %v9424_v41 = vpop.permute.xlu0 %9423 }
 0x3e4   :  { %v9426_v42 = vunpack.i.h.bf16 %v9424_v41  ;;  %v9425_v43 = vunpack.i.l.bf16 %v9424_v41  ;;  %9073 = vmatmul.mubr.msk.f32.gmra.mrb[14].mxu1 %vm3254_vm0, %v3818_v22 }
 0x3e5   :  { %9162 = vmatprep.subr.bf16.mxu0 %v9161_v40  ;;  %9097 = vmatprep.mubr.msk.f32.mxu1 %vm3254_vm0, %v4102_v26 }
 0x3e6   :  { %v9165_v45 = vpack.c.bf16 %v9426_v42, %v9425_v43  ;;  %9164 = vmatpush3.bf16.msra.mxu0 %v9161_v40 }
 0x3e8   :  { %9166 = vmatprep.subr.bf16.mxu0 %v9165_v45 }
 0x3e9   :  { %9208 = vmatpush3.bf16.xpose.msk.msra.mxu1 %vm11093_vm1, %v9203_v35 }
 0x3ea   :  { %9168 = vmatpush3.bf16.msra.mxu0 %v9165_v45 }
 0x3eb   :  { %9170 = vmatprep.subr.bf16.mxu0 %v11089_v31 }
 0x3f0   :  { %9098 = vmatmul.mubr.msk.f32.vlgmr.msra.gmra.mrb[16].mxu1 %vm3254_vm0, %v4104_v25 }
 0x3f1   :  { %9100 = vmatprep.mubr.msk.f32.mxu1 %vm3254_vm0, %v4106_v33 }
 0x3f4   :  { %9101 = vmatmul.mubr.msk.f32.gmra.mrb[18].mxu1 %vm3254_vm0, %v4108_v32 }
 0x42d   :  { %v9015_v50 = vpop.f32.mrb[8].mxu0 }
 0x42e   :  { %v3365_v51 = vmul.f32 0.17677669, %v9015_v50  ;;  %v3345_v52 = vpop.f32.mrb[9].mxu0 }
 0x42f   :  { %v3364_v53 = vmul.f32 0.17677669, %v3345_v52 }
 0x430   :  { %v11187_v55 = vsel %vm3251_vm2, %v3365_v51, -1e+30 }
 0x431   :  { %v9018_v56 = vpop.f32.mrb[10].mxu0  ;;  %v3375_v57 = vsel %vm3254_vm0, %v11187_v55, -inf  ;;  %v11193_v58 = vsel %vm3250_vm3, %v3364_v53, -1e+30 }
 0x432   :  { %v3367_v59 = vmul.f32 0.17677669, %v9018_v56  ;;  %3376 = vmax.xlane.f32.xlu0 %v3375_v57  ;;  %v3355_v60 = vpop.f32.mrb[11].mxu0  ;;  %v3372_v61 = vsel %vm3254_vm0, %v11193_v58, -inf }
 0x433   :  { %v3366_v62 = vmul.f32 0.17677669, %v3355_v60  ;;  %3373 = vmax.xlane.f32.xlu1 %v3372_v61 }
 0x434   :  { %v11201_v63 = vsel %vm3253_vm4, %v3367_v59, -1e+30 }
 0x435   :  { %v3381_v0 = vsel %vm3254_vm0, %v11201_v63, -inf  ;;  %v11207_v1 = vsel %vm3252_vm5, %v3366_v62, -1e+30 }
 0x436   :  { %3382 = vmax.xlane.f32.xlu0 %v3381_v0  ;;  %v3378_v2 = vsel %vm3254_vm0, %v11207_v1, -inf }
 0x437   :  { %3379 = vmax.xlane.f32.xlu1 %v3378_v2 }
 0x4a3   :  { %v9029_v3 = vpop.f32.mrb[8].mxu1 }
 0x4a4   :  { %v3542_v4 = vmul.f32 0.17677669, %v9029_v3  ;;  %v3522_v5 = vpop.f32.mrb[9].mxu1 }
 0x4a5   :  { %v3541_v6 = vmul.f32 0.17677669, %v3522_v5 }
 0x4a6   :  { %v11213_v7 = vsel %vm3251_vm2, %v3542_v4, -1e+30 }
 0x4a7   :  { %v9032_v11 = vpop.f32.mrb[10].mxu1  ;;  %v3552_v14 = vsel %vm3254_vm0, %v11213_v7, -inf  ;;  %v11219_v15 = vsel %vm3250_vm3, %v3541_v6, -1e+30 }
 0x4a8   :  { %v3544_v16 = vmul.f32 0.17677669, %v9032_v11  ;;  %v3532_v17 = vpop.f32.mrb[11].mxu1  ;;  %3553 = vmax.xlane.f32.xlu1 %v3552_v14  ;;  %v3549_v18 = vsel %vm3254_vm0, %v11219_v15, -inf }
 0x4a9   :  { %v3543_v19 = vmul.f32 0.17677669, %v3532_v17  ;;  %3550 = vmax.xlane.f32.xlu0 %v3549_v18 }
 0x4aa   :  { %v11225_v20 = vsel %vm3253_vm4, %v3544_v16, -1e+30 }
 0x4ab   :  { %v3558_v22 = vsel %vm3254_vm0, %v11225_v20, -inf  ;;  %v11231_v23 = vsel %vm3252_vm5, %v3543_v19, -1e+30 }
 0x4ac   :  { %v3555_v24 = vsel %vm3254_vm0, %v11231_v23, -inf }
 0x4ad   :  { %3559 = vmax.xlane.f32.xlu0 %v3558_v22 }
 0x4b1   :  { %3556 = vmax.xlane.f32.xlu0 %v3555_v24 }
 0x4b3   :  { %v9071_v25 = vpop.f32.mrb[12].mxu1 }
 0x4b4   :  { %v3929_v26 = vmul.f32 0.17677669, %v9071_v25  ;;  %v3909_v28 = vpop.f32.mrb[13].mxu1 }
 0x4b5   :  { %v3928_v29 = vmul.f32 0.17677669, %v3909_v28 }
 0x4b6   :  { %v11237_v32 = vsel %vm3251_vm2, %v3929_v26, -1e+30 }
 0x4b7   :  { %v9074_v33 = vpop.f32.mrb[14].mxu1  ;;  %v3939_v35 = vsel %vm3254_vm0, %v11237_v32, -inf  ;;  %v11243_v36 = vsel %vm3250_vm3, %v3928_v29, -1e+30 }
 0x4b8   :  { %v3931_v37 = vmul.f32 0.17677669, %v9074_v33  ;;  %v3919_v38 = vpop.f32.mrb[15].mxu1  ;;  %3940 = vmax.xlane.f32.xlu0 %v3939_v35  ;;  %v3936_v40 = vsel %vm3254_vm0, %v11243_v36, -inf }
 0x4b9   :  { %v3930_v41 = vmul.f32 0.17677669, %v3919_v38  ;;  %3937 = vmax.xlane.f32.xlu1 %v3936_v40 }
 0x4ba   :  { %v11249_v42 = vsel %vm3253_vm4, %v3931_v37, -1e+30 }
 0x4bb   :  { %v3945_v43 = vsel %vm3254_vm0, %v11249_v42, -inf  ;;  %v11255_v45 = vsel %vm3252_vm5, %v3930_v41, -1e+30 }
 0x4bc   :  { %3946 = vmax.xlane.f32.xlu0 %v3945_v43  ;;  %v3942_v50 = vsel %vm3254_vm0, %v11255_v45, -inf }
 0x4bd   :  { %3943 = vmax.xlane.f32.xlu1 %v3942_v50 }
 0x4bf   :  { %v3377_v14 = vpop.xlane.xlu0 %3376 }
 0x4c0   :  { %v3374_v16 = vpop.xlane.xlu1 %3373  ;;  %v3385_v17 = vsub.f32 %v11187_v55, %v3377_v14 }
 0x4c1   :  { %v3384_v18 = vsub.f32 %v11193_v58, %v3374_v16 }
 0x4c2   :  { %v3390_v24 = vmul.f32 1.442695, %v3385_v17 }
 0x4c3   :  { %v9099_v51 = vpop.f32.mrb[16].mxu1  ;;  %v3383_v19 = vpop.xlane.xlu0 %3382  ;;  %v3388_v26 = vmul.f32 1.442695, %v3384_v18 }
 0x4c4   :  { %v4219_v52 = vmul.f32 0.17677669, %v9099_v51  ;;  %v4199_v53 = vpop.f32.mrb[17].mxu1  ;;  %v3380_v22 = vpop.xlane.xlu1 %3379  ;;  %v3387_v25 = vsub.f32 %v11201_v63, %v3383_v19  ;;  %10407 = vpow2.f32 %v3390_v24 }
 0x4c5   :  { %v4218_v56 = vmul.f32 0.17677669, %v4199_v53  ;;  %v3386_v28 = vsub.f32 %v11207_v1, %v3380_v22  ;;  %10409 = vpow2.f32 %v3388_v26 }
 0x4c6   :  { %v11261_v57 = vsel %vm3251_vm2, %v4219_v52, -1e+30  ;;  %v3394_v29 = vmul.f32 1.442695, %v3387_v25 }
 0x4c7   :  { %v9102_v59 = vpop.f32.mrb[18].mxu1  ;;  %v4229_v60 = vsel %vm3254_vm0, %v11261_v57, -inf  ;;  %v11267_v61 = vsel %vm3250_vm3, %v4218_v56, -1e+30  ;;  %v3392_v33 = vmul.f32 1.442695, %v3386_v28 }
 0x4c8   :  { %v4221_v62 = vmul.f32 0.17677669, %v9102_v59  ;;  %v4209_v0 = vpop.f32.mrb[19].mxu1  ;;  %4230 = vmax.xlane.f32.xlu0 %v4229_v60  ;;  %v4226_v2 = vsel %vm3254_vm0, %v11267_v61, -inf  ;;  %10411 = vpow2.f32 %v3394_v29 }
 0x4c9   :  { %v4220_v3 = vmul.f32 0.17677669, %v4209_v0  ;;  %4227 = vmax.xlane.f32.xlu1 %v4226_v2  ;;  %10413 = vpow2.f32 %v3392_v33 }
 0x4ca   :  { %v11273_v4 = vsel %vm3253_vm4, %v4221_v62, -1e+30 }
 0x4cb   :  { %v4235_v5 = vsel %vm3254_vm0, %v11273_v4, -inf  ;;  %v11279_v6 = vsel %vm3252_vm5, %v4220_v3, -1e+30 }
 0x4cc   :  { %4236 = vmax.xlane.f32.xlu0 %v4235_v5  ;;  %v4232_v11 = vsel %vm3254_vm0, %v11279_v6, -inf }
 0x4cd   :  { %4233 = vmax.xlane.f32.xlu1 %v4232_v11 }
 0x4ce   :  { %v10408_v35 = vpop.eup %10407 }
 0x4cf   :  { %v10410_v37 = vpop.eup %10409  ;;  %v11293_v55 = vsel %vm3251_vm2, %v10408_v35, 0.0 }
 0x4d0   :  { %v11297_v38 = vsel %vm3250_vm3, %v10410_v37, 0.0  ;;  %v3403_v1 = vsel %vm3254_vm0, %v11293_v55, 0.0 }
 0x4d1   :  { %v3400_v40 = vsel %vm3254_vm0, %v11297_v38, 0.0 }
 0x4d2   :  { %v10412_v58 = vpop.eup %10411 }
 0x4d3   :  { %v10414_v63 = vpop.eup %10413  ;;  %v11305_v41 = vsel %vm3253_vm4, %v10412_v58, 0.0 }
 0x4d4   :  { %v11309_v43 = vsel %vm3252_vm5, %v10414_v63, 0.0  ;;  %v3409_v50 = vsel %vm3254_vm0, %v11305_v41, 0.0 }
 0x4d5   :  { %v3406_v51 = vsel %vm3254_vm0, %v11309_v43, 0.0 }
 0x4de   :  { %9428 = vrot.lane.b32.xlu1 %v11087_v30, %s10809_s7 }
 0x4e2   :  { %9433 = vrot.lane.b32.xlu0 %v11108_v47, %s10809_s7 }
 0x501   :  { %3404 = vadd.xlane.f32.xlu0 %v3403_v1 }
 0x502   :  { %3401 = vadd.xlane.f32.xlu1 %v3400_v40 }
 0x505   :  { %3410 = vadd.xlane.f32.xlu0 %v3409_v50 }
 0x506   :  { %3407 = vadd.xlane.f32.xlu1 %v3406_v51 }
 0x535   :  { %v3554_v52 = vpop.xlane.xlu1 %3553 }
 0x536   :  { %v3562_v53 = vsub.f32 %v11213_v7, %v3554_v52  ;;  %v3551_v56 = vpop.xlane.xlu0 %3550 }
 0x537   :  { %v3561_v59 = vsub.f32 %v11219_v15, %v3551_v56 }
 0x538   :  { %v3567_v60 = vmul.f32 1.442695, %v3562_v53 }
 0x539   :  { %v3565_v62 = vmul.f32 1.442695, %v3561_v59 }
 0x53a   :  { %10415 = vpow2.f32 %v3567_v60  ;;  %v3560_v0 = vpop.xlane.xlu0 %3559 }
 0x53b   :  { %10417 = vpow2.f32 %v3565_v62  ;;  %v3564_v2 = vsub.f32 %v11225_v20, %v3560_v0 }
 0x53d   :  { %v3571_v3 = vmul.f32 1.442695, %v3564_v2 }
 0x53e   :  { %v3557_v5 = vpop.xlane.xlu0 %3556 }
 0x53f   :  { %10419 = vpow2.f32 %v3571_v3  ;;  %v3563_v11 = vsub.f32 %v11231_v23, %v3557_v5 }
 0x541   :  { %v3569_v14 = vmul.f32 1.442695, %v3563_v11 }
 0x543   :  { %10421 = vpow2.f32 %v3569_v14 }
 0x544   :  { %v10416_v16 = vpop.eup %10415 }
 0x545   :  { %v10418_v17 = vpop.eup %10417  ;;  %v3941_v7 = vpop.xlane.xlu0 %3940  ;;  %v11321_v15 = vsel %vm3251_vm2, %v10416_v16, 0.0 }
 0x546   :  { %v3949_v18 = vsub.f32 %v11237_v32, %v3941_v7  ;;  %v3938_v19 = vpop.xlane.xlu1 %3937  ;;  %v3580_v20 = vsel %vm3254_vm0, %v11321_v15, 0.0  ;;  %v11328_v22 = vsel %vm3250_vm3, %v10418_v17, 0.0 }
 0x547   :  { %v3948_v23 = vsub.f32 %v11243_v36, %v3938_v19  ;;  %3581 = vadd.xlane.f32.xlu0 %v3580_v20  ;;  %v3577_v24 = vsel %vm3254_vm0, %v11328_v22, 0.0 }
 0x548   :  { %v3954_v25 = vmul.f32 1.442695, %v3949_v18  ;;  %3578 = vadd.xlane.f32.xlu1 %v3577_v24 }
 0x549   :  { %v10420_v26 = vpop.eup %10419  ;;  %v3952_v28 = vmul.f32 1.442695, %v3948_v23  ;;  %v3947_v29 = vpop.xlane.xlu0 %3946 }
 0x54a   :  { %10423 = vpow2.f32 %v3954_v25  ;;  %v3951_v32 = vsub.f32 %v11249_v42, %v3947_v29  ;;  %v3944_v33 = vpop.xlane.xlu1 %3943  ;;  %v11336_v35 = vsel %vm3253_vm4, %v10420_v26, 0.0 }
 0x54b   :  { %10425 = vpow2.f32 %v3952_v28  ;;  %v3950_v36 = vsub.f32 %v11255_v45, %v3944_v33  ;;  %v3586_v37 = vsel %vm3254_vm0, %v11336_v35, 0.0 }
 0x54c   :  { %v3958_v58 = vmul.f32 1.442695, %v3951_v32  ;;  %3587 = vadd.xlane.f32.xlu0 %v3586_v37 }
 0x54d   :  { %v10422_v63 = vpop.eup %10421  ;;  %v3956_v1 = vmul.f32 1.442695, %v3950_v36 }
 0x54e   :  { %10427 = vpow2.f32 %v3958_v58  ;;  %v11343_v40 = vsel %vm3252_vm5, %v10422_v63, 0.0 }
 0x54f   :  { %10429 = vpow2.f32 %v3956_v1  ;;  %v3583_v42 = vsel %vm3254_vm0, %v11343_v40, 0.0 }
 0x550   :  { %3584 = vadd.xlane.f32.xlu1 %v3583_v42 }
 0x554   :  { %v10424_v50 = vpop.eup %10423 }
 0x555   :  { %v10426_v51 = vpop.eup %10425  ;;  %v4231_v45 = vpop.xlane.xlu0 %4230  ;;  %v11349_v52 = vsel %vm3251_vm2, %v10424_v50, 0.0 }
 0x556   :  { %v4239_v53 = vsub.f32 %v11261_v57, %v4231_v45  ;;  %v4228_v56 = vpop.xlane.xlu1 %4227  ;;  %v3967_v59 = vsel %vm3254_vm0, %v11349_v52, 0.0  ;;  %v11356_v60 = vsel %vm3250_vm3, %v10426_v51, 0.0 }
 0x557   :  { %v4238_v62 = vsub.f32 %v11267_v61, %v4228_v56  ;;  %3968 = vadd.xlane.f32.xlu0 %v3967_v59  ;;  %v3964_v0 = vsel %vm3254_vm0, %v11356_v60, 0.0 }
 0x558   :  { %v10428_v2 = vpop.eup %10427  ;;  %v4244_v3 = vmul.f32 1.442695, %v4239_v53  ;;  %3965 = vadd.xlane.f32.xlu1 %v3964_v0 }
 0x559   :  { %v10430_v5 = vpop.eup %10429  ;;  %v4242_v11 = vmul.f32 1.442695, %v4238_v62  ;;  %v11363_v57 = vsel %vm3253_vm4, %v10428_v2, 0.0  ;;  %v4237_v46 = vpop.xlane.xlu0 %4236 }
 0x55a   :  { %10431 = vpow2.f32 %v4244_v3  ;;  %v3973_v14 = vsel %vm3254_vm0, %v11363_v57, 0.0  ;;  %v11369_v61 = vsel %vm3252_vm5, %v10430_v5, 0.0  ;;  %v4234_v24 = vpop.xlane.xlu1 %4233  ;;  %v4241_v25 = vsub.f32 %v11273_v4, %v4237_v46 }
 0x55b   :  { %10433 = vpow2.f32 %v4242_v11  ;;  %3974 = vadd.xlane.f32.xlu0 %v3973_v14  ;;  %v3970_v16 = vsel %vm3254_vm0, %v11369_v61, 0.0  ;;  %v4240_v26 = vsub.f32 %v11279_v6, %v4234_v24 }
 0x55c   :  { %v4248_v49 = vmul.f32 1.442695, %v4241_v25 }
 0x55d   :  { %v4246_v28 = vmul.f32 1.442695, %v4240_v26  ;;  %v11403_v6 = vpop.permute.xlu0 %9433 }
 0x55e   :  { %10435 = vpow2.f32 %v4248_v49  ;;  %v9429_v36 = vpop.permute.xlu1 %9428 }
 0x55f   :  { %3971 = vadd.xlane.f32.xlu0 %v3970_v16  ;;  %10437 = vpow2.f32 %v4246_v28 }
 0x564   :  { %v10432_v17 = vpop.eup %10431 }
 0x565   :  { %v10434_v7 = vpop.eup %10433  ;;  %v11375_v18 = vsel %vm3251_vm2, %v10432_v17, 0.0 }
 0x566   :  { %v4257_v19 = vsel %vm3254_vm0, %v11375_v18, 0.0  ;;  %v11381_v20 = vsel %vm3250_vm3, %v10434_v7, 0.0  ;;  %v9431_v7 = vunpack.i.h.bf16 %v9429_v36 }
 0x567   :  { %4258 = vadd.xlane.f32.xlu0 %v4257_v19  ;;  %v4254_v23 = vsel %vm3254_vm0, %v11381_v20, 0.0  ;;  %v9430_v19 = vunpack.i.l.bf16 %v9429_v36 }
 0x568   :  { %4255 = vadd.xlane.f32.xlu1 %v4254_v23  ;;  %v10436_v29 = vpop.eup %10435 }
 0x569   :  { %v10438_v32 = vpop.eup %10437  ;;  %v11393_v33 = vsel %vm3253_vm4, %v10436_v29, 0.0  ;;  %v9189_v26 = vpack.c.bf16 %v9431_v7, %v9430_v19 }
 0x579   :  { %9438 = vrot.lane.b32.xlu1 %v11087_v30, %s10804_s28  ;;  %v11397_v30 = vsel %vm3252_vm5, %v10438_v32, 0.0 }
 0x57a   :  { %v4260_v4 = vsel %vm3254_vm0, %v11397_v30, 0.0 }
 0x57d   :  { %9443 = vrot.lane.b32.xlu0 %v11108_v47, %s10804_s28  ;;  %v4263_v47 = vsel %vm3254_vm0, %v11393_v33, 0.0 }
 0x58e   :  { %v3405_v37 = vpop.xlane.xlu0 %3404 }
 0x58f   :  { %v3402_v58 = vpop.xlane.xlu1 %3401  ;;  %v3413_v62 = vmax.f32 %v3405_v37, 1e-30  ;;  %v9436_v37 = vunpack.i.h.bf16 %v11403_v6 }
 0x590   :  { %v3412_v45 = vmax.f32 %v3402_v58, 1e-30  ;;  %v9435_v58 = vunpack.i.l.bf16 %v11403_v6 }
 0x592   :  { %v3411_v34 = vpop.xlane.xlu0 %3410 }
 0x593   :  { %v3408_v63 = vpop.xlane.xlu1 %3407  ;;  %v3415_v5 = vmax.f32 %v3411_v34, 1e-30 }
 0x594   :  { %v3414_v0 = vmax.f32 %v3408_v63, 1e-30  ;;  %v9193_v63 = vpack.c.bf16 %v9436_v37, %v9435_v58  ;;  %v10821_v37 = vmov 0   ;;  %v4407_v58 = vld [vmem:[#allocation11 + $0x10] sm:$0xff] }
 0x595   :  { %4634 = vmatprep.mubr.bf16.mxu1 %v10821_v37 }
 0x59c   :  { %4264 = vadd.xlane.f32.xlu0 %v4263_v47 }
 0x59d   :  { %4261 = vadd.xlane.f32.xlu1 %v4260_v4 }
 0x5d4   :  { %v3582_v1 = vpop.xlane.xlu0 %3581 }
 0x5d5   :  { %v3590_v42 = vmax.f32 %v3582_v1, 1e-30  ;;  %v3579_v54 = vpop.xlane.xlu1 %3578 }
 0x5d6   :  { %v3589_v50 = vmax.f32 %v3579_v54, 1e-30 }
 0x5d7   :  { %10439 = vrcp.f32 %v3590_v42 }
 0x5d8   :  { %10441 = vrcp.f32 %v3589_v50 }
 0x5d9   :  { %v3588_v51 = vpop.xlane.xlu0 %3587  ;;  %10443 = vrcp.f32 %v3412_v45 }
 0x5da   :  { %v3592_v53 = vmax.f32 %v3588_v51, 1e-30 }
 0x5dc   :  { %10445 = vrcp.f32 %v3592_v53 }
 0x5dd   :  { %v3585_v56 = vpop.xlane.xlu1 %3584 }
 0x5de   :  { %v3591_v59 = vmax.f32 %v3585_v56, 1e-30 }
 0x5e0   :  { %10447 = vrcp.f32 %v3591_v59 }
 0x5e1   :  { %v10440_v2 = vpop.eup %10439  ;;  %10449 = vrcp.f32 %v3413_v62 }
 0x5e2   :  { %v10442_v3 = vpop.eup %10441  ;;  %10451 = vrcp.f32 %v3414_v0  ;;  %v3596_v14 = vmul.f32 %v10440_v2, %v11321_v15 }
 0x5e3   :  { %v3594_v11 = vmul.f32 %v10442_v3, %v11328_v22  ;;  %10453 = vrcp.f32 %v3415_v5  ;;  %v10444_v24 = vpop.eup %10443 }
 0x5e4   :  { %v3969_v16 = vpop.xlane.xlu0 %3968  ;;  %v3417_v4 = vmul.f32 %v10444_v24, %v11297_v38 }
 0x5e5   :  { %9041 = vmatprep.mubr.msk.f32.mxu0 %vm3254_vm0, %v3594_v11  ;;  %v3966_v17 = vpop.xlane.xlu1 %3965  ;;  %v3977_v46 = vmax.f32 %v3969_v16, 1e-30 }
 0x5e6   :  { %v3976_v23 = vmax.f32 %v3966_v17, 1e-30  ;;  %9042 = vmatmul.mubr.msk.f32.vlgmr.msra.gmra.mrb[12].mxu0 %vm3254_vm0, %v3596_v14  ;;  %v10446_v25 = vpop.eup %10445 }
 0x5e7   :  { %9172 = vmatpush3.bf16.msra.mxu0 %v11089_v31  ;;  %v3600_v32 = vmul.f32 %v10446_v25, %v11336_v35 }
 0x5e8   :  { %10455 = vrcp.f32 %v3976_v23  ;;  %9174 = vmatprep.subr.bf16.mxu0 %v11110_v48  ;;  %v3975_v22 = vpop.xlane.xlu0 %3974 }
 0x5e9   :  { %v3979_v49 = vmax.f32 %v3975_v22, 1e-30  ;;  %10457 = vrcp.f32 %v3977_v46  ;;  %v4406_v22 = vld [vmem:[#allocation11 + $0x8] sm:$0xff] }
 0x5ea   :  { %v10448_v15 = vpop.eup %10447 }
 0x5eb   :  { %9176 = vmatpush3.bf16.msra.mxu0 %v11110_v48  ;;  %v3598_v28 = vmul.f32 %v10448_v15, %v11343_v40  ;;  %v10450_v47 = vpop.eup %10449  ;;  %10459 = vrcp.f32 %v3979_v49  ;;  %v4410_v15 = vld [vmem:[#allocation11 + $0x28] sm:$0xff] }
 0x5ec   :  { %9190 = vmatprep.subr.bf16.mxu0 %v9189_v26  ;;  %v3972_v29 = vpop.xlane.xlu0 %3971  ;;  %v10452_v36 = vpop.eup %10451  ;;  %v3419_v48 = vmul.f32 %v10450_v47, %v11293_v55  ;;  %v8353_v49 = vcombine.low %v4406_v22, %v4410_v15  ;;  %v4418_v47 = vld [vmem:[#allocation11 + $0x68] sm:$0xff] }
 0x5ed   :  { %v3978_v31 = vmax.f32 %v3972_v29, 1e-30  ;;  %9044 = vmatprep.mubr.msk.f32.mxu0 %vm3254_vm0, %v3598_v28  ;;  %v10454_v35 = vpop.eup %10453  ;;  %v3421_v40 = vmul.f32 %v10452_v36, %v11309_v43  ;;  %v8354_v28 = vcombine.high %v4406_v22, %v4410_v15  ;;  %v4413_v29 = vld [vmem:[#allocation11 + $0x40] sm:$0xff] }
 0x5ee   :  { %9045 = vmatmul.mubr.msk.f32.gmra.mrb[14].mxu0 %vm3254_vm0, %v3600_v32  ;;  %v3423_v6 = vmul.f32 %v10454_v35, %v11305_v41  ;;  %v4417_v32 = vld [vmem:[#allocation11 + $0x60] sm:$0xff]  ;;  %v4408_v35 = vld [vmem:[#allocation11 + $0x18] sm:$0xff] }
 0x5ef   :  { %10461 = vrcp.f32 %v3978_v31  ;;  %9055 = vmatprep.mubr.msk.f32.mxu0 %vm3254_vm0, %v3417_v4  ;;  %4602 = vmatprep.subr.bf16.mxu1 %v8354_v28  ;;  %v8359_v31 = vcombine.low %v4413_v29, %v4417_v32  ;;  %v10028_v15 = vld [vmem:[#allocation14 + $0x1c] ss:$12 sps:$4 sm:$0xff]   ;;  %v10031_v28 = vld [vmem:[#allocation14 + $0x34] ss:$12 sps:$4 sm:$0xff]  }
 0x5f0   :  { %4603 = vmatpush1.bf16.msra.mxu1 %v8353_v49  ;;  %v10056_v49 = vld [vmem:[#allocation14 + $0x20] ss:$12 sps:$4 sm:$0xff]  }
 0x5f2   :  { %v10456_v34 = vpop.eup %10455  ;;  %9056 = vmatmul.mubr.msk.f32.vlgmr.msra.gmra.mrb[12].mxu0 %vm3254_vm0, %v3419_v48  ;;  %v4411_v48 = vld [vmem:[#allocation11 + $0x30] sm:$0xff] }
 0x5f3   :  { %9192 = vmatpush3.bf16.msra.mxu0 %v9189_v26  ;;  %9058 = vmatprep.mubr.msk.f32.mxu0 %vm3254_vm0, %v3421_v40  ;;  %v10458_v1 = vpop.eup %10457  ;;  %v3981_v50 = vmul.f32 %v10456_v34, %v11356_v60  ;;  %v8356_v40 = vcombine.high %v4407_v58, %v4411_v48  ;;  %v4412_v34 = vld [vmem:[#allocation11 + $0x38] sm:$0xff] }
 0x5f4   :  { %9194 = vmatprep.subr.bf16.mxu0 %v9193_v63  ;;  %v4259_v38 = vpop.xlane.xlu0 %4258  ;;  %v3983_v51 = vmul.f32 %v10458_v1, %v11349_v52  ;;  %v684_v1 = vsub.s32 3, %v11068_v9 }
 0x5f5   :  { %v4267_v42 = vmax.f32 %v4259_v38, 1e-30  ;;  %v4256_v54 = vpop.xlane.xlu1 %4255  ;;  %v10460_v43 = vpop.eup %10459  ;;  %v8357_v38 = vcombine.low %v4408_v35, %v4412_v34 }
 0x5f6   :  { %v4266_v55 = vmax.f32 %v4256_v54, 1e-30  ;;  %9059 = vmatmul.mubr.msk.f32.gmra.mrb[14].mxu0 %vm3254_vm0, %v3423_v6  ;;  %v3987_v3 = vmul.f32 %v10460_v43, %v11363_v57  ;;  %v8358_v6 = vcombine.high %v4408_v35, %v4412_v34  ;;  %v10071_v35 = vld [vmem:[#allocation14 + $0x68] ss:$12 sps:$4 sm:$0xff]   ;;  %v10075_v34 = vld [vmem:[#allocation14 + $0x140] ss:$12 sps:$4 sm:$0xff]  }
 0x5f7   :  { %10463 = vrcp.f32 %v4267_v42  ;;  %9196 = vmatpush3.bf16.msra.mxu0 %v9193_v63  ;;  %9083 = vmatprep.mubr.msk.f32.mxu0 %vm3254_vm0, %v3981_v50  ;;  %v8355_v63 = vcombine.low %v4407_v58, %v4411_v48  ;;  %v10471_v42 = vld [vmem:[#allocation10] sm:$0xf]  ;;  %v10035_v48 = vld [vmem:[#allocation14 + $0x60] ss:$12 sps:$4 sm:$0xff]  }
 0x5f8   :  { %10465 = vrcp.f32 %v4266_v55  ;;  %v9444_v45 = vpop.permute.xlu0 %9443  ;;  %v685_v54 = vrot.slane %v10471_v42, %v684_v1  ;;  %v10070_v58 = vld [vmem:[#allocation14 + $0x128] ss:$12 sps:$4 sm:$0xff]   ;;  %v10041_v42 = vld [vmem:[#allocation14 + $0x90] ss:$12 sps:$4 sm:$0xff]  }
 0x5f9   :  { %v10462_v53 = vpop.eup %10461  ;;  %v9446_v56 = vunpack.i.h.bf16 %v9444_v45  ;;  %v9439_v41 = vpop.permute.xlu1 %9438  ;;  %v9445_v59 = vunpack.i.l.bf16 %v9444_v45 }
 0x5fa   :  { %v9441_v62 = vunpack.i.h.bf16 %v9439_v41  ;;  %v9440_v0 = vunpack.i.l.bf16 %v9439_v41  ;;  %9084 = vmatmul.mubr.msk.f32.vlgmr.msra.gmra.mrb[12].mxu0 %vm3254_vm0, %v3983_v51  ;;  %v3985_v60 = vmul.f32 %v10462_v53, %v11369_v61  ;;  %v9228_v55 = vadd.f32 %v11084_v27, %v685_v54 }
 0x5fb   :  { %v9213_v5 = vpack.c.bf16 %v9446_v56, %v9445_v59  ;;  %v9226_v45 = vadd.f32 %v11082_v21, %v685_v54 }
 0x5fc   :  { %v9209_v2 = vpack.c.bf16 %v9441_v62, %v9440_v0  ;;  %9086 = vmatprep.mubr.msk.f32.mxu0 %vm3254_vm0, %v3985_v60  ;;  %v4415_v62 = vld [vmem:[#allocation11 + $0x50] sm:$0xff] }
 0x5fd   :  { %v4419_v60 = vld [vmem:[#allocation11 + $0x70] sm:$0xff] }
 0x5fe   :  { %9087 = vmatmul.mubr.msk.f32.gmra.mrb[14].mxu0 %vm3254_vm0, %v3987_v3  ;;  %9210 = vmatprep.subr.bf16.mxu0 %v9209_v2  ;;  %v4420_v3 = vld [vmem:[#allocation11 + $0x78] sm:$0xff]  ;;  %v8363_v21 = vcombine.low %v4415_v62, %v4419_v60 }
 0x5ff   :  { %9212 = vmatpush3.bf16.msra.mxu0 %v9209_v2  ;;  %v4416_v2 = vld [vmem:[#allocation11 + $0x58] sm:$0xff] }
 0x600   :  { %9214 = vmatprep.subr.bf16.mxu0 %v9213_v5  ;;  %v8365_v27 = vcombine.low %v4416_v2, %v4420_v3 }
 0x601   :  { %v10464_v52 = vpop.eup %10463 }
 0x602   :  { %v10466_v11 = vpop.eup %10465  ;;  %v4273_v16 = vmul.f32 %v10464_v52, %v11375_v18  ;;  %v4405_v18 = vld [vmem:[#allocation11] sm:$0xff]  ;;  %v8364_v52 = vcombine.high %v4415_v62, %v4419_v60  ;;  %v10059_v62 = vld [vmem:[#allocation14 + $0xf4] ss:$12 sps:$4 sm:$0xff]  }
 0x603   :  { %9216 = vmatpush3.bf16.msra.mxu0 %v9213_v5  ;;  %v4271_v14 = vmul.f32 %v10466_v11, %v11381_v20  ;;  %v4409_v20 = vld [vmem:[#allocation11 + $0x20] sm:$0xff]  ;;  %v8366_v11 = vcombine.high %v4416_v2, %v4420_v3  ;;  %v10062_v2 = vld [vmem:[#allocation14 + $0x108] ss:$12 sps:$4 sm:$0xff]   ;;  %v10069_v3 = vld [vmem:[#allocation14 + $0x124] ss:$12 sps:$4 sm:$0xff]  }
 0x604   :  { %v8352_v25 = vcombine.high %v4405_v18, %v4409_v20  ;;  %v8351_v26 = vcombine.low %v4405_v18, %v4409_v20  ;;  %v10064_v60 = vld [vmem:[#allocation14 + $0x10c] ss:$12 sps:$4 sm:$0xff]  }
 0x605   :  { %9111 = vmatprep.mubr.msk.f32.mxu0 %vm3254_vm0, %v4271_v14  ;;  %v10025_v14 = vld [vmem:[#allocation14 + $0x4] ss:$12 sps:$4 sm:$0xff]  }
 0x606   :  { %9112 = vmatmul.mubr.msk.f32.vlgmr.msra.gmra.mrb[12].mxu0 %vm3254_vm0, %v4273_v16  ;;  %4549 = vmatprep.subr.bf16.mxu0 %v8352_v25  ;;  %v10050_v16 = vld [vmem:[#allocation14 + $0xc8] ss:$12 sps:$4 sm:$0xff]   ;;  %v10023_v25 = vld [vmem:[#allocation14] ss:$12 sps:$4 sm:$0xff]  }
 0x607   :  { %4550 = vmatpush1.bf16.msra.mxu0 %v8351_v26  ;;  %v10055_v26 = vld [vmem:[#allocation14 + $0xe0] ss:$12 sps:$4 sm:$0xff]  }
 0x629   :  { %v4265_v61 = vpop.xlane.xlu0 %4264 }
 0x62a   :  { %v4269_v17 = vmax.f32 %v4265_v61, 1e-30  ;;  %v4262_v57 = vpop.xlane.xlu1 %4261 }
 0x62b   :  { %v4268_v7 = vmax.f32 %v4262_v57, 1e-30 }
 0x62c   :  { %10467 = vrcp.f32 %v4269_v17  ;;  %v9232_v17 = vadd.f32 %v11105_v44, %v685_v54  ;;  %v10051_v44 = vld [vmem:[#allocation14 + $0x8] ss:$12 sps:$4 sm:$0xff]  }
 0x62d   :  { %10469 = vrcp.f32 %v4268_v7 }
 0x636   :  { %v10468_v19 = vpop.eup %10467 }
 0x637   :  { %v10470_v23 = vpop.eup %10469  ;;  %v4277_v24 = vmul.f32 %v10468_v19, %v11393_v33  ;;  %v8360_v33 = vcombine.high %v4413_v29, %v4417_v32  ;;  %v9230_v19 = vadd.f32 %v11101_v39, %v685_v54  ;;  %v10026_v39 = vld [vmem:[#allocation14 + $0x18] ss:$12 sps:$4 sm:$0xff]   ;;  %v10029_v32 = vld [vmem:[#allocation14 + $0x30] ss:$12 sps:$4 sm:$0xff]  }
 0x638   :  { %v4275_v46 = vmul.f32 %v10470_v23, %v11397_v30  ;;  %v4414_v30 = vld [vmem:[#allocation11 + $0x48] sm:$0xff]  ;;  %v10046_v54 = vld [vmem:[#allocation14 + $0xac] ss:$12 sps:$4 sm:$0xff]  }
 0x639   :  { %v8361_v4 = vcombine.low %v4414_v30, %v4418_v47  ;;  %v8362_v36 = vcombine.high %v4414_v30, %v4418_v47  ;;  %4551 = vmatprep.subr.bf16.mxu0 %v8360_v33  ;;  %v10060_v29 = vld [vmem:[#allocation14 + $0xf8] ss:$12 sps:$4 sm:$0xff]   ;;  %v10065_v47 = vld [vmem:[#allocation14 + $0x110] ss:$12 sps:$4 sm:$0xff]  }
 0x63a   :  { %9114 = vmatprep.mubr.msk.f32.mxu0 %vm3254_vm0, %v4275_v46  ;;  %4552 = vmatpush1.bf16.msra.mxu0 %v8359_v31  ;;  %v10061_v30 = vld [vmem:[#allocation14 + $0x38] ss:$12 sps:$4 sm:$0xff]   ;;  %v10032_v31 = vld [vmem:[#allocation14 + $0x48] ss:$12 sps:$4 sm:$0xff]  }
 0x63b   :  { %9115 = vmatmul.mubr.msk.f32.gmra.mrb[14].mxu0 %vm3254_vm0, %v4277_v24  ;;  %4604 = vmatprep.subr.bf16.mxu1 %v8362_v36  ;;  %v10034_v33 = vld [vmem:[#allocation14 + $0x4c] ss:$12 sps:$4 sm:$0xff]   ;;  %v10037_v36 = vld [vmem:[#allocation14 + $0x64] ss:$12 sps:$4 sm:$0xff]  }
 0x63c   :  { %4605 = vmatpush1.bf16.msra.mxu1 %v8361_v4  ;;  %4581 = vmatprep.mubr.bf16.mxu0 %v10821_v37  ;;  %v10066_v4 = vld [vmem:[#allocation14 + $0x50] ss:$12 sps:$4 sm:$0xff]  }
 0x63d   :  { %4655 = vmatprep.subr.bf16.mxu0 %v8356_v40  ;;  %4708 = vmatprep.subr.bf16.mxu1 %v8358_v6  ;;  %v10040_v40 = vld [vmem:[#allocation14 + $0x7c] ss:$12 sps:$4 sm:$0xff]   ;;  %v10076_v6 = vld [vmem:[#allocation14 + $0x80] ss:$12 sps:$4 sm:$0xff]  }
 0x6d9   :  { %v9113_v50 = vpop.f32.mrb[12].mxu0 }
 0x6da   :  { %v4392_v43 = vmul.f32 0.25, %v9113_v50  ;;  %v4368_v51 = vpop.f32.mrb[13].mxu0  ;;  %v10080_v50 = vld [vmem:[#allocation14 + $0x158] ss:$12 sps:$4 sm:$0xff]  }
 0x6db   :  { %v4391_v53 = vmul.f32 0.25, %v4368_v51  ;;  %v10049_v51 = vld [vmem:[#allocation14 + $0xc4] ss:$12 sps:$4 sm:$0xff]  }
 0x6dc   :  { %v4396_v56 = vadd.f32 %v9228_v55, %v4392_v43  ;;  %v10081_v55 = vld [vmem:[#allocation14 + $0x98] ss:$12 sps:$4 sm:$0xff]   ;;  %v10044_v43 = vld [vmem:[#allocation14 + $0xa8] ss:$12 sps:$4 sm:$0xff]  }
 0x6dd   :  { %v4395_v41 = vadd.f32 %v9226_v45, %v4391_v53  ;;  %v10085_v45 = vld [vmem:[#allocation14 + $0x170] ss:$12 sps:$4 sm:$0xff]  }
 0x6de   :  { %v4400_v59 = vmax.f32 %v4396_v56, 0.0  ;;  %v10086_v53 = vld [vmem:[#allocation14 + $0xb0] ss:$12 sps:$4 sm:$0xff]   ;;  %v10047_v56 = vld [vmem:[#allocation14 + $0xc0] ss:$12 sps:$4 sm:$0xff]  }
 0x6df   :  { %v4399_v0 = vmax.f32 %v4395_v41, 0.0  ;;  %v10054_v41 = vld [vmem:[#allocation14 + $0xdc] ss:$12 sps:$4 sm:$0xff]  }
 0x6e1   :  { %v4403_v5 = vpack.c.bf16 %v4400_v59, %v4399_v0  ;;  %v10052_v59 = vld [vmem:[#allocation14 + $0xd8] ss:$12 sps:$4 sm:$0xff]   ;;  %v10057_v0 = vld [vmem:[#allocation14 + $0xf0] ss:$12 sps:$4 sm:$0xff]  }
 0x6e3   :  { %8367 = vmatmul.mubr.msk.bf16.vlgmr.msra.gmra.mrb[16].mxu0 %vm3254_vm0, %v4403_v5  ;;  %8369 = vmatmul.mubr.msk.bf16.vlgmr.msra.gmra.mrb[20].mxu1 %vm3254_vm0, %v4403_v5 }
 0x6e4   :  { %4591 = vmatprep.mubr.bf16.mxu0 %v10821_v37  ;;  %4644 = vmatprep.mubr.bf16.mxu1 %v10821_v37 }
 0x6e5   :  { %4656 = vmatpush1.bf16.msra.mxu0 %v8355_v63  ;;  %4709 = vmatpush1.bf16.msra.mxu1 %v8357_v38  ;;  %v10038_v63 = vld [vmem:[#allocation14 + $0x78] ss:$12 sps:$4 sm:$0xff]   ;;  %v10043_v38 = vld [vmem:[#allocation14 + $0x94] ss:$12 sps:$4 sm:$0xff]  }
 0x6e6   :  { %4657 = vmatprep.subr.bf16.mxu0 %v8364_v52  ;;  %4710 = vmatprep.subr.bf16.mxu1 %v8366_v11  ;;  %v10074_v52 = vld [vmem:[#allocation14 + $0x13c] ss:$12 sps:$4 sm:$0xff]   ;;  %v10072_v11 = vld [vmem:[#allocation14 + $0x138] ss:$12 sps:$4 sm:$0xff]  }
 0x6e9   :  { %4658 = vmatpush1.bf16.msra.mxu0 %v8363_v21  ;;  %4711 = vmatpush1.bf16.msra.mxu1 %v8365_v27  ;;  %v10079_v21 = vld [vmem:[#allocation14 + $0x154] ss:$12 sps:$4 sm:$0xff]   ;;  %v10077_v27 = vld [vmem:[#allocation14 + $0x150] ss:$12 sps:$4 sm:$0xff]  }
 0x6ea   :  { %6106 = vmatprep.subr.bf16.mxu0 %v10025_v14  ;;  %8752 = vmatprep.subr.bf16.mxu1 %v10050_v16  ;;  %v10084_v14 = vld [vmem:[#allocation14 + $0x16c] ss:$12 sps:$4 sm:$0xff]   ;;  %v10082_v16 = vld [vmem:[#allocation14 + $0x168] ss:$12 sps:$4 sm:$0xff]  }
 0x70e   :  { %v9116_v61 = vpop.f32.mrb[14].mxu0 }
 0x70f   :  { %v4394_v57 = vmul.f32 0.25, %v9116_v61  ;;  %v4378_v7 = vpop.f32.mrb[15].mxu0  ;;  %v10089_v61 = vld [vmem:[#allocation14 + $0x184] ss:$12 sps:$4 sm:$0xff]  }
 0x710   :  { %v4393_v23 = vmul.f32 0.25, %v4378_v7 }
 0x711   :  { %v4398_v46 = vadd.f32 %v9232_v17, %v4394_v57  ;;  %v10111_v17 = vld [vmem:[#allocation14 + $0x248] ss:$12 sps:$4 sm:$0xff]   ;;  %v11465_v57 = vld [vmem:[#allocation13] sm:$0xff] }
 0x712   :  { %v4397_v24 = vadd.f32 %v9230_v19, %v4393_v23  ;;  %v11469_v7 = vrot.slane %v11465_v57, %v11071_v10  ;;  %v11473_v19 = vrot.slane %v11465_v57, %v11074_v12  ;;  %v11477_v23 = vrot.slane %v11465_v57, %v11077_v13 }
 0x713   :  { %v4402_v18 = vmax.f32 %v4398_v46, 0.0  ;;  %v11482_v46 = vrot.slane %v11465_v57, %v684_v1 }
 0x714   :  { %v4401_v20 = vmax.f32 %v4397_v24, 0.0 }
 0x716   :  { %v4404_v22 = vpack.c.bf16 %v4402_v18, %v4401_v20 }
 0x718   :  { %8368 = vmatmul.mubr.msk.bf16.gmra.mrb[20].mxu0 %vm3254_vm0, %v4404_v22  ;;  %8370 = vmatmul.mubr.msk.bf16.gmra.mrb[24].mxu1 %vm3254_vm0, %v4404_v22 }
 0x719   :  { %4687 = vmatprep.mubr.bf16.mxu0 %v10821_v37  ;;  %4740 = vmatprep.mubr.bf16.mxu1 %v10821_v37 }
 0x720   :  { %8371 = vmatmul.mubr.msk.bf16.vlgmr.msra.gmra.mrb[24].mxu0 %vm3254_vm0, %v4403_v5  ;;  %8373 = vmatmul.mubr.msk.bf16.vlgmr.msra.gmra.mrb[28].mxu1 %vm3254_vm0, %v4403_v5  ;;  %v10067_v5 = vld [vmem:[#allocation14 + $0x120] ss:$12 sps:$4 sm:$0xff]  }
 0x721   :  { %4697 = vmatprep.mubr.bf16.mxu0 %v10821_v37  ;;  %4750 = vmatprep.mubr.bf16.mxu1 %v10821_v37 }
 0x722   :  { %6107 = vmatpush1.bf16.msra.mxu0 %v10023_v25  ;;  %8753 = vmatpush3.bf16.msra.mxu1 %v10051_v44 }
 0x723   :  { %6108 = vmatprep.subr.bf16.mxu0 %v10028_v15  ;;  %8754 = vmatprep.subr.bf16.mxu1 %v10055_v26 }
 0x726   :  { %6109 = vmatpush1.bf16.msra.mxu0 %v10026_v39  ;;  %8755 = vmatpush3.bf16.msra.mxu1 %v10056_v49 }
 0x727   :  { %6110 = vmatprep.subr.bf16.mxu0 %v10031_v28  ;;  %8756 = vmatprep.subr.bf16.mxu1 %v10060_v29 }
 0x728   :  { %8372 = vmatmul.mubr.msk.bf16.gmra.mrb[28].mxu0 %vm3254_vm0, %v4404_v22  ;;  %8374 = vmatmul.mubr.msk.bf16.gmra.mrb[32].mxu1 %vm3254_vm0, %v4404_v22 }
 0x72a   :  { %6111 = vmatpush1.bf16.msra.mxu0 %v10029_v32  ;;  %8757 = vmatpush3.bf16.msra.mxu1 %v10061_v30 }
 0x72b   :  { %6112 = vmatprep.subr.bf16.mxu0 %v10034_v33  ;;  %8758 = vmatprep.subr.bf16.mxu1 %v10065_v47 }
 0x72e   :  { %6113 = vmatpush1.bf16.msra.mxu0 %v10032_v31  ;;  %8759 = vmatpush3.bf16.msra.mxu1 %v10066_v4 }
 0x72f   :  { %6114 = vmatprep.subr.bf16.mxu0 %v10037_v36  ;;  %8760 = vmatprep.subr.bf16.mxu1 %v10070_v58 }
 0x732   :  { %6115 = vmatpush1.bf16.msra.mxu0 %v10035_v48  ;;  %8761 = vmatpush3.bf16.msra.mxu1 %v10071_v35 }
 0x733   :  { %6116 = vmatprep.subr.bf16.mxu0 %v10040_v40  ;;  %8762 = vmatprep.subr.bf16.mxu1 %v10075_v34 }
 0x736   :  { %6117 = vmatpush1.bf16.msra.mxu0 %v10038_v63  ;;  %8763 = vmatpush3.bf16.msra.mxu1 %v10076_v6 }
 0x737   :  { %6118 = vmatprep.subr.bf16.mxu0 %v10043_v38  ;;  %8764 = vmatprep.subr.bf16.mxu1 %v10080_v50  ;;  %v10092_v50 = vld [vmem:[#allocation14 + $0x19c] ss:$12 sps:$4 sm:$0xff]  }
 0x73a   :  { %6119 = vmatpush1.bf16.msra.mxu0 %v10041_v42  ;;  %8765 = vmatpush3.bf16.msra.mxu1 %v10081_v55  ;;  %v10087_v42 = vld [vmem:[#allocation14 + $0x180] ss:$12 sps:$4 sm:$0xff]  }
 0x73b   :  { %6120 = vmatprep.subr.bf16.mxu0 %v10046_v54  ;;  %8766 = vmatprep.subr.bf16.mxu1 %v10085_v45  ;;  %v10112_v54 = vld [vmem:[#allocation14 + $0x188] ss:$12 sps:$4 sm:$0xff]   ;;  %v10116_v55 = vld [vmem:[#allocation14 + $0x260] ss:$12 sps:$4 sm:$0xff]  }
 0x73c   :  { %v10095_v45 = vld [vmem:[#allocation14 + $0x1b4] ss:$12 sps:$4 sm:$0xff]  }
 0x73e   :  { %6121 = vmatpush1.bf16.msra.mxu0 %v10044_v43  ;;  %8767 = vmatpush3.bf16.msra.mxu1 %v10086_v53  ;;  %v10090_v43 = vld [vmem:[#allocation14 + $0x198] ss:$12 sps:$4 sm:$0xff]  }
 0x73f   :  { %6122 = vmatprep.subr.bf16.mxu0 %v10049_v51  ;;  %8780 = vmatprep.subr.bf16.mxu1 %v10111_v17  ;;  %v10117_v51 = vld [vmem:[#allocation14 + $0x1a0] ss:$12 sps:$4 sm:$0xff]   ;;  %v10121_v53 = vld [vmem:[#allocation14 + $0x278] ss:$12 sps:$4 sm:$0xff]   ;;  %v10105_v17 = vld [vmem:[#allocation14 + $0x210] ss:$12 sps:$4 sm:$0xff]  }
 0x742   :  { %6123 = vmatpush1.bf16.msra.mxu0 %v10047_v56  ;;  %v10093_v56 = vld [vmem:[#allocation14 + $0x1b0] ss:$12 sps:$4 sm:$0xff]  }
 0x743   :  { %6124 = vmatprep.subr.bf16.mxu0 %v10054_v41  ;;  %v10122_v41 = vld [vmem:[#allocation14 + $0x1b8] ss:$12 sps:$4 sm:$0xff]  }
 0x746   :  { %6125 = vmatpush1.bf16.msra.mxu0 %v10052_v59  ;;  %v10098_v59 = vld [vmem:[#allocation14 + $0x1cc] ss:$12 sps:$4 sm:$0xff]  }
 0x747   :  { %6126 = vmatprep.subr.bf16.mxu0 %v10059_v62  ;;  %v10126_v62 = vld [vmem:[#allocation14 + $0x290] ss:$12 sps:$4 sm:$0xff]  }
 0x74a   :  { %6127 = vmatpush1.bf16.msra.mxu0 %v10057_v0  ;;  %v10096_v0 = vld [vmem:[#allocation14 + $0x1c8] ss:$12 sps:$4 sm:$0xff]  }
 0x74b   :  { %6128 = vmatprep.subr.bf16.mxu0 %v10064_v60  ;;  %v10127_v60 = vld [vmem:[#allocation14 + $0x1d0] ss:$12 sps:$4 sm:$0xff]  }
 0x74e   :  { %6129 = vmatpush1.bf16.msra.mxu0 %v10062_v2  ;;  %v10101_v2 = vld [vmem:[#allocation14 + $0x1e4] ss:$12 sps:$4 sm:$0xff]  }
 0x74f   :  { %6130 = vmatprep.subr.bf16.mxu0 %v10069_v3  ;;  %v10131_v3 = vld [vmem:[#allocation14 + $0x2a8] ss:$12 sps:$4 sm:$0xff]  }
 0x752   :  { %6131 = vmatpush1.bf16.msra.mxu0 %v10067_v5  ;;  %v10099_v5 = vld [vmem:[#allocation14 + $0x1e0] ss:$12 sps:$4 sm:$0xff]  }
 0x753   :  { %6132 = vmatprep.subr.bf16.mxu0 %v10074_v52  ;;  %v10132_v52 = vld [vmem:[#allocation14 + $0x1e8] ss:$12 sps:$4 sm:$0xff]  }
 0x756   :  { %6133 = vmatpush1.bf16.msra.mxu0 %v10072_v11  ;;  %v10104_v11 = vld [vmem:[#allocation14 + $0x1fc] ss:$12 sps:$4 sm:$0xff]  }
 0x757   :  { %6134 = vmatprep.subr.bf16.mxu0 %v10079_v21  ;;  %v10136_v21 = vld [vmem:[#allocation14 + $0x2c0] ss:$12 sps:$4 sm:$0xff]  }
 0x75a   :  { %6135 = vmatpush1.bf16.msra.mxu0 %v10077_v27  ;;  %v10102_v27 = vld [vmem:[#allocation14 + $0x1f8] ss:$12 sps:$4 sm:$0xff]  }
 0x75b   :  { %6136 = vmatprep.subr.bf16.mxu0 %v10084_v14  ;;  %v10137_v14 = vld [vmem:[#allocation14 + $0x200] ss:$12 sps:$4 sm:$0xff]  }
 0x75e   :  { %6137 = vmatpush1.bf16.msra.mxu0 %v10082_v16  ;;  %v10107_v16 = vld [vmem:[#allocation14 + $0x214] ss:$12 sps:$4 sm:$0xff]  }
 0x75f   :  { %6159 = vmatprep.subr.bf16.mxu0 %v10089_v61  ;;  %v10141_v61 = vld [vmem:[#allocation14 + $0x2d8] ss:$12 sps:$4 sm:$0xff]  }
 0x7b6   :  { %v4583_v24 = vpop.f32.mrb[16].mxu0  ;;  %v4636_v18 = vpop.f32.mrb[20].mxu1 }
 0x7b7   :  { %v4584_v20 = vadd.f32 %v4583_v24, %v11469_v7  ;;  %v4637_v22 = vadd.f32 %v4636_v18, %v11473_v19  ;;  %v4585_v25 = vpop.f32.mrb[17].mxu0  ;;  %v4638_v44 = vpop.f32.mrb[21].mxu1  ;;  %v10142_v24 = vld [vmem:[#allocation14 + $0x218] ss:$12 sps:$4 sm:$0xff]  }
 0x7b8   :  { %v4586_v15 = vadd.f32 %v4585_v25, %v11477_v23  ;;  %v4639_v26 = vadd.f32 %v4638_v44, %v11482_v46  ;;  %v4587_v39 = vpop.f32.mrb[18].mxu0  ;;  %v4640_v49 = vpop.f32.mrb[22].mxu1  ;;  %v10110_v18 = vld [vmem:[#allocation14 + $0x22c] ss:$12 sps:$4 sm:$0xff]   ;;  %v10147_v25 = vld [vmem:[#allocation14 + $0x230] ss:$12 sps:$4 sm:$0xff]  }
 0x7b9   :  { %v4588_v28 = vadd.f32 %v4587_v39, %v11469_v7  ;;  %v4641_v29 = vadd.f32 %v4640_v49, %v11473_v19  ;;  %v4589_v1 = vpop.f32.mrb[19].mxu0  ;;  %v4642_v32 = vpop.f32.mrb[23].mxu1  ;;  %v4761_v47 = vmax.f32 %v4584_v20, 0.0  ;;  %v4763_v31 = vmax.f32 %v4637_v22, 0.0  ;;  %v10146_v20 = vld [vmem:[#allocation14 + $0x2f0] ss:$12 sps:$4 sm:$0xff]  }
 0x7ba   :  { %v4590_v30 = vadd.f32 %v4589_v1, %v11477_v23  ;;  %v4643_v33 = vadd.f32 %v4642_v32, %v11482_v46  ;;  %v4762_v58 = vmax.f32 %v4586_v15, 0.0  ;;  %v4764_v48 = vmax.f32 %v4639_v26, 0.0  ;;  %v10108_v22 = vld [vmem:[#allocation14 + $0x228] ss:$12 sps:$4 sm:$0xff]   ;;  %v10115_v44 = vld [vmem:[#allocation14 + $0x244] ss:$12 sps:$4 sm:$0xff]  }
 0x7bb   :  { %v4769_v4 = vmax.f32 %v4588_v28, 0.0  ;;  %v4771_v36 = vmax.f32 %v4641_v29, 0.0  ;;  %v10151_v15 = vld [vmem:[#allocation14 + $0x3c8] ss:$12 sps:$4 sm:$0xff]   ;;  %v10113_v26 = vld [vmem:[#allocation14 + $0x240] ss:$12 sps:$4 sm:$0xff]  }
 0x7bc   :  { %v4770_v35 = vmax.f32 %v4590_v30, 0.0  ;;  %v4772_v40 = vmax.f32 %v4643_v33, 0.0  ;;  %v10120_v39 = vld [vmem:[#allocation14 + $0x25c] ss:$12 sps:$4 sm:$0xff]   ;;  %v10118_v49 = vld [vmem:[#allocation14 + $0x258] ss:$12 sps:$4 sm:$0xff]  }
 0x7bd   :  { %v4793_v34 = vpack.c.bf16 %v4769_v4, %v4761_v47  ;;  %v11492_v63 = vpack.c.bf16 %v4771_v36, %v4763_v31  ;;  %v10125_v28 = vld [vmem:[#allocation14 + $0x274] ss:$12 sps:$4 sm:$0xff]   ;;  %v10123_v29 = vld [vmem:[#allocation14 + $0x270] ss:$12 sps:$4 sm:$0xff]   ;;  %v10130_v1 = vld [vmem:[#allocation14 + $0x28c] ss:$12 sps:$4 sm:$0xff]  }
 0x7be   :  { %v4794_v38 = vpack.c.bf16 %v4770_v35, %v4762_v58  ;;  %v11494_v6 = vpack.c.bf16 %v4772_v40, %v4764_v48  ;;  %v10128_v32 = vld [vmem:[#allocation14 + $0x288] ss:$12 sps:$4 sm:$0xff]   ;;  %v4441_v30 = vsub.s32 4, %v11068_v9  ;;  %v4449_v33 = vsub.s32 6, %v11068_v9  ;;  %v10135_v4 = vld [vmem:[#allocation14 + $0x2a4] ss:$12 sps:$4 sm:$0xff]  }
 0x7bf   :  { %v4445_v36 = vsub.s32 5, %v11068_v9  ;;  %v4453_v58 = vsub.s32 7, %v11068_v9 }
 0x7c0   :  { %6138 = vmatprep.mubr.bf16.mxu0 %v4794_v38  ;;  %6350 = vmatprep.mubr.bf16.mxu1 %v4794_v38 }
 0x7c1   :  { %6139 = vmatmul.mubr.bf16.vlgmr.msra.gmra.mrb[32].mxu0 %v4793_v34  ;;  %6351 = vmatmul.mubr.bf16.vlgmr.msra.gmra.mrb[36].mxu1 %v4793_v34 }
 0x7c2   :  { %6160 = vmatpush1.bf16.msra.mxu0 %v10087_v42  ;;  %8781 = vmatpush3.bf16.msra.mxu1 %v10112_v54 }
 0x7c3   :  { %6161 = vmatprep.subr.bf16.mxu0 %v10092_v50  ;;  %8782 = vmatprep.subr.bf16.mxu1 %v10116_v55 }
 0x7c6   :  { %6162 = vmatpush1.bf16.msra.mxu0 %v10090_v43  ;;  %8783 = vmatpush3.bf16.msra.mxu1 %v10117_v51 }
 0x7c7   :  { %6163 = vmatprep.subr.bf16.mxu0 %v10095_v45  ;;  %8784 = vmatprep.subr.bf16.mxu1 %v10121_v53  ;;  %v10133_v53 = vld [vmem:[#allocation14 + $0x2a0] ss:$12 sps:$4 sm:$0xff]  }
 0x7ca   :  { %6164 = vmatpush1.bf16.msra.mxu0 %v10093_v56  ;;  %8785 = vmatpush3.bf16.msra.mxu1 %v10122_v41  ;;  %v11507_v56 = vrot.slane %v11465_v57, %v4441_v30  ;;  %v11510_v41 = vrot.slane %v11465_v57, %v4449_v33 }
 0x7cb   :  { %6165 = vmatprep.subr.bf16.mxu0 %v10098_v59  ;;  %8786 = vmatprep.subr.bf16.mxu1 %v10126_v62 }
 0x7ce   :  { %6166 = vmatpush1.bf16.msra.mxu0 %v10096_v0  ;;  %8787 = vmatpush3.bf16.msra.mxu1 %v10127_v60  ;;  %v11515_v0 = vrot.slane %v11465_v57, %v4445_v36 }
 0x7cf   :  { %6167 = vmatprep.subr.bf16.mxu0 %v10101_v2  ;;  %8788 = vmatprep.subr.bf16.mxu1 %v10131_v3 }
 0x7d2   :  { %6168 = vmatpush1.bf16.msra.mxu0 %v10099_v5  ;;  %8789 = vmatpush3.bf16.msra.mxu1 %v10132_v52 }
 0x7d3   :  { %6169 = vmatprep.subr.bf16.mxu0 %v10104_v11  ;;  %8790 = vmatprep.subr.bf16.mxu1 %v10136_v21 }
 0x7d6   :  { %6170 = vmatpush1.bf16.msra.mxu0 %v10102_v27  ;;  %8791 = vmatpush3.bf16.msra.mxu1 %v10137_v14 }
 0x7d7   :  { %6171 = vmatprep.subr.bf16.mxu0 %v10107_v16  ;;  %8792 = vmatprep.subr.bf16.mxu1 %v10141_v61 }
 0x7da   :  { %6172 = vmatpush1.bf16.msra.mxu0 %v10105_v17  ;;  %8793 = vmatpush3.bf16.msra.mxu1 %v10142_v24 }
 0x7db   :  { %6173 = vmatprep.subr.bf16.mxu0 %v10110_v18  ;;  %8794 = vmatprep.subr.bf16.mxu1 %v10146_v20 }
 0x7de   :  { %6174 = vmatpush1.bf16.msra.mxu0 %v10108_v22  ;;  %8795 = vmatpush3.bf16.msra.mxu1 %v10147_v25  ;;  %v10145_v25 = vld [vmem:[#allocation14 + $0x2d4] ss:$12 sps:$4 sm:$0xff]  }
 0x7df   :  { %6175 = vmatprep.subr.bf16.mxu0 %v10115_v44  ;;  %8808 = vmatprep.subr.bf16.mxu1 %v10151_v15 }
 0x7e2   :  { %6176 = vmatpush1.bf16.msra.mxu0 %v10113_v26 }
 0x7e3   :  { %6177 = vmatprep.subr.bf16.mxu0 %v10120_v39 }
 0x7e6   :  { %6178 = vmatpush1.bf16.msra.mxu0 %v10118_v49 }
 0x7e7   :  { %6179 = vmatprep.subr.bf16.mxu0 %v10125_v28 }
 0x7ea   :  { %6180 = vmatpush1.bf16.msra.mxu0 %v10123_v29 }
 0x7eb   :  { %v4593_v47 = vpop.f32.mrb[20].mxu0  ;;  %v4646_v31 = vpop.f32.mrb[24].mxu1  ;;  %6181 = vmatprep.subr.bf16.mxu0 %v10130_v1 }
 0x7ec   :  { %v4594_v48 = vadd.f32 %v4593_v47, %v11469_v7  ;;  %v4647_v35 = vadd.f32 %v4646_v31, %v11473_v19  ;;  %v4595_v40 = vpop.f32.mrb[21].mxu0  ;;  %v4648_v34 = vpop.f32.mrb[25].mxu1  ;;  %v10150_v47 = vld [vmem:[#allocation14 + $0x2ec] ss:$12 sps:$4 sm:$0xff]  }
 0x7ed   :  { %v4596_v38 = vadd.f32 %v4595_v40, %v11477_v23  ;;  %v4649_v42 = vadd.f32 %v4648_v34, %v11482_v46  ;;  %v4597_v54 = vpop.f32.mrb[22].mxu0  ;;  %v4650_v50 = vpop.f32.mrb[26].mxu1 }
 0x7ee   :  { %v4598_v55 = vadd.f32 %v4597_v54, %v11469_v7  ;;  %v4651_v43 = vadd.f32 %v4650_v50, %v11473_v19  ;;  %6182 = vmatpush1.bf16.msra.mxu0 %v10128_v32  ;;  %v4599_v51 = vpop.f32.mrb[23].mxu0  ;;  %v4652_v45 = vpop.f32.mrb[27].mxu1  ;;  %v11518_v7 = vrot.slane %v11465_v57, %v4453_v58  ;;  %v10140_v19 = vld [vmem:[#allocation14 + $0x2bc] ss:$12 sps:$4 sm:$0xff]   ;;  %v4777_v60 = vmax.f32 %v4594_v48, 0.0 }
 0x7ef   :  { %v4600_v59 = vadd.f32 %v4599_v51, %v11477_v23  ;;  %v4653_v62 = vadd.f32 %v4652_v45, %v11482_v46  ;;  %6183 = vmatprep.subr.bf16.mxu0 %v10135_v4  ;;  %v4779_v2 = vmax.f32 %v4647_v35, 0.0  ;;  %v4778_v52 = vmax.f32 %v4596_v38, 0.0  ;;  %v10138_v46 = vld [vmem:[#allocation14 + $0x2b8] ss:$12 sps:$4 sm:$0xff]   ;;  %v10143_v32 = vld [vmem:[#allocation14 + $0x2d0] ss:$12 sps:$4 sm:$0xff]  }
 0x7f0   :  { %v4785_v3 = vmax.f32 %v4598_v55, 0.0  ;;  %v4787_v5 = vmax.f32 %v4651_v43, 0.0  ;;  %v4780_v11 = vmax.f32 %v4649_v42, 0.0  ;;  %v10148_v54 = vld [vmem:[#allocation14 + $0x2e8] ss:$12 sps:$4 sm:$0xff]  }
 0x7f1   :  { %v4786_v21 = vmax.f32 %v4600_v59, 0.0  ;;  %v4788_v27 = vmax.f32 %v4653_v62, 0.0  ;;  %v10152_v45 = vld [vmem:[#allocation14 + $0x308] ss:$12 sps:$4 sm:$0xff]  }
 0x7f2   :  { %v4801_v14 = vpack.c.bf16 %v4785_v3, %v4777_v60  ;;  %v11520_v23 = vpack.c.bf16 %v4787_v5, %v4779_v2  ;;  %6184 = vmatpush1.bf16.msra.mxu0 %v10133_v53  ;;  %v10156_v60 = vld [vmem:[#allocation14 + $0x3e0] ss:$12 sps:$4 sm:$0xff]  }
 0x7f3   :  { %v4802_v16 = vpack.c.bf16 %v4786_v21, %v4778_v52  ;;  %v11522_v61 = vpack.c.bf16 %v4788_v27, %v4780_v11  ;;  %v4689_v17 = vpop.f32.mrb[24].mxu0  ;;  %v4742_v57 = vpop.f32.mrb[28].mxu1  ;;  %6185 = vmatprep.subr.bf16.mxu0 %v10140_v19  ;;  %v10155_v19 = vld [vmem:[#allocation14 + $0x304] ss:$12 sps:$4 sm:$0xff]  }
 0x7f4   :  { %v4690_v24 = vadd.f32 %v4689_v17, %v11507_v56  ;;  %v4743_v18 = vadd.f32 %v4742_v57, %v11510_v41  ;;  %v4691_v20 = vpop.f32.mrb[25].mxu0  ;;  %v4744_v22 = vpop.f32.mrb[29].mxu1  ;;  %v10157_v57 = vld [vmem:[#allocation14 + $0x320] ss:$12 sps:$4 sm:$0xff]  }
 0x7f5   :  { %v4692_v44 = vadd.f32 %v4691_v20, %v11515_v0  ;;  %v4745_v15 = vadd.f32 %v4744_v22, %v11518_v7  ;;  %v4693_v26 = vpop.f32.mrb[26].mxu0  ;;  %v4746_v39 = vpop.f32.mrb[30].mxu1  ;;  %6148 = vmatprep.mubr.bf16.mxu0 %v4802_v16  ;;  %6358 = vmatprep.mubr.bf16.mxu1 %v4802_v16 }
 0x7f6   :  { %v4694_v49 = vadd.f32 %v4693_v26, %v11507_v56  ;;  %v4747_v28 = vadd.f32 %v4746_v39, %v11510_v41  ;;  %6186 = vmatpush1.bf16.msra.mxu0 %v10138_v46  ;;  %v4695_v29 = vpop.f32.mrb[27].mxu0  ;;  %v4748_v1 = vpop.f32.mrb[31].mxu1  ;;  %6359 = vmatmul.mubr.bf16.gmra.mrb[40].mxu1 %v4801_v14  ;;  %v4765_v31 = vmax.f32 %v4690_v24, 0.0  ;;  %v4767_v4 = vmax.f32 %v4743_v18, 0.0  ;;  %v10153_v46 = vld [vmem:[#allocation14 + $0x300] ss:$12 sps:$4 sm:$0xff]  }
 0x7f7   :  { %v4696_v30 = vadd.f32 %v4695_v29, %v11515_v0  ;;  %v4749_v33 = vadd.f32 %v4748_v1, %v11518_v7  ;;  %6149 = vmatmul.mubr.bf16.gmra.mrb[36].mxu0 %v4801_v14  ;;  %6399 = vmatprep.mubr.bf16.mxu1 %v11494_v6  ;;  %v4766_v48 = vmax.f32 %v4692_v44, 0.0  ;;  %v4768_v35 = vmax.f32 %v4745_v15, 0.0  ;;  %v10160_v24 = vld [vmem:[#allocation14 + $0x31c] ss:$12 sps:$4 sm:$0xff]   ;;  %v10158_v39 = vld [vmem:[#allocation14 + $0x318] ss:$12 sps:$4 sm:$0xff]  }
 0x7f8   :  { %v4773_v36 = vmax.f32 %v4694_v49, 0.0  ;;  %v4775_v58 = vmax.f32 %v4747_v28, 0.0  ;;  %6191 = vmatprep.mubr.bf16.mxu0 %v11494_v6  ;;  %6187 = vmatprep.subr.bf16.mxu0 %v10145_v25  ;;  %v10162_v29 = vld [vmem:[#allocation14 + $0x338] ss:$12 sps:$4 sm:$0xff]   ;;  %v10165_v1 = vld [vmem:[#allocation14 + $0x334] ss:$12 sps:$4 sm:$0xff]  }
 0x7f9   :  { %v4774_v40 = vmax.f32 %v4696_v30, 0.0  ;;  %v4776_v34 = vmax.f32 %v4749_v33, 0.0  ;;  %v10170_v30 = vld [vmem:[#allocation14 + $0x34c] ss:$12 sps:$4 sm:$0xff]   ;;  %v10171_v33 = vld [vmem:[#allocation14 + $0x428] ss:$12 sps:$4 sm:$0xff]  }
 0x7fa   :  { %v11534_v38 = vpack.c.bf16 %v4773_v36, %v4765_v31  ;;  %v11536_v42 = vpack.c.bf16 %v4775_v58, %v4767_v4  ;;  %6188 = vmatpush1.bf16.msra.mxu0 %v10143_v32  ;;  %v10166_v32 = vld [vmem:[#allocation14 + $0x410] ss:$12 sps:$4 sm:$0xff]   ;;  %v10172_v31 = vld [vmem:[#allocation14 + $0x368] ss:$12 sps:$4 sm:$0xff]   ;;  %v10176_v36 = vld [vmem:[#allocation14 + $0x440] ss:$12 sps:$4 sm:$0xff]  }
 0x7fb   :  { %v11538_v50 = vpack.c.bf16 %v4774_v40, %v4766_v48  ;;  %v11540_v55 = vpack.c.bf16 %v4776_v34, %v4768_v35  ;;  %v4699_v43 = vpop.f32.mrb[28].mxu0  ;;  %v4752_v51 = vpop.f32.mrb[32].mxu1  ;;  %6189 = vmatprep.subr.bf16.mxu0 %v10150_v47  ;;  %v10168_v47 = vld [vmem:[#allocation14 + $0x348] ss:$12 sps:$4 sm:$0xff]   ;;  %v10175_v4 = vld [vmem:[#allocation14 + $0x364] ss:$12 sps:$4 sm:$0xff]  }
 0x7fc   :  { %v4700_v6 = vadd.f32 %v4699_v43, %v11507_v56  ;;  %v4753_v53 = vadd.f32 %v4752_v51, %v11510_v41  ;;  %v4701_v59 = vpop.f32.mrb[29].mxu0  ;;  %v4754_v62 = vpop.f32.mrb[33].mxu1  ;;  %v10173_v58 = vld [vmem:[#allocation14 + $0x360] ss:$12 sps:$4 sm:$0xff]   ;;  %v10180_v35 = vld [vmem:[#allocation14 + $0x37c] ss:$12 sps:$4 sm:$0xff]  }
 0x7fd   :  { %v4702_v2 = vadd.f32 %v4701_v59, %v11515_v0  ;;  %v4755_v3 = vadd.f32 %v4754_v62, %v11518_v7  ;;  %v4703_v5 = vpop.f32.mrb[30].mxu0  ;;  %v4756_v52 = vpop.f32.mrb[34].mxu1  ;;  %v10177_v48 = vld [vmem:[#allocation14 + $0x380] ss:$12 sps:$4 sm:$0xff]   ;;  %v10181_v40 = vld [vmem:[#allocation14 + $0x458] ss:$12 sps:$4 sm:$0xff]  }
 0x7fe   :  { %v4704_v11 = vadd.f32 %v4703_v5, %v11507_v56  ;;  %v4757_v21 = vadd.f32 %v4756_v52, %v11510_v41  ;;  %6190 = vmatpush1.bf16.msra.mxu0 %v10148_v54  ;;  %v4705_v27 = vpop.f32.mrb[31].mxu0  ;;  %v4758_v14 = vpop.f32.mrb[35].mxu1  ;;  %6400 = vmatmul.mubr.bf16.vlgmr.msra.gmra.mrb[44].mxu1 %v11492_v63  ;;  %v4781_v18 = vmax.f32 %v4700_v6, 0.0  ;;  %v4783_v20 = vmax.f32 %v4753_v53, 0.0  ;;  %v10161_v41 = vld [vmem:[#allocation14 + $0x3f8] ss:$12 sps:$4 sm:$0xff]  }
 0x7ff   :  { %v4706_v16 = vadd.f32 %v4705_v27, %v11515_v0  ;;  %v4759_v17 = vadd.f32 %v4758_v14, %v11518_v7  ;;  %8809 = vmatpush3.bf16.msra.mxu1 %v10152_v45  ;;  %6407 = vmatprep.mubr.bf16.mxu1 %v11522_v61  ;;  %v4782_v25 = vmax.f32 %v4702_v2, 0.0  ;;  %v4784_v44 = vmax.f32 %v4755_v3, 0.0  ;;  %v10182_v34 = vld [vmem:[#allocation14 + $0x398] ss:$12 sps:$4 sm:$0xff]   ;;  %v10185_v54 = vld [vmem:[#allocation14 + $0x394] ss:$12 sps:$4 sm:$0xff]  }
 0x800   :  { %v4789_v56 = vmax.f32 %v4704_v11, 0.0  ;;  %v4791_v22 = vmax.f32 %v4757_v21, 0.0  ;;  %6212 = vmatprep.subr.bf16.mxu0 %v10155_v19  ;;  %8810 = vmatprep.subr.bf16.mxu1 %v10156_v60  ;;  %v10183_v43 = vld [vmem:[#allocation14 + $0x390] ss:$12 sps:$4 sm:$0xff]   ;;  %v10190_v45 = vld [vmem:[#allocation14 + $0x3ac] ss:$12 sps:$4 sm:$0xff]  }
 0x801   :  { %v4790_v15 = vmax.f32 %v4706_v16, 0.0  ;;  %v4792_v26 = vmax.f32 %v4759_v17, 0.0  ;;  %6192 = vmatmul.mubr.bf16.vlgmr.msra.gmra.mrb[32].mxu0 %v11492_v63  ;;  %v10163_v63 = vld [vmem:[#allocation14 + $0x330] ss:$12 sps:$4 sm:$0xff]   ;;  %v10191_v6 = vld [vmem:[#allocation14 + $0x548] ss:$12 sps:$4 sm:$0xff]  }
 0x802   :  { %v11553_v0 = vpack.c.bf16 %v4789_v56, %v4781_v18  ;;  %v11555_v7 = vpack.c.bf16 %v4791_v22, %v4783_v20  ;;  %6201 = vmatprep.mubr.bf16.mxu0 %v11522_v61  ;;  %6213 = vmatpush1.bf16.msra.mxu0 %v10153_v46  ;;  %v10167_v61 = vld [vmem:[#allocation14 + $0x350] ss:$12 sps:$4 sm:$0xff]   ;;  %v10188_v53 = vld [vmem:[#allocation14 + $0x3a8] ss:$12 sps:$4 sm:$0xff]   ;;  %v10196_v19 = vld [vmem:[#allocation14 + $0x560] ss:$12 sps:$4 sm:$0xff]  }
 0x803   :  { %v11558_v49 = vpack.c.bf16 %v4790_v15, %v4782_v25  ;;  %v11560_v28 = vpack.c.bf16 %v4792_v26, %v4784_v44  ;;  %8811 = vmatpush3.bf16.msra.mxu1 %v10157_v57  ;;  %6214 = vmatprep.subr.bf16.mxu0 %v10160_v24  ;;  %v10187_v51 = vld [vmem:[#allocation14 + $0x3b0] ss:$12 sps:$4 sm:$0xff]   ;;  %v10192_v59 = vld [vmem:[#allocation14 + $0x488] ss:$12 sps:$4 sm:$0xff]   ;;  %v10193_v60 = vld [vmem:[#allocation14 + $0x3c0] ss:$12 sps:$4 sm:$0xff]  }
 0x804   :  { %8812 = vmatprep.subr.bf16.mxu1 %v10161_v41  ;;  %v10195_v62 = vld [vmem:[#allocation14 + $0x3c4] ss:$12 sps:$4 sm:$0xff]   ;;  %v10197_v2 = vld [vmem:[#allocation14 + $0x4a0] ss:$12 sps:$4 sm:$0xff]   ;;  %v10200_v3 = vld [vmem:[#allocation14 + $0x3dc] ss:$12 sps:$4 sm:$0xff]  }
 0x805   :  { %v10201_v5 = vld [vmem:[#allocation14 + $0x578] ss:$12 sps:$4 sm:$0xff]   ;;  %v10205_v21 = vld [vmem:[#allocation14 + $0x3f4] ss:$12 sps:$4 sm:$0xff]   ;;  %v10206_v27 = vld [vmem:[#allocation14 + $0x590] ss:$12 sps:$4 sm:$0xff]  }
 0x806   :  { %6215 = vmatpush1.bf16.msra.mxu0 %v10158_v39  ;;  %6408 = vmatmul.mubr.bf16.gmra.mrb[48].mxu1 %v11520_v23  ;;  %v10198_v52 = vld [vmem:[#allocation14 + $0x3d8] ss:$12 sps:$4 sm:$0xff]   ;;  %v10203_v14 = vld [vmem:[#allocation14 + $0x3f0] ss:$12 sps:$4 sm:$0xff]   ;;  %v10211_v17 = vld [vmem:[#allocation14 + $0x5a8] ss:$12 sps:$4 sm:$0xff]  }
 0x807   :  { %8813 = vmatpush3.bf16.msra.mxu1 %v10162_v29  ;;  %6448 = vmatprep.mubr.bf16.mxu1 %v11538_v50  ;;  %v10202_v11 = vld [vmem:[#allocation14 + $0x4b8] ss:$12 sps:$4 sm:$0xff]   ;;  %v10207_v46 = vld [vmem:[#allocation14 + $0x4d0] ss:$12 sps:$4 sm:$0xff]   ;;  %v10208_v57 = vld [vmem:[#allocation14 + $0x408] ss:$12 sps:$4 sm:$0xff]  }
 0x808   :  { %6216 = vmatprep.subr.bf16.mxu0 %v10165_v1  ;;  %8814 = vmatprep.subr.bf16.mxu1 %v10166_v32  ;;  %v10210_v16 = vld [vmem:[#allocation14 + $0x40c] ss:$12 sps:$4 sm:$0xff]   ;;  %v10212_v24 = vld [vmem:[#allocation14 + $0x4e8] ss:$12 sps:$4 sm:$0xff]   ;;  %v10215_v18 = vld [vmem:[#allocation14 + $0x424] ss:$12 sps:$4 sm:$0xff]  }
 0x809   :  { %6202 = vmatmul.mubr.bf16.gmra.mrb[36].mxu0 %v11520_v23  ;;  %v10178_v23 = vld [vmem:[#allocation14 + $0x378] ss:$12 sps:$4 sm:$0xff]   ;;  %v10216_v20 = vld [vmem:[#allocation14 + $0x5c0] ss:$12 sps:$4 sm:$0xff]   ;;  %v10220_v41 = vld [vmem:[#allocation14 + $0x43c] ss:$12 sps:$4 sm:$0xff]  }
 0x80a   :  { %6217 = vmatpush1.bf16.msra.mxu0 %v10163_v63  ;;  %6244 = vmatprep.mubr.bf16.mxu0 %v11538_v50  ;;  %v10186_v50 = vld [vmem:[#allocation14 + $0x470] ss:$12 sps:$4 sm:$0xff]   ;;  %v10213_v56 = vld [vmem:[#allocation14 + $0x420] ss:$12 sps:$4 sm:$0xff]   ;;  %v10221_v25 = vld [vmem:[#allocation14 + $0x5d8] ss:$12 sps:$4 sm:$0xff]  }
 0x80b   :  { %8815 = vmatpush3.bf16.msra.mxu1 %v10167_v61  ;;  %6218 = vmatprep.subr.bf16.mxu0 %v10170_v30  ;;  %v10217_v22 = vld [vmem:[#allocation14 + $0x500] ss:$12 sps:$4 sm:$0xff]   ;;  %v10218_v44 = vld [vmem:[#allocation14 + $0x438] ss:$12 sps:$4 sm:$0xff]   ;;  %v10226_v39 = vld [vmem:[#allocation14 + $0x5f0] ss:$12 sps:$4 sm:$0xff]  }
 0x80c   :  { %8816 = vmatprep.subr.bf16.mxu1 %v10171_v33  ;;  %v10222_v15 = vld [vmem:[#allocation14 + $0x518] ss:$12 sps:$4 sm:$0xff]   ;;  %v10225_v26 = vld [vmem:[#allocation14 + $0x454] ss:$12 sps:$4 sm:$0xff]   ;;  %v10223_v29 = vld [vmem:[#allocation14 + $0x450] ss:$12 sps:$4 sm:$0xff]  }
 0x80d   :  { %v10227_v1 = vld [vmem:[#allocation14 + $0x530] ss:$12 sps:$4 sm:$0xff]   ;;  %v10230_v32 = vld [vmem:[#allocation14 + $0x46c] ss:$12 sps:$4 sm:$0xff]   ;;  %v10231_v63 = vld [vmem:[#allocation17 + $0x40] sm:$0xff]  }
 0x80e   :  { %6219 = vmatpush1.bf16.msra.mxu0 %v10168_v47  ;;  %v10228_v61 = vld [vmem:[#allocation14 + $0x468] ss:$12 sps:$4 sm:$0xff]   ;;  %v10235_v33 = vld [vmem:[#allocation14 + $0x484] ss:$12 sps:$4 sm:$0xff]  }
 0x80f   :  { %8817 = vmatpush3.bf16.msra.mxu1 %v10172_v31  ;;  %6220 = vmatprep.subr.bf16.mxu0 %v10175_v4  ;;  %v10232_v30 = vld [vmem:[#allocation17] sm:$0xff]   ;;  %v10236_v47 = vld [vmem:[#allocation17 + $0x48] sm:$0xff]  }
 0x810   :  { %8818 = vmatprep.subr.bf16.mxu1 %v10176_v36  ;;  %v10233_v31 = vld [vmem:[#allocation14 + $0x480] ss:$12 sps:$4 sm:$0xff]   ;;  %v10240_v36 = vld [vmem:[#allocation14 + $0x49c] ss:$12 sps:$4 sm:$0xff]  }
 0x811   :  { %v10237_v4 = vld [vmem:[#allocation17 + $0x8] sm:$0xff]  }
 0x812   :  { %6221 = vmatpush1.bf16.msra.mxu0 %v10173_v58  ;;  %v10241_v58 = vld [vmem:[#allocation17 + $0x50] sm:$0xff]  }
 0x813   :  { %8819 = vmatpush3.bf16.msra.mxu1 %v10177_v48  ;;  %6222 = vmatprep.subr.bf16.mxu0 %v10180_v35  ;;  %v6590_v48 = vld [vmem:[#allocation7 + $0x8] sm:$0xff]  ;;  %v10238_v35 = vld [vmem:[#allocation14 + $0x498] ss:$12 sps:$4 sm:$0xff]  }
 0x814   :  { %8820 = vmatprep.subr.bf16.mxu1 %v10181_v40  ;;  %v10242_v40 = vld [vmem:[#allocation17 + $0x10] sm:$0xff]  }
 0x816   :  { %6223 = vmatpush1.bf16.msra.mxu0 %v10178_v23  ;;  %v10245_v23 = vld [vmem:[#allocation14 + $0x4b4] ss:$12 sps:$4 sm:$0xff]  }
 0x817   :  { %8821 = vmatpush3.bf16.msra.mxu1 %v10182_v34  ;;  %6224 = vmatprep.subr.bf16.mxu0 %v10185_v54  ;;  %v10246_v34 = vld [vmem:[#allocation17 + $0x58] sm:$0xff]   ;;  %v6602_v54 = vpack.c.bf16 %v6590_v48, %v6590_v48  ;;  %v10302_v48 = vld [vmem:[#allocation17 + $0xb0] sm:$0xff]  }
 0x818   :  { %8822 = vmatprep.subr.bf16.mxu1 %v10186_v50  ;;  %v10243_v50 = vld [vmem:[#allocation14 + $0x4b0] ss:$12 sps:$4 sm:$0xff]  }
 0x81a   :  { %6225 = vmatpush1.bf16.msra.mxu0 %v10183_v43  ;;  %v10247_v43 = vld [vmem:[#allocation17 + $0x18] sm:$0xff]  }
 0x81b   :  { %8823 = vmatpush3.bf16.msra.mxu1 %v10187_v51  ;;  %6226 = vmatprep.subr.bf16.mxu0 %v10190_v45  ;;  %v10251_v51 = vld [vmem:[#allocation17 + $0x60] sm:$0xff]  }
 0x81c   :  { %8836 = vmatprep.subr.bf16.mxu1 %v10191_v6  ;;  %v10252_v45 = vld [vmem:[#allocation17 + $0x20] sm:$0xff]  }
 0x81d   :  { %v10255_v6 = vld [vmem:[#allocation14 + $0x4e4] ss:$12 sps:$4 sm:$0xff]  }
 0x81e   :  { %6227 = vmatpush1.bf16.msra.mxu0 %v10188_v53  ;;  %6449 = vmatmul.mubr.bf16.vlgmr.msra.gmra.mrb[52].mxu1 %v11534_v38  ;;  %v10256_v53 = vld [vmem:[#allocation17 + $0x68] sm:$0xff]  }
 0x81f   :  { %6456 = vmatprep.mubr.bf16.mxu1 %v11558_v49  ;;  %8837 = vmatpush3.bf16.msra.mxu1 %v10192_v59  ;;  %v10253_v59 = vld [vmem:[#allocation14 + $0x4e0] ss:$12 sps:$4 sm:$0xff]  }
 0x820   :  { %6228 = vmatprep.subr.bf16.mxu0 %v10195_v62  ;;  %8838 = vmatprep.subr.bf16.mxu1 %v10196_v19  ;;  %v10257_v62 = vld [vmem:[#allocation17 + $0x28] sm:$0xff]   ;;  %v10260_v19 = vld [vmem:[#allocation14 + $0x4fc] ss:$12 sps:$4 sm:$0xff]  }
 0x822   :  { %6229 = vmatpush1.bf16.msra.mxu0 %v10193_v60  ;;  %v10261_v60 = vld [vmem:[#allocation17 + $0x70] sm:$0xff]  }
 0x823   :  { %8839 = vmatpush3.bf16.msra.mxu1 %v10197_v2  ;;  %6230 = vmatprep.subr.bf16.mxu0 %v10200_v3  ;;  %v10265_v2 = vld [vmem:[#allocation14 + $0x514] ss:$12 sps:$4 sm:$0xff]  }
 0x824   :  { %8840 = vmatprep.subr.bf16.mxu1 %v10201_v5  ;;  %v10266_v3 = vld [vmem:[#allocation17 + $0x78] sm:$0xff]  }
 0x825   :  { %v10263_v5 = vld [vmem:[#allocation14 + $0x510] ss:$12 sps:$4 sm:$0xff]  }
 0x826   :  { %6231 = vmatpush1.bf16.msra.mxu0 %v10198_v52  ;;  %6457 = vmatmul.mubr.bf16.gmra.mrb[56].mxu1 %v11553_v0  ;;  %v10267_v52 = vld [vmem:[#allocation17 + $0x38] sm:$0xff]  }
 0x827   :  { %8841 = vmatpush3.bf16.msra.mxu1 %v10202_v11  ;;  %6497 = vmatprep.mubr.bf16.mxu1 %v11540_v55  ;;  %v10270_v11 = vld [vmem:[#allocation14 + $0x52c] ss:$12 sps:$4 sm:$0xff]  }
 0x828   :  { %6232 = vmatprep.subr.bf16.mxu0 %v10205_v21  ;;  %8842 = vmatprep.subr.bf16.mxu1 %v10206_v27  ;;  %v6589_v21 = vld [vmem:[#allocation7] sm:$0xff]  ;;  %v10271_v27 = vld [vmem:[#allocation17 + $0xc0] sm:$0xff]  }
 0x82a   :  { %6233 = vmatpush1.bf16.msra.mxu0 %v10203_v14  ;;  %v6592_v14 = vld [vmem:[#allocation7 + $0x18] sm:$0xff] }
 0x82b   :  { %8843 = vmatpush3.bf16.msra.mxu1 %v10207_v46  ;;  %6234 = vmatprep.subr.bf16.mxu0 %v10210_v16  ;;  %v10268_v46 = vld [vmem:[#allocation14 + $0x528] ss:$12 sps:$4 sm:$0xff]   ;;  %v6601_v16 = vpack.c.bf16 %v6589_v21, %v6589_v21 }
 0x82c   :  { %8844 = vmatprep.subr.bf16.mxu1 %v10211_v17  ;;  %v10272_v17 = vld [vmem:[#allocation17 + $0x80] sm:$0xff]  }
 0x82e   :  { %6235 = vmatpush1.bf16.msra.mxu0 %v10208_v57  ;;  %v10275_v57 = vld [vmem:[#allocation14 + $0x544] ss:$12 sps:$4 sm:$0xff]  }
 0x82f   :  { %8845 = vmatpush3.bf16.msra.mxu1 %v10212_v24  ;;  %6236 = vmatprep.subr.bf16.mxu0 %v10215_v18  ;;  %v10276_v24 = vld [vmem:[#allocation17 + $0xc8] sm:$0xff]   ;;  %v6604_v18 = vpack.c.bf16 %v6592_v14, %v6592_v14  ;;  %v10341_v14 = vld [vmem:[#allocation17 + $0x258] sm:$0xff]  }
 0x830   :  { %8846 = vmatprep.subr.bf16.mxu1 %v10216_v20  ;;  %v10273_v20 = vld [vmem:[#allocation14 + $0x540] ss:$12 sps:$4 sm:$0xff]  }
 0x832   :  { %6237 = vmatpush1.bf16.msra.mxu0 %v10213_v56  ;;  %v10277_v56 = vld [vmem:[#allocation17 + $0x88] sm:$0xff]  }
 0x833   :  { %8847 = vmatpush3.bf16.msra.mxu1 %v10217_v22  ;;  %6238 = vmatprep.subr.bf16.mxu0 %v10220_v41  ;;  %v10280_v22 = vld [vmem:[#allocation14 + $0x55c] ss:$12 sps:$4 sm:$0xff]   ;;  %v10281_v41 = vld [vmem:[#allocation17 + $0xd0] sm:$0xff]  }
 0x834   :  { %8848 = vmatprep.subr.bf16.mxu1 %v10221_v25  ;;  %v10278_v25 = vld [vmem:[#allocation14 + $0x558] ss:$12 sps:$4 sm:$0xff]  }
 0x836   :  { %6239 = vmatpush1.bf16.msra.mxu0 %v10218_v44  ;;  %v10282_v44 = vld [vmem:[#allocation17 + $0x90] sm:$0xff]  }
 0x837   :  { %8849 = vmatpush3.bf16.msra.mxu1 %v10222_v15  ;;  %6240 = vmatprep.subr.bf16.mxu0 %v10225_v26  ;;  %v10285_v15 = vld [vmem:[#allocation14 + $0x574] ss:$12 sps:$4 sm:$0xff]  }
 0x838   :  { %8850 = vmatprep.subr.bf16.mxu1 %v10226_v39  ;;  %v10286_v26 = vld [vmem:[#allocation17 + $0xd8] sm:$0xff]  }
 0x839   :  { %v10283_v39 = vld [vmem:[#allocation14 + $0x570] ss:$12 sps:$4 sm:$0xff]  }
 0x83a   :  { %6241 = vmatpush1.bf16.msra.mxu0 %v10223_v29  ;;  %v10287_v29 = vld [vmem:[#allocation17 + $0x98] sm:$0xff]  }
 0x83b   :  { %8851 = vmatpush3.bf16.msra.mxu1 %v10227_v1  ;;  %6242 = vmatprep.subr.bf16.mxu0 %v10230_v32  ;;  %v10290_v1 = vld [vmem:[#allocation14 + $0x58c] ss:$12 sps:$4 sm:$0xff]   ;;  %v10291_v32 = vld [vmem:[#allocation17 + $0xe0] sm:$0xff]  }
 0x83c   :  { %8864 = vmatprep.subr.bf16.mxu1 %v10231_v63  ;;  %v10288_v63 = vld [vmem:[#allocation14 + $0x588] ss:$12 sps:$4 sm:$0xff]  }
 0x83e   :  { %6243 = vmatpush1.bf16.msra.mxu0 %v10228_v61  ;;  %6498 = vmatmul.mubr.bf16.vlgmr.msra.gmra.mrb[60].mxu1 %v11536_v42  ;;  %v10292_v61 = vld [vmem:[#allocation17 + $0xa0] sm:$0xff]  }
 0x83f   :  { %6505 = vmatprep.mubr.bf16.mxu1 %v11560_v28  ;;  %8865 = vmatpush3.bf16.msra.mxu1 %v10232_v30  ;;  %v10295_v30 = vld [vmem:[#allocation14 + $0x5a4] ss:$12 sps:$4 sm:$0xff]  }
 0x840   :  { %6265 = vmatprep.subr.bf16.mxu0 %v10235_v33  ;;  %8866 = vmatprep.subr.bf16.mxu1 %v10236_v47  ;;  %v10296_v33 = vld [vmem:[#allocation17 + $0xe8] sm:$0xff]  }
 0x841   :  { %6245 = vmatmul.mubr.bf16.vlgmr.msra.gmra.mrb[32].mxu0 %v11534_v38  ;;  %v10250_v38 = vld [vmem:[#allocation14 + $0x4cc] ss:$12 sps:$4 sm:$0xff]  }
 0x842   :  { %6254 = vmatprep.mubr.bf16.mxu0 %v11558_v49  ;;  %6266 = vmatpush1.bf16.msra.mxu0 %v10233_v31  ;;  %v10248_v49 = vld [vmem:[#allocation14 + $0x4c8] ss:$12 sps:$4 sm:$0xff]   ;;  %v10293_v47 = vld [vmem:[#allocation14 + $0x5a0] ss:$12 sps:$4 sm:$0xff]  }
 0x843   :  { %8867 = vmatpush3.bf16.msra.mxu1 %v10237_v4  ;;  %6267 = vmatprep.subr.bf16.mxu0 %v10240_v36  ;;  %v10297_v31 = vld [vmem:[#allocation17 + $0xa8] sm:$0xff]   ;;  %v10300_v4 = vld [vmem:[#allocation14 + $0x5bc] ss:$12 sps:$4 sm:$0xff]   ;;  %v10301_v36 = vld [vmem:[#allocation17 + $0xf0] sm:$0xff]  }
 0x844   :  { %8868 = vmatprep.subr.bf16.mxu1 %v10241_v58  ;;  %v10298_v58 = vld [vmem:[#allocation14 + $0x5b8] ss:$12 sps:$4 sm:$0xff]  }
 0x846   :  { %6268 = vmatpush1.bf16.msra.mxu0 %v10238_v35  ;;  %6506 = vmatmul.mubr.bf16.gmra.mrb[64].mxu1 %v11555_v7  ;;  %v10305_v35 = vld [vmem:[#allocation14 + $0x5d4] ss:$12 sps:$4 sm:$0xff]  }
 0x847   :  { %8869 = vmatpush3.bf16.msra.mxu1 %v10242_v40  ;;  %6269 = vmatprep.subr.bf16.mxu0 %v10245_v23  ;;  %v10306_v40 = vld [vmem:[#allocation17 + $0xf8] sm:$0xff]  }
 0x848   :  { %8870 = vmatprep.subr.bf16.mxu1 %v10246_v34  ;;  %7420 = vmatprep.mubr.bf16.mxu1 %v6602_v54  ;;  %v10303_v23 = vld [vmem:[#allocation14 + $0x5d0] ss:$12 sps:$4 sm:$0xff]   ;;  %v10310_v54 = vld [vmem:[#allocation14 + $0x5ec] ss:$12 sps:$4 sm:$0xff]  }
 0x849   :  { %6255 = vmatmul.mubr.bf16.gmra.mrb[36].mxu0 %v11553_v0  ;;  %v10258_v0 = vld [vmem:[#allocation14 + $0x4f8] ss:$12 sps:$4 sm:$0xff]   ;;  %v10307_v34 = vld [vmem:[#allocation17 + $0xb8] sm:$0xff]  }
 0x84a   :  { %6270 = vmatpush1.bf16.msra.mxu0 %v10243_v50  ;;  %6297 = vmatprep.mubr.bf16.mxu0 %v11540_v55  ;;  %v10262_v55 = vld [vmem:[#allocation17 + $0x30] sm:$0xff]   ;;  %v6591_v50 = vld [vmem:[#allocation7 + $0x10] sm:$0xff] }
 0x84b   :  { %8871 = vmatpush3.bf16.msra.mxu1 %v10247_v43  ;;  %6271 = vmatprep.subr.bf16.mxu0 %v10250_v38  ;;  %v10311_v43 = vld [vmem:[#allocation17 + $0x140] sm:$0xff]   ;;  %v6594_v38 = vld [vmem:[#allocation7 + $0x28] sm:$0xff] }
 0x84c   :  { %8872 = vmatprep.subr.bf16.mxu1 %v10251_v51  ;;  %v10308_v51 = vld [vmem:[#allocation14 + $0x5e8] ss:$12 sps:$4 sm:$0xff]  }
 0x84e   :  { %6272 = vmatpush1.bf16.msra.mxu0 %v10248_v49  ;;  %v6603_v49 = vpack.c.bf16 %v6591_v50, %v6591_v50  ;;  %v10340_v50 = vld [vmem:[#allocation17 + $0x198] sm:$0xff]  }
 0x84f   :  { %8873 = vmatpush3.bf16.msra.mxu1 %v10252_v45  ;;  %6273 = vmatprep.subr.bf16.mxu0 %v10255_v6  ;;  %v10312_v45 = vld [vmem:[#allocation17 + $0x100] sm:$0xff]   ;;  %v6606_v6 = vpack.c.bf16 %v6594_v38, %v6594_v38 }
 0x850   :  { %8874 = vmatprep.subr.bf16.mxu1 %v10256_v53  ;;  %v10313_v53 = vld [vmem:[#allocation17 + $0x148] sm:$0xff]   ;;  %v10344_v38 = vld [vmem:[#allocation17 + $0x1a0] sm:$0xff]  }
 0x852   :  { %6274 = vmatpush1.bf16.msra.mxu0 %v10253_v59  ;;  %v10329_v59 = vld [vmem:[#allocation17 + $0x240] sm:$0xff]  }
 0x853   :  { %8875 = vmatpush3.bf16.msra.mxu1 %v10257_v62  ;;  %6275 = vmatprep.subr.bf16.mxu0 %v10260_v19  ;;  %v10330_v62 = vld [vmem:[#allocation17 + $0x200] sm:$0xff]   ;;  %v10314_v19 = vld [vmem:[#allocation17 + $0x108] sm:$0xff]  }
 0x854   :  { %8876 = vmatprep.subr.bf16.mxu1 %v10261_v60  ;;  %v10333_v60 = vld [vmem:[#allocation17 + $0x248] sm:$0xff]  }
 0x856   :  { %6276 = vmatpush1.bf16.msra.mxu0 %v10258_v0  ;;  %v10315_v0 = vld [vmem:[#allocation17 + $0x150] sm:$0xff]  }
 0x857   :  { %8877 = vmatpush3.bf16.msra.mxu1 %v10262_v55  ;;  %6277 = vmatprep.subr.bf16.mxu0 %v10265_v2  ;;  %v10334_v55 = vld [vmem:[#allocation17 + $0x208] sm:$0xff]   ;;  %v10316_v2 = vld [vmem:[#allocation17 + $0x110] sm:$0xff]  }
 0x858   :  { %8878 = vmatprep.subr.bf16.mxu1 %v10266_v3  ;;  %v10337_v3 = vld [vmem:[#allocation17 + $0x250] sm:$0xff]  }
 0x85a   :  { %6278 = vmatpush1.bf16.msra.mxu0 %v10263_v5  ;;  %v6598_v5 = vld [vmem:[#allocation7 + $0x48] sm:$0xff] }
 0x85b   :  { %8879 = vmatpush3.bf16.msra.mxu1 %v10267_v52  ;;  %6279 = vmatprep.subr.bf16.mxu0 %v10270_v11  ;;  %v10317_v52 = vld [vmem:[#allocation17 + $0x158] sm:$0xff]   ;;  %v10338_v11 = vld [vmem:[#allocation17 + $0x210] sm:$0xff]   ;;  %v6610_v21 = vpack.c.bf16 %v6598_v5, %v6598_v5 }
 0x85c   :  { %8886 = vmatprep.subr.bf16.mxu1 %v10271_v27  ;;  %v10318_v27 = vld [vmem:[#allocation17 + $0x118] sm:$0xff]   ;;  %v10363_v5 = vld [vmem:[#allocation17 + $0x2d0] sm:$0xff]  }
 0x85e   :  { %6280 = vmatpush1.bf16.msra.mxu0 %v10268_v46  ;;  %7421 = vmatmul.mubr.bf16.vlgmr.msra.gmra.mrb[68].mxu1 %v6601_v16  ;;  %v10320_v46 = vld [vmem:[#allocation17 + $0x120] sm:$0xff]  }
 0x85f   :  { %8887 = vmatpush3.bf16.msra.mxu1 %v10272_v17  ;;  %6281 = vmatprep.subr.bf16.mxu0 %v10275_v57  ;;  %v10345_v16 = vld [vmem:[#allocation17 + $0x260] sm:$0xff]   ;;  %v10321_v17 = vld [vmem:[#allocation17 + $0x168] sm:$0xff]  }
 0x860   :  { %8888 = vmatprep.subr.bf16.mxu1 %v10276_v24  ;;  %7460 = vmatprep.mubr.bf16.mxu1 %v6604_v18  ;;  %v10346_v57 = vld [vmem:[#allocation17 + $0x220] sm:$0xff]   ;;  %v10322_v24 = vld [vmem:[#allocation17 + $0x128] sm:$0xff]  }
 0x861   :  { %v10349_v18 = vld [vmem:[#allocation17 + $0x268] sm:$0xff]  }
 0x862   :  { %6282 = vmatpush1.bf16.msra.mxu0 %v10273_v20  ;;  %v10323_v20 = vld [vmem:[#allocation17 + $0x170] sm:$0xff]  }
 0x863   :  { %8889 = vmatpush3.bf16.msra.mxu1 %v10277_v56  ;;  %6283 = vmatprep.subr.bf16.mxu0 %v10280_v22  ;;  %v10350_v56 = vld [vmem:[#allocation17 + $0x228] sm:$0xff]   ;;  %v10353_v22 = vld [vmem:[#allocation17 + $0x270] sm:$0xff]  }
 0x864   :  { %8890 = vmatprep.subr.bf16.mxu1 %v10281_v41 }
 0x866   :  { %6284 = vmatpush1.bf16.msra.mxu0 %v10278_v25  ;;  %v10325_v25 = vld [vmem:[#allocation17 + $0x178] sm:$0xff]  }
 0x867   :  { %8891 = vmatpush3.bf16.msra.mxu1 %v10282_v44  ;;  %6285 = vmatprep.subr.bf16.mxu0 %v10285_v15 }
 0x868   :  { %8892 = vmatprep.subr.bf16.mxu1 %v10286_v26 }
 0x86a   :  { %6286 = vmatpush1.bf16.msra.mxu0 %v10283_v39  ;;  %v10354_v39 = vld [vmem:[#allocation17 + $0x230] sm:$0xff]  }
 0x86b   :  { %8893 = vmatpush3.bf16.msra.mxu1 %v10287_v29  ;;  %6287 = vmatprep.subr.bf16.mxu0 %v10290_v1  ;;  %v10326_v1 = vld [vmem:[#allocation17 + $0x138] sm:$0xff]  }
 0x86c   :  { %8894 = vmatprep.subr.bf16.mxu1 %v10291_v32  ;;  %v6593_v32 = vld [vmem:[#allocation7 + $0x20] sm:$0xff] }
 0x86e   :  { %6288 = vmatpush1.bf16.msra.mxu0 %v10288_v63  ;;  %v10357_v63 = vld [vmem:[#allocation17 + $0x278] sm:$0xff]  }
 0x86f   :  { %8895 = vmatpush3.bf16.msra.mxu1 %v10292_v61  ;;  %6289 = vmatprep.subr.bf16.mxu0 %v10295_v30  ;;  %v10327_v30 = vld [vmem:[#allocation17 + $0x1c0] sm:$0xff]  }
 0x870   :  { %8896 = vmatprep.subr.bf16.mxu1 %v10296_v33  ;;  %v6596_v33 = vld [vmem:[#allocation7 + $0x38] sm:$0xff] }
 0x872   :  { %6290 = vmatpush1.bf16.msra.mxu0 %v10293_v47  ;;  %v6605_v47 = vpack.c.bf16 %v6593_v32, %v6593_v32 }
 0x873   :  { %8897 = vmatpush3.bf16.msra.mxu1 %v10297_v31  ;;  %6291 = vmatprep.subr.bf16.mxu0 %v10300_v4  ;;  %v10358_v31 = vld [vmem:[#allocation17 + $0x238] sm:$0xff]   ;;  %v6597_v4 = vld [vmem:[#allocation7 + $0x40] sm:$0xff] }
 0x874   :  { %8898 = vmatprep.subr.bf16.mxu1 %v10301_v36  ;;  %v10328_v36 = vld [vmem:[#allocation17 + $0x180] sm:$0xff]  }
 0x876   :  { %6292 = vmatpush1.bf16.msra.mxu0 %v10298_v58  ;;  %v6608_v58 = vpack.c.bf16 %v6596_v33, %v6596_v33 }
 0x877   :  { %8899 = vmatpush3.bf16.msra.mxu1 %v10302_v48  ;;  %6293 = vmatprep.subr.bf16.mxu0 %v10305_v35  ;;  %v10331_v48 = vld [vmem:[#allocation17 + $0x1c8] sm:$0xff]   ;;  %v6609_v35 = vpack.c.bf16 %v6597_v4, %v6597_v4 }
 0x878   :  { %8900 = vmatprep.subr.bf16.mxu1 %v10306_v40  ;;  %v10332_v40 = vld [vmem:[#allocation17 + $0x188] sm:$0xff]  }
 0x87a   :  { %6294 = vmatpush1.bf16.msra.mxu0 %v10303_v23  ;;  %v10335_v23 = vld [vmem:[#allocation17 + $0x1d0] sm:$0xff]  }
 0x87b   :  { %8901 = vmatpush3.bf16.msra.mxu1 %v10307_v34  ;;  %6295 = vmatprep.subr.bf16.mxu0 %v10310_v54  ;;  %v10336_v34 = vld [vmem:[#allocation17 + $0x190] sm:$0xff]   ;;  %v10339_v54 = vld [vmem:[#allocation17 + $0x1d8] sm:$0xff]  }
 0x87c   :  { %8908 = vmatprep.subr.bf16.mxu1 %v10311_v43  ;;  %v10343_v43 = vld [vmem:[#allocation17 + $0x1e0] sm:$0xff]  }
 0x87e   :  { %6296 = vmatpush1.bf16.msra.mxu0 %v10308_v51  ;;  %7461 = vmatmul.mubr.bf16.vlgmr.msra.gmra.mrb[72].mxu1 %v6603_v49  ;;  %v10347_v51 = vld [vmem:[#allocation17 + $0x1e8] sm:$0xff]  }
 0x87f   :  { %8909 = vmatpush3.bf16.msra.mxu1 %v10312_v45  ;;  %7500 = vmatprep.mubr.bf16.mxu1 %v6606_v6  ;;  %v10348_v49 = vld [vmem:[#allocation17 + $0x1a8] sm:$0xff]   ;;  %v10351_v45 = vld [vmem:[#allocation17 + $0x1f0] sm:$0xff]  }
 0x880   :  { %8910 = vmatprep.subr.bf16.mxu1 %v10313_v53  ;;  %8952 = vmatprep.subr.bf16.mxu0 %v10329_v59  ;;  %v10352_v6 = vld [vmem:[#allocation17 + $0x1b0] sm:$0xff]   ;;  %v10356_v53 = vld [vmem:[#allocation17 + $0x1b8] sm:$0xff]   ;;  %v6595_v59 = vld [vmem:[#allocation7 + $0x30] sm:$0xff] }
 0x881   :  { %6298 = vmatmul.mubr.bf16.vlgmr.msra.gmra.mrb[32].mxu0 %v11536_v42  ;;  %v10319_v42 = vld [vmem:[#allocation17 + $0x160] sm:$0xff]  }
 0x882   :  { %6307 = vmatprep.mubr.bf16.mxu0 %v11560_v28  ;;  %8953 = vmatpush3.bf16.msra.mxu0 %v10330_v62  ;;  %v10342_v28 = vld [vmem:[#allocation17 + $0x218] sm:$0xff]   ;;  %v10359_v62 = vld [vmem:[#allocation17 + $0x2c0] sm:$0xff]  }
 0x883   :  { %8911 = vmatpush3.bf16.msra.mxu1 %v10314_v19  ;;  %8954 = vmatprep.subr.bf16.mxu0 %v10333_v60  ;;  %v6600_v19 = vld [vmem:[#allocation7 + $0x58] sm:$0xff]  ;;  %v6607_v60 = vpack.c.bf16 %v6595_v59, %v6595_v59 }
 0x884   :  { %8912 = vmatprep.subr.bf16.mxu1 %v10315_v0  ;;  %v10360_v0 = vld [vmem:[#allocation17 + $0x280] sm:$0xff]  }
 0x886   :  { %8955 = vmatpush3.bf16.msra.mxu0 %v10334_v55  ;;  %v6612_v55 = vpack.c.bf16 %v6600_v19, %v6600_v19 }
 0x887   :  { %8913 = vmatpush3.bf16.msra.mxu1 %v10316_v2  ;;  %8956 = vmatprep.subr.bf16.mxu0 %v10337_v3  ;;  %v10361_v2 = vld [vmem:[#allocation17 + $0x2c8] sm:$0xff]  }
 0x888   :  { %8914 = vmatprep.subr.bf16.mxu1 %v10317_v52  ;;  %v10362_v3 = vld [vmem:[#allocation17 + $0x288] sm:$0xff]   ;;  %v10364_v52 = vld [vmem:[#allocation17 + $0x290] sm:$0xff]  }
 0x889   :  { %6308 = vmatmul.mubr.bf16.gmra.mrb[36].mxu0 %v11555_v7  ;;  %v10324_v7 = vld [vmem:[#allocation17 + $0x130] sm:$0xff]  }
 0x88a   :  { %8957 = vmatpush3.bf16.msra.mxu0 %v10338_v11  ;;  %7580 = vmatprep.mubr.bf16.mxu0 %v6610_v21  ;;  %v10365_v11 = vld [vmem:[#allocation17 + $0x2d8] sm:$0xff]  }
 0x88b   :  { %8915 = vmatpush3.bf16.msra.mxu1 %v10318_v27  ;;  %8958 = vmatprep.subr.bf16.mxu0 %v10341_v14  ;;  %v10366_v21 = vld [vmem:[#allocation17 + $0x298] sm:$0xff]   ;;  %v10367_v27 = vld [vmem:[#allocation17 + $0x2e0] sm:$0xff]  }
 0x88c   :  { %8916 = vmatprep.subr.bf16.mxu1 %v10319_v42 }
 0x88e   :  { %8959 = vmatpush3.bf16.msra.mxu0 %v10342_v28 }
 0x88f   :  { %8917 = vmatpush3.bf16.msra.mxu1 %v10320_v46  ;;  %8960 = vmatprep.subr.bf16.mxu0 %v10345_v16  ;;  %v10368_v16 = vld [vmem:[#allocation17 + $0x2a0] sm:$0xff]  }
 0x890   :  { %8918 = vmatprep.subr.bf16.mxu1 %v10321_v17  ;;  %v11585_v17 = vld [vmem:[#allocation16] sm:$0x7] }
 0x892   :  { %8961 = vmatpush3.bf16.msra.mxu0 %v10346_v57 }
 0x893   :  { %8919 = vmatpush3.bf16.msra.mxu1 %v10322_v24  ;;  %8962 = vmatprep.subr.bf16.mxu0 %v10349_v18  ;;  %v10369_v24 = vld [vmem:[#allocation17 + $0x2e8] sm:$0xff]  }
 0x894   :  { %v8768_v41 = vpop.f32.mrb[36].mxu1  ;;  %8920 = vmatprep.subr.bf16.mxu1 %v10323_v20  ;;  %v5078_v20 = vrot.slane %v11585_v17, %v11074_v12 }
 0x895   :  { %v8769_v44 = vpop.f32.mrb[37].mxu1 }
 0x896   :  { %v11580_v15 = vadd.f32 %v8769_v44, %v8768_v41  ;;  %v8771_v26 = vpop.f32.mrb[38].mxu1  ;;  %8963 = vmatpush3.bf16.msra.mxu0 %v10350_v56  ;;  %v10370_v56 = vld [vmem:[#allocation17 + $0x2a8] sm:$0xff]  }
 0x897   :  { %8921 = vmatpush3.bf16.msra.mxu1 %v10324_v7  ;;  %v8772_v29 = vpop.f32.mrb[39].mxu1  ;;  %8964 = vmatprep.subr.bf16.mxu0 %v10353_v22  ;;  %v10371_v7 = vld [vmem:[#allocation17 + $0x2f0] sm:$0xff]  }
 0x898   :  { %v11582_v61 = vadd.f32 %v8772_v29, %v8771_v26  ;;  %8922 = vmatprep.subr.bf16.mxu1 %v10325_v25  ;;  %v6353_v25 = vadd.f32 %v11580_v15, %v5078_v20 }
 0x89a   :  { %8965 = vmatpush3.bf16.msra.mxu0 %v10354_v39  ;;  %v10372_v39 = vld [vmem:[#allocation17 + $0x2b0] sm:$0xff]   ;;  %v6356_v32 = vadd.f32 %v11582_v61, %v5078_v20 }
 0x89b   :  { %8923 = vmatpush3.bf16.msra.mxu1 %v10326_v1  ;;  %8966 = vmatprep.subr.bf16.mxu0 %v10357_v63  ;;  %v10373_v1 = vld [vmem:[#allocation17 + $0x2f8] sm:$0xff]  }
 0x89c   :  { %8930 = vmatprep.subr.bf16.mxu1 %v10327_v30 }
 0x89e   :  { %7501 = vmatmul.mubr.bf16.vlgmr.msra.gmra.mrb[76].mxu1 %v6605_v47  ;;  %8967 = vmatpush3.bf16.msra.mxu0 %v10358_v31  ;;  %v10374_v47 = vld [vmem:[#allocation17 + $0x2b8] sm:$0xff]   ;;  %v6599_v31 = vld [vmem:[#allocation7 + $0x50] sm:$0xff] }
 0x89f   :  { %8931 = vmatpush3.bf16.msra.mxu1 %v10328_v36  ;;  %7540 = vmatprep.mubr.bf16.mxu1 %v6608_v58  ;;  %v6611_v58 = vpack.c.bf16 %v6599_v31, %v6599_v31  ;;  %v10389_v31 = vld [vmem:[#allocation20 + $0x4c] ss:$12 sps:$4 sm:$0xff]  }
 0x8a0   :  { %8932 = vmatprep.subr.bf16.mxu1 %v10331_v48 }
 0x8a1   :  { %7581 = vmatmul.mubr.bf16.vlgmr.msra.gmra.mrb[40].mxu0 %v6609_v35 }
 0x8a2   :  { %7839 = vmatprep.mubr.bf16.mxu0 %v10821_v37  ;;  %v10355_v37 = vld [vmem:[#allocation17 + $0x1f8] sm:$0xff]  }
 0x8a3   :  { %8933 = vmatpush3.bf16.msra.mxu1 %v10332_v40 }
 0x8a4   :  { %8934 = vmatprep.subr.bf16.mxu1 %v10335_v23 }
 0x8a7   :  { %8935 = vmatpush3.bf16.msra.mxu1 %v10336_v34 }
 0x8a8   :  { %8936 = vmatprep.subr.bf16.mxu1 %v10339_v54 }
 0x8ab   :  { %8937 = vmatpush3.bf16.msra.mxu1 %v10340_v50 }
 0x8ac   :  { %8938 = vmatprep.subr.bf16.mxu1 %v10343_v43 }
 0x8af   :  { %8939 = vmatpush3.bf16.msra.mxu1 %v10344_v38 }
 0x8b0   :  { %8940 = vmatprep.subr.bf16.mxu1 %v10347_v51 }
 0x8b3   :  { %8941 = vmatpush3.bf16.msra.mxu1 %v10348_v49 }
 0x8b4   :  { %8942 = vmatprep.subr.bf16.mxu1 %v10351_v45 }
 0x8b7   :  { %8943 = vmatpush3.bf16.msra.mxu1 %v10352_v6 }
 0x8b8   :  { %8944 = vmatprep.subr.bf16.mxu1 %v10355_v37 }
 0x8bb   :  { %8945 = vmatpush3.bf16.msra.mxu1 %v10356_v53 }
 0x8bc   :  { %8974 = vmatprep.subr.bf16.mxu1 %v10359_v62 }
 0x8be   :  { %7541 = vmatmul.mubr.bf16.vlgmr.msra.gmra.mrb[80].mxu1 %v6607_v60 }
 0x8bf   :  { %8975 = vmatpush3.bf16.msra.mxu1 %v10360_v0  ;;  %7620 = vmatprep.mubr.bf16.mxu1 %v6612_v55 }
 0x8c0   :  { %8976 = vmatprep.subr.bf16.mxu1 %v10361_v2 }
 0x8c3   :  { %8977 = vmatpush3.bf16.msra.mxu1 %v10362_v3 }
 0x8c4   :  { %8978 = vmatprep.subr.bf16.mxu1 %v10363_v5 }
 0x8c7   :  { %8979 = vmatpush3.bf16.msra.mxu1 %v10364_v52 }
 0x8c8   :  { %8980 = vmatprep.subr.bf16.mxu1 %v10365_v11 }
 0x8c9   :  { %v8774_v14 = vpop.f32.mrb[40].mxu1 }
 0x8ca   :  { %v8775_v42 = vpop.f32.mrb[41].mxu1 }
 0x8cb   :  { %v8776_v28 = vadd.f32 %v8775_v42, %v8774_v14  ;;  %8981 = vmatpush3.bf16.msra.mxu1 %v10366_v21  ;;  %v8777_v46 = vpop.f32.mrb[42].mxu1 }
 0x8cc   :  { %v8778_v57 = vpop.f32.mrb[43].mxu1  ;;  %8982 = vmatprep.subr.bf16.mxu1 %v10367_v27 }
 0x8cd   :  { %v8779_v18 = vadd.f32 %v8778_v57, %v8777_v46  ;;  %v6361_v15 = vadd.f32 %v8776_v28, %v5078_v20  ;;  %v10375_v28 = vld [vmem:[#allocation20] ss:$12 sps:$4 sm:$0xff]   ;;  %v10377_v46 = vld [vmem:[#allocation20 + $0x4] ss:$12 sps:$4 sm:$0xff]   ;;  %v10378_v57 = vld [vmem:[#allocation20 + $0x8] ss:$12 sps:$4 sm:$0xff]  }
 0x8ce   :  { %7807 = vmatprep.subr.bf16.mxu0 %v10377_v46 }
 0x8cf   :  { %8983 = vmatpush3.bf16.msra.mxu1 %v10368_v16  ;;  %v6364_v23 = vadd.f32 %v8779_v18, %v5078_v20  ;;  %v10822_v16 = vmov 0.0   ;;  %7808 = vmatpush1.bf16.msra.mxu0 %v10375_v28 }
 0x8d0   :  { %8984 = vmatprep.subr.bf16.mxu1 %v10369_v24  ;;  %v10381_v24 = vld [vmem:[#allocation20 + $0x1c] ss:$12 sps:$4 sm:$0xff]  }
 0x8d1   :  { %v8796_v22 = vpop.f32.mrb[44].mxu1  ;;  %7809 = vmatprep.subr.bf16.mxu0 %v10381_v24 }
 0x8d2   :  { %v8797_v41 = vpop.f32.mrb[45].mxu1 }
 0x8d3   :  { %v8798_v44 = vadd.f32 %v8797_v41, %v8796_v22  ;;  %8985 = vmatpush3.bf16.msra.mxu1 %v10370_v56  ;;  %v8799_v26 = vpop.f32.mrb[46].mxu1  ;;  %v10379_v22 = vld [vmem:[#allocation20 + $0x18] ss:$12 sps:$4 sm:$0xff]   ;;  %v10382_v41 = vld [vmem:[#allocation20 + $0x20] ss:$12 sps:$4 sm:$0xff]  }
 0x8d4   :  { %v8800_v29 = vpop.f32.mrb[47].mxu1  ;;  %8986 = vmatprep.subr.bf16.mxu1 %v10371_v7  ;;  %7810 = vmatpush1.bf16.msra.mxu0 %v10379_v22 }
 0x8d5   :  { %v6402_v63 = vadd.f32 %v8798_v44, %v6353_v25  ;;  %v8801_v30 = vadd.f32 %v8800_v29, %v8799_v26 }
 0x8d7   :  { %v6405_v33 = vadd.f32 %v8801_v30, %v6356_v32  ;;  %8987 = vmatpush3.bf16.msra.mxu1 %v10372_v39  ;;  %v10385_v39 = vld [vmem:[#allocation20 + $0x34] ss:$12 sps:$4 sm:$0xff]   ;;  %v10386_v30 = vld [vmem:[#allocation20 + $0x38] ss:$12 sps:$4 sm:$0xff]  }
 0x8d8   :  { %8988 = vmatprep.subr.bf16.mxu1 %v10373_v1  ;;  %7811 = vmatprep.subr.bf16.mxu0 %v10385_v39 }
 0x8d9   :  { %v8802_v4 = vpop.f32.mrb[48].mxu1 }
 0x8da   :  { %v8803_v36 = vpop.f32.mrb[49].mxu1 }
 0x8db   :  { %v8804_v48 = vadd.f32 %v8803_v36, %v8802_v4  ;;  %8989 = vmatpush3.bf16.msra.mxu1 %v10374_v47  ;;  %v8805_v35 = vpop.f32.mrb[50].mxu1 }
 0x8dc   :  { %v8806_v40 = vpop.f32.mrb[51].mxu1  ;;  %9117 = vmatprep.subr.bf16.mxu1 %v10822_v16 }
 0x8dd   :  { %v6410_v34 = vadd.f32 %v8804_v48, %v6361_v15  ;;  %v8807_v54 = vadd.f32 %v8806_v40, %v8805_v35  ;;  %v10390_v15 = vld [vmem:[#allocation20 + $0x50] ss:$12 sps:$4 sm:$0xff]   ;;  %v10391_v40 = vld [vmem:[#allocation20 + $0x60] ss:$12 sps:$4 sm:$0xff]  }
 0x8de   :  { %7621 = vmatmul.mubr.bf16.vlgmr.msra.gmra.mrb[84].mxu1 %v6611_v58  ;;  %v10387_v58 = vld [vmem:[#allocation20 + $0x48] ss:$12 sps:$4 sm:$0xff]   ;;  %v10393_v35 = vld [vmem:[#allocation20 + $0x64] ss:$12 sps:$4 sm:$0xff]  }
 0x8df   :  { %v6413_v61 = vadd.f32 %v8807_v54, %v6364_v23  ;;  %9118 = vmatpush3.bf16.msra.mxu1 %v10378_v57  ;;  %v10394_v23 = vld [vmem:[#allocation20 + $0x68] ss:$12 sps:$4 sm:$0xff]   ;;  %v10395_v54 = vld [vmem:[#allocation20 + $0x78] ss:$12 sps:$4 sm:$0xff]   ;;  %9133 = vmatprep.mubr.msk.bf16.mxu1 %vm10823_vm6, %v10822_v16 }
 0x8e0   :  { %9119 = vmatprep.subr.bf16.mxu1 %v10822_v16 }
 0x8e3   :  { %9120 = vmatpush3.bf16.msra.mxu1 %v10382_v41 }
 0x8e4   :  { %9121 = vmatprep.subr.bf16.mxu1 %v10822_v16 }
 0x8e7   :  { %9122 = vmatpush3.bf16.msra.mxu1 %v10386_v30 }
 0x8e8   :  { %9123 = vmatprep.subr.bf16.mxu1 %v10822_v16 }
 0x8eb   :  { %9124 = vmatpush3.bf16.msra.mxu1 %v10390_v15 }
 0x8ec   :  { %9125 = vmatprep.subr.bf16.mxu1 %v10822_v16 }
 0x8ef   :  { %9126 = vmatpush3.bf16.msra.mxu1 %v10394_v23 }
 0x8f0   :  { %9127 = vmatprep.subr.bf16.mxu1 %v10822_v16 }
 0x8f1   :  { %v8824_v50 = vpop.f32.mrb[52].mxu1 }
 0x8f2   :  { %v8825_v43 = vpop.f32.mrb[53].mxu1 }
 0x8f3   :  { %v8826_v38 = vadd.f32 %v8825_v43, %v8824_v50  ;;  %v8827_v51 = vpop.f32.mrb[54].mxu1  ;;  %v10401_v43 = vld [vmem:[#allocation20 + $0x94] ss:$12 sps:$4 sm:$0xff]  }
 0x8f4   :  { %v8828_v49 = vpop.f32.mrb[55].mxu1 }
 0x8f5   :  { %v6451_v45 = vadd.f32 %v8826_v38, %v6402_v63  ;;  %v8829_v6 = vadd.f32 %v8828_v49, %v8827_v51  ;;  %v10383_v63 = vld [vmem:[#allocation20 + $0x30] ss:$12 sps:$4 sm:$0xff]   ;;  %v10402_v49 = vld [vmem:[#allocation20 + $0x98] ss:$12 sps:$4 sm:$0xff]  }
 0x8f6   :  { %7812 = vmatpush1.bf16.msra.mxu0 %v10383_v63  ;;  %v10399_v51 = vld [vmem:[#allocation20 + $0x90] ss:$12 sps:$4 sm:$0xff]  }
 0x8f7   :  { %v6454_v37 = vadd.f32 %v8829_v6, %v6405_v33  ;;  %7813 = vmatprep.subr.bf16.mxu0 %v10389_v31 }
 0x8f9   :  { %v8830_v53 = vpop.f32.mrb[56].mxu1 }
 0x8fa   :  { %v8831_v59 = vpop.f32.mrb[57].mxu1  ;;  %7814 = vmatpush1.bf16.msra.mxu0 %v10387_v58 }
 0x8fb   :  { %v8832_v62 = vadd.f32 %v8831_v59, %v8830_v53  ;;  %v8833_v19 = vpop.f32.mrb[58].mxu1  ;;  %7815 = vmatprep.subr.bf16.mxu0 %v10393_v35  ;;  %v10405_v53 = vld [vmem:[#allocation20 + $0xac] ss:$12 sps:$4 sm:$0xff]   ;;  %v10403_v59 = vld [vmem:[#allocation20 + $0xa8] ss:$12 sps:$4 sm:$0xff]  }
 0x8fc   :  { %v8834_v60 = vpop.f32.mrb[59].mxu1 }
 0x8fd   :  { %v6459_v0 = vadd.f32 %v8832_v62, %v6410_v34  ;;  %v8835_v55 = vadd.f32 %v8834_v60, %v8833_v19  ;;  %v10397_v34 = vld [vmem:[#allocation20 + $0x7c] ss:$12 sps:$4 sm:$0xff]  }
 0x8fe   :  { %7816 = vmatpush1.bf16.msra.mxu0 %v10391_v40  ;;  %v10406_v62 = vld [vmem:[#allocation20 + $0xb0] ss:$12 sps:$4 sm:$0xff]  }
 0x8ff   :  { %v6462_v2 = vadd.f32 %v8835_v55, %v6413_v61  ;;  %v10398_v61 = vld [vmem:[#allocation20 + $0x80] ss:$12 sps:$4 sm:$0xff]   ;;  %7817 = vmatprep.subr.bf16.mxu0 %v10397_v34  ;;  %v8567_v19 = vld [vmem:[#allocation19] ss:$0 sm:$0xff] }
 0x900   :  { %9128 = vmatpush3.bf16.msra.mxu1 %v10398_v61 }
 0x901   :  { %9129 = vmatprep.subr.bf16.mxu1 %v10822_v16 }
 0x902   :  { %7818 = vmatpush1.bf16.msra.mxu0 %v10395_v54 }
 0x903   :  { %7819 = vmatprep.subr.bf16.mxu0 %v10401_v43 }
 0x904   :  { %9130 = vmatpush3.bf16.msra.mxu1 %v10402_v49 }
 0x905   :  { %9131 = vmatprep.subr.bf16.mxu1 %v10822_v16 }
 0x906   :  { %7820 = vmatpush1.bf16.msra.mxu0 %v10399_v51 }
 0x907   :  { %7821 = vmatprep.subr.bf16.mxu0 %v10405_v53 }
 0x908   :  { %9132 = vmatpush3.bf16.msra.mxu1 %v10406_v62 }
 0x90a   :  { %7822 = vmatpush1.bf16.msra.mxu0 %v10403_v59 }
 0x911   :  { %v8852_v3 = vpop.f32.mrb[60].mxu1 }
 0x912   :  { %v8853_v5 = vpop.f32.mrb[61].mxu1 }
 0x913   :  { %v8854_v52 = vadd.f32 %v8853_v5, %v8852_v3  ;;  %v8855_v11 = vpop.f32.mrb[62].mxu1 }
 0x914   :  { %v8856_v21 = vpop.f32.mrb[63].mxu1 }
 0x915   :  { %v6500_v27 = vadd.f32 %v8854_v52, %v6451_v45  ;;  %v8857_v14 = vadd.f32 %v8856_v21, %v8855_v11 }
 0x917   :  { %v6503_v42 = vadd.f32 %v8857_v14, %v6454_v37  ;;  %v6516_v18 = vmax.f32 %v6500_v27, 0.0 }
 0x919   :  { %v6519_v20 = vmax.f32 %v6503_v42, 0.0  ;;  %v8858_v56 = vpop.f32.mrb[64].mxu1 }
 0x91a   :  { %v8859_v7 = vpop.f32.mrb[65].mxu1 }
 0x91b   :  { %v6544_v25 = vadd.f32 %v6519_v20, %v6516_v18  ;;  %v8860_v44 = vadd.f32 %v8859_v7, %v8858_v56  ;;  %v8861_v26 = vpop.f32.mrb[66].mxu1 }
 0x91c   :  { %v8862_v29 = vpop.f32.mrb[67].mxu1 }
 0x91d   :  { %v6508_v1 = vadd.f32 %v8860_v44, %v6459_v0  ;;  %v8863_v32 = vadd.f32 %v8862_v29, %v8861_v26  ;;  %v5070_v0 = vrot.slane %v11585_v17, %v11071_v10 }
 0x91f   :  { %v6522_v33 = vmax.f32 %v6508_v1, 0.0  ;;  %v6511_v47 = vadd.f32 %v8863_v32, %v6462_v2  ;;  %v5074_v2 = vrot.slane %v11585_v17, %v11077_v13 }
 0x921   :  { %v6545_v4 = vadd.f32 %v6544_v25, %v6522_v33  ;;  %v6525_v36 = vmax.f32 %v6511_v47, 0.0 }
 0x923   :  { %v11594_v48 = vadd.f32 %v6545_v4, %v6525_v36 }
 0x925   :  { %v6547_v56 = vrot.slane %v11594_v48, 4 }
 0x927   :  { %v6548_v39 = vadd.f32 %v6547_v56, %v11594_v48 }
 0x929   :  { %v6549_v36 = vrot.slane %v6548_v39, 2 }
 0x92b   :  { %v6550_v34 = vadd.f32 %v6549_v36, %v6548_v39 }
 0x92d   :  { %v6551_v43 = vrot.slane %v6550_v34, 1 }
 0x92f   :  { %v6552_v53 = vadd.f32 %v6551_v43, %v6550_v34 }
 0x931   :  { %v8880_v50 = vpop.f32.mrb[68].mxu1 }
 0x932   :  { %v8881_v38 = vpop.f32.mrb[69].mxu1 }
 0x933   :  { %v8882_v45 = vadd.f32 %v8881_v38, %v8880_v50  ;;  %v8883_v6 = vpop.f32.mrb[70].mxu1  ;;  %v10824_v38 = vmov 1966171168  }
 0x934   :  { %v8884_v37 = vpop.f32.mrb[71].mxu1  ;;  %v6562_v51 = vunpack.c.l.s4 %v10824_v38 }
 0x935   :  { %v7423_v3 = vadd.f32 %v8882_v45, %v8567_v19 }
 0x936   :  { %v6563_v59 = vunpack.c.0.s8 %v6562_v51 }
 0x951   :  { %v8902_v60 = vpop.f32.mrb[72].mxu1 }
 0x952   :  { %v8903_v55 = vpop.f32.mrb[73].mxu1 }
 0x953   :  { %v8904_v5 = vadd.f32 %v8903_v55, %v8902_v60  ;;  %v8905_v52 = vpop.f32.mrb[74].mxu1 }
 0x954   :  { %v6299_v11 = vpop.f32.mrb[32].mxu0  ;;  %v8906_v21 = vpop.f32.mrb[75].mxu1 }
 0x955   :  { %v7463_v27 = vadd.f32 %v8904_v5, %v7423_v3  ;;  %v9233_v14 = vadd.f32 %v6299_v11, %v5070_v0  ;;  %v6301_v42 = vpop.f32.mrb[33].mxu0  ;;  %v6566_v3 = vsub.s32 %v6563_v59, %v11068_v9 }
 0x956   :  { %v9234_v28 = vadd.f32 %v6301_v42, %v5074_v2  ;;  %v6303_v46 = vpop.f32.mrb[34].mxu0 }
 0x957   :  { %v9235_v16 = vadd.f32 %v6303_v46, %v5070_v0  ;;  %v6305_v57 = vpop.f32.mrb[35].mxu0  ;;  %v6514_v18 = vmax.f32 %v9233_v14, 0.0 }
 0x958   :  { %v9236_v24 = vadd.f32 %v6305_v57, %v5074_v2  ;;  %v6515_v7 = vmax.f32 %v9234_v28, 0.0 }
 0x959   :  { %v6517_v20 = vmax.f32 %v9235_v16, 0.0 }
 0x95a   :  { %v6518_v22 = vmax.f32 %v9236_v24, 0.0 }
 0x95b   :  { %v6526_v17 = vadd.f32 %v6517_v20, %v6514_v18 }
 0x95c   :  { %v6535_v41 = vadd.f32 %v6518_v22, %v6515_v7  ;;  %v6309_v25 = vpop.f32.mrb[36].mxu0 }
 0x95d   :  { %v9237_v44 = vadd.f32 %v6309_v25, %v5070_v0  ;;  %v6311_v26 = vpop.f32.mrb[37].mxu0 }
 0x95e   :  { %v9238_v29 = vadd.f32 %v6311_v26, %v5074_v2  ;;  %v6313_v1 = vpop.f32.mrb[38].mxu0 }
 0x95f   :  { %v6520_v32 = vmax.f32 %v9237_v44, 0.0  ;;  %v9239_v63 = vadd.f32 %v6313_v1, %v5070_v0  ;;  %v6315_v30 = vpop.f32.mrb[39].mxu0 }
 0x960   :  { %v6521_v33 = vmax.f32 %v9238_v29, 0.0  ;;  %v9240_v47 = vadd.f32 %v6315_v30, %v5074_v2  ;;  %v6556_v2 = vmul.f32 0.03125, %v6552_v53 }
 0x961   :  { %v6527_v31 = vadd.f32 %v6526_v17, %v6520_v32  ;;  %v6523_v4 = vmax.f32 %v9239_v63, 0.0 }
 0x962   :  { %v6536_v58 = vadd.f32 %v6535_v41, %v6521_v33  ;;  %v6524_v15 = vmax.f32 %v9240_v47, 0.0  ;;  %v6574_v57 = vrot.slane %v6556_v2, %v6566_v3  ;;  %v7662_v47 = vld [vmem:[#allocation22] sm:$0x7] }
 0x963   :  { %v6528_v35 = vadd.f32 %v6527_v31, %v6523_v4  ;;  %v7667_v31 = vrot.slane %v7662_v47, %v11071_v10  ;;  %v7675_v4 = vrot.slane %v7662_v47, %v11074_v12  ;;  %v7671_v36 = vrot.slane %v7662_v47, %v11077_v13 }
 0x964   :  { %v6537_v40 = vadd.f32 %v6536_v58, %v6524_v15 }
 0x965   :  { %v6529_v23 = vrot.slane %v6528_v35, 4 }
 0x966   :  { %v6538_v54 = vrot.slane %v6537_v40, 4 }
 0x967   :  { %v6530_v61 = vadd.f32 %v6529_v23, %v6528_v35 }
 0x968   :  { %v6539_v50 = vadd.f32 %v6538_v54, %v6537_v40 }
 0x969   :  { %v6531_v48 = vrot.slane %v6530_v61, 2 }
 0x96a   :  { %v6540_v49 = vrot.slane %v6539_v50, 2 }
 0x96b   :  { %v6532_v45 = vadd.f32 %v6531_v48, %v6530_v61 }
 0x96c   :  { %v6541_v6 = vadd.f32 %v6540_v49, %v6539_v50 }
 0x96d   :  { %v6533_v37 = vrot.slane %v6532_v45, 1 }
 0x96e   :  { %v6542_v62 = vrot.slane %v6541_v6, 1 }
 0x96f   :  { %v6534_v19 = vadd.f32 %v6533_v37, %v6532_v45 }
 0x970   :  { %v6543_v60 = vadd.f32 %v6542_v62, %v6541_v6 }
 0x971   :  { %v6554_v0 = vmul.f32 0.03125, %v6534_v19  ;;  %v8924_v55 = vpop.f32.mrb[76].mxu1 }
 0x972   :  { %v6555_v5 = vmul.f32 0.03125, %v6543_v60  ;;  %v8925_v52 = vpop.f32.mrb[77].mxu1 }
 0x973   :  { %v8926_v11 = vadd.f32 %v8925_v52, %v8924_v55  ;;  %v8927_v21 = vpop.f32.mrb[78].mxu1 }
 0x974   :  { %v6560_v14 = vcombine.low %v6554_v0, %v6555_v5  ;;  %v8928_v42 = vpop.f32.mrb[79].mxu1  ;;  %v8968_v28 = vpop.f32.mrb[40].mxu0 }
 0x975   :  { %v7503_v46 = vadd.f32 %v8926_v11, %v7463_v27  ;;  %v8969_v16 = vpop.f32.mrb[41].mxu0 }
 0x976   :  { %v6567_v24 = vrot.slane %v6560_v14, %v6566_v3  ;;  %v8970_v18 = vadd.f32 %v8969_v16, %v8968_v28  ;;  %v8971_v20 = vpop.f32.mrb[42].mxu0 }
 0x977   :  { %v8972_v56 = vpop.f32.mrb[43].mxu0 }
 0x978   :  { %v6575_v7 = vcombine.low %v6567_v24, %v6574_v57 }
 0x97a   :  { %v6582_v22 = vrot.slane %v6575_v7, %v6566_v3 }
 0x97c   :  { %6588 = vst.msk [vmem:[%s11641_s13] sm:$0x7] %vm6586_vm7, %v6582_v22  ;;  %s10825_s13 = smov [#allocation23]  }
 0x97d   :  { %s7902_s7 = sshll.u32 %s10825_s13, 4  ;;  %s7903_s7 = int_to_ptr.vmem [resolvable:$true] %s7902_s7 }
 0x97e   :  { %s10758_s5 = scalar_lea.vmem %s7903_s7, 384  ;;  %p10763_p7 = scmp.lt.s32.totalorder %s7903_s7, %s7903_s7 }
 0x97f   :  { %p10759_p6 = scmp.ne.s32.totalorder %s7903_s7, %s10758_s5  ;;  %p10764_p8 = scmp.lt.s32.totalorder %s10758_s5, %s10758_s5 }
 0x981   :  { %p10765_p9 = por %p10764_p8, %p10763_p7 }
 0x983   :  { %p10766_p10 = pnand %p10765_p9, %p10759_p6 }
 0x991   :  { %v8946_v9 = vpop.f32.mrb[80].mxu1 }
 0x992   :  { %v8947_v17 = vpop.f32.mrb[81].mxu1 }
 0x993   :  { %v8948_v41 = vadd.f32 %v8947_v17, %v8946_v9  ;;  %v8949_v25 = vpop.f32.mrb[82].mxu1 }
 0x994   :  { %v8950_v44 = vpop.f32.mrb[83].mxu1 }
 0x995   :  { %v7543_v27 = vadd.f32 %v8948_v41, %v7503_v46 }
 0x997   :  { %v7583_v26 = vadd.f32 %v8970_v18, %v7543_v27 }
 0x9b1   :  { %v8990_v39 = vpop.f32.mrb[84].mxu1 }
 0x9b2   :  { %v8991_v29 = vpop.f32.mrb[85].mxu1 }
 0x9b3   :  { %v8992_v1 = vadd.f32 %v8991_v29, %v8990_v39  ;;  %v8993_v32 = vpop.f32.mrb[86].mxu1 }
 0x9b4   :  { %v8994_v63 = vpop.f32.mrb[87].mxu1 }
 0x9b5   :  { %v7623_v30 = vadd.f32 %v8992_v1, %v7583_v26 }
 0x9b7   :  { %v7628_v33 = vmax.f32 %v7623_v30, 0.0 }
 0x9b9   :  { %v7629_v8 = vpack.c.bf16 %v7628_v33, %v7628_v33 }
 0x9bb   :  { %7840 = vmatmul.mubr.bf16.vlgmr.msra.gmra.mrb[44].mxu0 %v7629_v8  ;;  %9134 = vmatmul.mubr.bf16.vlgmr.msra.gmra.mrb[88].mxu1 %v7629_v8 }
 0xa8e   :  { %v7841_v58 = vpop.f32.mrb[44].mxu0  ;;  %v7882_v15 = vpop.f32.mrb[88].mxu1 }
 0xa8f   :  { %v7842_v35 = vadd.f32 %v7841_v58, %v7667_v31  ;;  %v7883_v40 = vadd.f32 %v7882_v15, %v7675_v4  ;;  %v7843_v23 = vpop.f32.mrb[45].mxu0  ;;  %v9135_v34 = vpop.f32.mrb[89].mxu1 }
 0xa90   :  { %v7844_v54 = vadd.f32 %v7843_v23, %v7671_v36  ;;  %v7845_v61 = vpop.f32.mrb[46].mxu0  ;;  %v7885_v50 = vpop.f32.mrb[90].mxu1 }
 0xa91   :  { %v7888_v48 = vmax.f32 %v7842_v35, 0.0  ;;  %v7890_v43 = vmax.f32 %v7883_v40, 0.0  ;;  %v7846_v38 = vpop.f32.mrb[47].mxu0  ;;  %v9136_v51 = vpop.f32.mrb[91].mxu1 }
 0xa92   :  { %v7889_v10 = vmax.f32 %v7844_v54, 0.0 }
 0xa93   :  { %7891 = vst [vmem:[#allocation23] sm:$0xff] %v7888_v48  ;;  %7893 = vst [vmem:[#allocation23 + $0x10] sm:$0xff] %v7890_v43 }
 0xa94   :  { %7892 = vst [vmem:[#allocation23 + $0x8] sm:$0xff] %v7889_v10 }
 0xa95   :  { %10769 = shalt.err (!%p10766_p10)
}
 0xa96   :  { %s10770_s16 = scalar_lea.hbm %s11642_s14, 384 }
 0xa97   :  { %p10771_p11 = scmp.ne.s32.totalorder %s11642_s14, %s10770_s16  ;;  %p10774_p12 = scmp.lt.u32.totalorder %s10770_s16, %s11642_s14 }
 0xa99   :  { %p10776_p13 = pnand %p10774_p12, %p10771_p11 }
 0xa9b   :  { %10779 = shalt.err (!%p10776_p13)
}
 0xa9c   :  { %7905 = dma.vmem_to_hbm [thread:$0]  %s7903_s7, 384, %s11642_s14, [#allocation4]  }
 0xa9d   :  { %10794 = dma.done.wait [#allocation4], 384  }
 0xa9e   :  { %10795 = vsyncadd [#allocation4], 4294966912 }
 0xa9f   :  { %7911 = vsyncpa [#allocation3], 1 }
 0xaa0   :  { %7912 = vsyncpa [#allocation6], 1 }
 0xaa1   :  { %7913 = vsyncpa [#allocation9], 1 }
 0xaa2   :  { %7914 = vsyncpa [#allocation12], 1 }
 0xaa3   :  { %7915 = vsyncpa [#allocation15], 1 }
 0xaa4   :  { %7916 = vsyncpa [#allocation18], 1 }
 0xaa5   :  { %7917 = vsyncpa [#allocation21], 1 }
 0xaa6   :  { %7918 = vsyncpa [#allocation4], 1 }

</bundles_post_ra>
